<compile_context>
chip_gen: v6e
topology: v6e:2x2x1
jax: 0.10.0
libtpu: 0.0.40
codegen_flags: <defaults>
</compile_context>

<pallas_src>
import functools

import jax
import jax.numpy as jnp
from jax.experimental import pallas as pl
from jax.experimental.pallas import tpu as pltpu


# ---------------------------------------------------------------------------
# One fused kernel: all bidirectional LSTM layers (PyTorch nn.LSTM semantics,
# gate order i, f, g, o; zero initial (h0, c0)) + fc1 -> fc2 -> log_softmax.
# ---------------------------------------------------------------------------
def _lstm_net_kernel(*refs, hidden_size, seq_len, batch, layer_num):
    H, T, B = hidden_size, seq_len, batch
    n_in = 1 + 3 * layer_num + 4

    x2d_ref = refs[0]                                   # (T*B, E) bf16, time-major
    layer_w = [refs[1 + 3 * l: 4 + 3 * l] for l in range(layer_num)]
    w1_ref, b1_ref, w2_ref, b2_ref = refs[1 + 3 * layer_num: n_in]
    out_ref = refs[n_in]                                # (B, C) f32
    act_ref, ix_ref = refs[n_in + 1:]
    # act_ref: (T*B, 2H) f32  per-layer bidirectional output, time-major rows
    # ix_ref:  (T*B, 8H) f32  hoisted x @ [Wih_f | Wih_b] + b, both directions

    for l in range(layer_num):
        wih_ref, whh_ref, b_ref = layer_w[l]

        # ---- hoisted input projection: ONE MXU matmul + ONE full-width store
        if l == 0:
            xin = x2d_ref[...]                          # (T*B, E) bf16
        else:
            xin = act_ref[...].astype(jnp.bfloat16)     # (T*B, 2H)
        ix_ref[...] = jnp.dot(xin, wih_ref[...],
                              preferred_element_type=jnp.float32) + b_ref[...]

        whh = whh_ref[...]                              # (2H, 8H) bf16, block-diag

        # loop-carried register state: [h_f | h_b] and per-direction cell state
        # (no per-step VMEM loads/stores on the serial chain).
        h = jnp.zeros((B, 2 * H), jnp.float32)
        c_f = jnp.zeros((B, H), jnp.float32)
        c_b = jnp.zeros((B, H), jnp.float32)

        # T is small & static: full unroll (Python loop) gives the LLO scheduler
        # cross-iteration visibility so fwd/bwd work of adjacent steps overlaps.
        # TODO(synk): if T grows beyond ~32, switch to lax.fori_loop with partial
        #             unroll + pl.ds indexing to bound code size / vreg liveness.
        for t in range(T):
            tr = T - 1 - t
            # one fused recurrent matmul per step (block-diag Whh, K = 2H = 256)
            g_hh = jnp.dot(h.astype(jnp.bfloat16), whh,
                           preferred_element_type=jnp.float32)      # (B, 8H)
            g_f = g_hh[:, 0:4 * H] + ix_ref[t * B:(t + 1) * B, 0:4 * H]
            g_b = g_hh[:, 4 * H:8 * H] + ix_ref[tr * B:(tr + 1) * B, 4 * H:8 * H]
            # gate order i, f, g, o (PyTorch nn.LSTM)
            i_f = jax.nn.sigmoid(g_f[:, 0 * H:1 * H])
            f_f = jax.nn.sigmoid(g_f[:, 1 * H:2 * H])
            gg_f = jnp.tanh(g_f[:, 2 * H:3 * H])
            o_f = jax.nn.sigmoid(g_f[:, 3 * H:4 * H])
            i_b = jax.nn.sigmoid(g_b[:, 0 * H:1 * H])
            f_b = jax.nn.sigmoid(g_b[:, 1 * H:2 * H])
            gg_b = jnp.tanh(g_b[:, 2 * H:3 * H])
            o_b = jax.nn.sigmoid(g_b[:, 3 * H:4 * H])
            c_f = f_f * c_f + i_f * gg_f
            c_b = f_b * c_b + i_b * gg_b
            h_f = o_f * jnp.tanh(c_f)
            h_b = o_b * jnp.tanh(c_b)
            h = jnp.concatenate([h_f, h_b], axis=-1)    # lane concat @ 128-aligned
            act_ref[t * B:(t + 1) * B, 0:H] = h_f       # forward output @ t
            act_ref[tr * B:(tr + 1) * B, H:2 * H] = h_b  # backward output @ tr

    # ---- fused head: fc1 -> fc2 -> log_softmax on out[:, -1, :] ----
    # bf16 MXU operands, f32 accumulation / biases / softmax.
    last = act_ref[(T - 1) * B:T * B, :].astype(jnp.bfloat16)        # (B, 2H)
    h1 = jnp.dot(last, w1_ref[...],
                 preferred_element_type=jnp.float32) + b1_ref[...]
    logits = jnp.dot(h1.astype(jnp.bfloat16), w2_ref[...],
                     preferred_element_type=jnp.float32) + b2_ref[...]
    m = jnp.max(logits, axis=-1, keepdims=True)
    z = logits - m
    lse = jnp.log(jnp.sum(jnp.exp(z), axis=-1, keepdims=True))
    out_ref[...] = z - lse


def _block_diag(a, b):
    """[[a, 0], [0, b]] for 2D blocks (block-diagonal recurrent weight)."""
    za = jnp.zeros((a.shape[0], b.shape[1]), a.dtype)
    zb = jnp.zeros((b.shape[0], a.shape[1]), b.dtype)
    return jnp.concatenate(
        [jnp.concatenate([a, za], axis=1),
         jnp.concatenate([zb, b], axis=1)], axis=0)


def lstm_forward(token_ids, params, *, hidden_size, layer_num):
    # TODO(synk): the frozen-embedding row gather (nn.Embedding) stays in plain
    #             JAX; arbitrary-index gather has no clean Pallas TPU equivalent
    #             at these shapes.
    B, T = token_ids.shape
    H = hidden_size
    C = params["b2"].shape[-1]

    # Transpose the tiny int32 index tensor (B,T)->(T,B) and gather from a bf16
    # table: the time-major flattened (T*B, E) bf16 slab needs no extra f32
    # activation transpose / cast on the XLA side.
    emb_bf16 = params["embedding"].astype(jnp.bfloat16)
    x2d = jnp.take(emb_bf16, token_ids.T.reshape(-1), axis=0)        # (T*B, E)

    args = [x2d]
    for l in range(layer_num):
        lp = params["lstm"][l]
        wih = jnp.concatenate([lp["wih_f"], lp["wih_b"]], axis=1)    # (in, 8H)
        # block-diag Whh: K = 2H = 256 exactly fills the 256-wide MXU on
        # v6e/v7x (on v5e this is a 2-pass K; acceptable at this size).
        whh = _block_diag(lp["whh_f"], lp["whh_b"])                  # (2H, 8H)
        b = jnp.concatenate([lp["b_f"], lp["b_b"]], axis=1)          # (1, 8H)
        args += [wih.astype(jnp.bfloat16), whh.astype(jnp.bfloat16), b]
    args += [params["w1"].astype(jnp.bfloat16), params["b1"],
             params["w2"].astype(jnp.bfloat16), params["b2"]]

    kernel = functools.partial(_lstm_net_kernel, hidden_size=H, seq_len=T,
                               batch=B, layer_num=layer_num)
    vmem = pl.BlockSpec(memory_space=pltpu.MemorySpace.VMEM)
    # Everything (inputs, weights, scratch) is VMEM resident: well under 1 MiB,
    # far below the scoped VMEM limit on v5e/v6e/v7x, so no grid / pipelining.
    # TODO(synk): if batch grows (B >= ~16) on v7x, add a leading batch grid
    #             axis with dimension_semantics=("parallel",) for the 2nd TC;
    #             if T*B*H scales up, store ix in bf16 / tile over T and set
    #             vmem_limit_bytes explicitly (v7x has only 64 MiB VMEM).
    return pl.pallas_call(
        kernel,
        out_shape=jax.ShapeDtypeStruct((B, C), jnp.float32),
        in_specs=[vmem] * len(args),
        out_specs=vmem,
        scratch_shapes=[
            pltpu.VMEM((T * B, 2 * H), jnp.float32),   # act (bidir layer output)
            pltpu.VMEM((T * B, 8 * H), jnp.float32),   # hoisted ix, both dirs
        ],
    )(*args)


# ---------------------------------------------------------------------------
# Deterministic synthetic parameters (PyTorch-style shapes, stored transposed
# as (in_dim, out_dim) so kernels do x @ W).  Gate column order: i, f, g, o.
# ---------------------------------------------------------------------------
def init_params(key, vocab_size, embedding_dim, hidden_size, layer_num,
                output_size):
    H = hidden_size
    keys = iter(jax.random.split(key, 8 * layer_num + 8))

    def u(shape, scale):
        return jax.random.uniform(next(keys), shape, jnp.float32, -scale, scale)

    params = {}
    params["embedding"] = jax.random.normal(
        next(keys), (vocab_size, embedding_dim), jnp.float32)

    k_lstm = 1.0 / float(H) ** 0.5
    lstm_layers = []
    in_dim = embedding_dim
    for _ in range(layer_num):
        layer = {}
        for d in ("f", "b"):
            layer[f"wih_{d}"] = u((in_dim, 4 * H), k_lstm)   # W_ih^T
            layer[f"whh_{d}"] = u((H, 4 * H), k_lstm)        # W_hh^T
            layer[f"b_{d}"] = u((1, 4 * H), k_lstm) + u((1, 4 * H), k_lstm)
        lstm_layers.append(layer)
        in_dim = 2 * H
    params["lstm"] = lstm_layers

    fc1_in = 2 * H
    k1 = 1.0 / float(fc1_in) ** 0.5
    params["w1"] = u((fc1_in, 64), k1)
    params["b1"] = u((1, 64), k1)
    k2 = 1.0 / 64.0 ** 0.5
    params["w2"] = u((64, output_size), k2)
    params["b2"] = u((1, output_size), k2)
    return params


if __name__ == "__main__":
    VOCAB_SIZE = 100
    EMBED_DIM = 32
    HIDDEN = 128          # lane-aligned gate slices
    LAYER_NUM = 1
    OUTPUT_SIZE = 4
    BATCH, SEQ = 2, 8

    key = jax.random.PRNGKey(0)
    k_params, k_tok = jax.random.split(key)
    params = init_params(k_params, VOCAB_SIZE, EMBED_DIM, HIDDEN,
                         LAYER_NUM, OUTPUT_SIZE)
    token_ids = jax.random.randint(k_tok, (BATCH, SEQ), 0, VOCAB_SIZE,
                                   dtype=jnp.int32)

    fwd = jax.jit(functools.partial(lstm_forward,
                                    hidden_size=HIDDEN,
                                    layer_num=LAYER_NUM))
    probs = fwd(token_ids, params)
    jax.block_until_ready(probs)

    assert probs.shape == (BATCH, OUTPUT_SIZE)
    assert jnp.all(jnp.isfinite(probs))
    # log-softmax rows must exponentiate-sum to 1
    assert jnp.allclose(jnp.exp(probs).sum(axis=-1), 1.0, atol=1e-3)
    print("KERNEL_OK")
</pallas_src>

<mosaic_0001>
module attributes {stable_mosaic.version = 11 : i64} {
  func.func @_lstm_net_kernel(%arg0: memref<16x32xbf16, #tpu.memory_space<vmem>>, %arg1: memref<32x1024xbf16, #tpu.memory_space<vmem>>, %arg2: memref<256x1024xbf16, #tpu.memory_space<vmem>>, %arg3: memref<1x1024xf32, #tpu.memory_space<vmem>>, %arg4: memref<256x64xbf16, #tpu.memory_space<vmem>>, %arg5: memref<1x64xf32, #tpu.memory_space<vmem>>, %arg6: memref<64x4xbf16, #tpu.memory_space<vmem>>, %arg7: memref<1x4xf32, #tpu.memory_space<vmem>>, %arg8: memref<2x4xf32, #tpu.memory_space<vmem>>, %arg9: memref<16x256xf32, #tpu.memory_space<vmem>>, %arg10: memref<16x1024xf32, #tpu.memory_space<vmem>>) attributes {dimension_semantics = [], scalar_prefetch = 0 : i64, scratch_operands = 2 : i64, tpu.core_type = #tpu.core_type<tc>} {
    %c0 = arith.constant 0 : index
    %c0_0 = arith.constant 0 : index
    %0 = vector.load %arg0[%c0, %c0_0] : memref<16x32xbf16, #tpu.memory_space<vmem>>, vector<16x32xbf16>
    %c0_1 = arith.constant 0 : index
    %c0_2 = arith.constant 0 : index
    %1 = vector.load %arg1[%c0_1, %c0_2] : memref<32x1024xbf16, #tpu.memory_space<vmem>>, vector<32x1024xbf16>
    %cst = arith.constant dense<0.000000e+00> : vector<16x1024xf32>
    %2 = tpu.matmul %0, %1, %cst {dimension_numbers = #tpu.dot_dimension_numbers<[1], [0], [0], [1], [0, 0, 1, 1], [], []>} : vector<16x32xbf16>, vector<32x1024xbf16>, vector<16x1024xf32> -> vector<16x1024xf32>
    %c0_3 = arith.constant 0 : index
    %c0_4 = arith.constant 0 : index
    %3 = vector.load %arg3[%c0_3, %c0_4] : memref<1x1024xf32, #tpu.memory_space<vmem>>, vector<1x1024xf32>
    %4 = vector.broadcast %3 : vector<1x1024xf32> to vector<16x1024xf32>
    %5 = arith.addf %2, %4 : vector<16x1024xf32>
    %c0_5 = arith.constant 0 : index
    %c0_6 = arith.constant 0 : index
    %6 = vector.load %arg10[%c0_5, %c0_6] : memref<16x1024xf32, #tpu.memory_space<vmem>>, vector<16x1024xf32>
    tpu.vector_store %arg10[%c0_5, %c0_6], %5 {strides = array<i32>} : memref<16x1024xf32, #tpu.memory_space<vmem>>, vector<16x1024xf32>,
    %c0_7 = arith.constant 0 : index
    %c0_8 = arith.constant 0 : index
    %7 = vector.load %arg2[%c0_7, %c0_8] : memref<256x1024xbf16, #tpu.memory_space<vmem>>, vector<256x1024xbf16>
    %cst_9 = arith.constant 0.000000e+00 : f32
    %8 = vector.broadcast %cst_9 : f32 to vector<2x256xf32>
    %cst_10 = arith.constant 0.000000e+00 : f32
    %9 = vector.broadcast %cst_10 : f32 to vector<2x128xf32>
    %cst_11 = arith.constant 0.000000e+00 : f32
    %10 = vector.broadcast %cst_11 : f32 to vector<2x128xf32>
    %11 = arith.truncf %8 : vector<2x256xf32> to vector<2x256xbf16>
    %cst_12 = arith.constant dense<0.000000e+00> : vector<2x1024xf32>
    %12 = tpu.matmul %11, %7, %cst_12 {dimension_numbers = #tpu.dot_dimension_numbers<[1], [0], [0], [1], [0, 0, 1, 1], [], []>} : vector<2x256xbf16>, vector<256x1024xbf16>, vector<2x1024xf32> -> vector<2x1024xf32>
    %13 = vector.extract_strided_slice %12 {offsets = [0, 0], sizes = [2, 512], strides = [1, 1]} : vector<2x1024xf32> to vector<2x512xf32>
    %c0_13 = arith.constant 0 : index
    %c0_14 = arith.constant 0 : index
    %14 = vector.load %arg10[%c0_13, %c0_14] : memref<16x1024xf32, #tpu.memory_space<vmem>>, vector<2x512xf32>
    %15 = arith.addf %13, %14 : vector<2x512xf32>
    %16 = vector.extract_strided_slice %12 {offsets = [0, 512], sizes = [2, 512], strides = [1, 1]} : vector<2x1024xf32> to vector<2x512xf32>
    %c14 = arith.constant 14 : index
    %c512 = arith.constant 512 : index
    %17 = vector.load %arg10[%c14, %c512] : memref<16x1024xf32, #tpu.memory_space<vmem>>, vector<2x512xf32>
    %18 = arith.addf %16, %17 : vector<2x512xf32>
    %19 = vector.extract_strided_slice %15 {offsets = [0, 0], sizes = [2, 128], strides = [1, 1]} : vector<2x512xf32> to vector<2x128xf32>
    %20 = arith.negf %19 : vector<2x128xf32>
    %21 = math.exp %20 : vector<2x128xf32>
    %cst_15 = arith.constant 1.000000e+00 : f32
    %22 = vector.broadcast %cst_15 : f32 to vector<2x128xf32>
    %23 = arith.addf %22, %21 : vector<2x128xf32>
    %24 = arith.divf %22, %23 : vector<2x128xf32>
    %25 = vector.extract_strided_slice %15 {offsets = [0, 128], sizes = [2, 128], strides = [1, 1]} : vector<2x512xf32> to vector<2x128xf32>
    %26 = arith.negf %25 : vector<2x128xf32>
    %27 = math.exp %26 : vector<2x128xf32>
    %cst_16 = arith.constant 1.000000e+00 : f32
    %28 = vector.broadcast %cst_16 : f32 to vector<2x128xf32>
    %29 = arith.addf %28, %27 : vector<2x128xf32>
    %30 = arith.divf %28, %29 : vector<2x128xf32>
    %31 = vector.extract_strided_slice %15 {offsets = [0, 256], sizes = [2, 128], strides = [1, 1]} : vector<2x512xf32> to vector<2x128xf32>
    %32 = math.tanh %31 : vector<2x128xf32>
    %33 = vector.extract_strided_slice %15 {offsets = [0, 384], sizes = [2, 128], strides = [1, 1]} : vector<2x512xf32> to vector<2x128xf32>
    %34 = arith.negf %33 : vector<2x128xf32>
    %35 = math.exp %34 : vector<2x128xf32>
    %cst_17 = arith.constant 1.000000e+00 : f32
    %36 = vector.broadcast %cst_17 : f32 to vector<2x128xf32>
    %37 = arith.addf %36, %35 : vector<2x128xf32>
    %38 = arith.divf %36, %37 : vector<2x128xf32>
    %39 = vector.extract_strided_slice %18 {offsets = [0, 0], sizes = [2, 128], strides = [1, 1]} : vector<2x512xf32> to vector<2x128xf32>
    %40 = arith.negf %39 : vector<2x128xf32>
    %41 = math.exp %40 : vector<2x128xf32>
    %cst_18 = arith.constant 1.000000e+00 : f32
    %42 = vector.broadcast %cst_18 : f32 to vector<2x128xf32>
    %43 = arith.addf %42, %41 : vector<2x128xf32>
    %44 = arith.divf %42, %43 : vector<2x128xf32>
    %45 = vector.extract_strided_slice %18 {offsets = [0, 128], sizes = [2, 128], strides = [1, 1]} : vector<2x512xf32> to vector<2x128xf32>
    %46 = arith.negf %45 : vector<2x128xf32>
    %47 = math.exp %46 : vector<2x128xf32>
    %cst_19 = arith.constant 1.000000e+00 : f32
    %48 = vector.broadcast %cst_19 : f32 to vector<2x128xf32>
    %49 = arith.addf %48, %47 : vector<2x128xf32>
    %50 = arith.divf %48, %49 : vector<2x128xf32>
    %51 = vector.extract_strided_slice %18 {offsets = [0, 256], sizes = [2, 128], strides = [1, 1]} : vector<2x512xf32> to vector<2x128xf32>
    %52 = math.tanh %51 : vector<2x128xf32>
    %53 = vector.extract_strided_slice %18 {offsets = [0, 384], sizes = [2, 128], strides = [1, 1]} : vector<2x512xf32> to vector<2x128xf32>
    %54 = arith.negf %53 : vector<2x128xf32>
    %55 = math.exp %54 : vector<2x128xf32>
    %cst_20 = arith.constant 1.000000e+00 : f32
    %56 = vector.broadcast %cst_20 : f32 to vector<2x128xf32>
    %57 = arith.addf %56, %55 : vector<2x128xf32>
    %58 = arith.divf %56, %57 : vector<2x128xf32>
    %59 = arith.mulf %30, %9 : vector<2x128xf32>
    %60 = arith.mulf %24, %32 : vector<2x128xf32>
    %61 = arith.addf %59, %60 : vector<2x128xf32>
    %62 = arith.mulf %50, %10 : vector<2x128xf32>
    %63 = arith.mulf %44, %52 : vector<2x128xf32>
    %64 = arith.addf %62, %63 : vector<2x128xf32>
    %65 = math.tanh %61 : vector<2x128xf32>
    %66 = arith.mulf %38, %65 : vector<2x128xf32>
    %67 = math.tanh %64 : vector<2x128xf32>
    %68 = arith.mulf %58, %67 : vector<2x128xf32>
    %69 = tpu.concatenate %66, %68 in 1 : vector<2x128xf32>, vector<2x128xf32> -> vector<2x256xf32>
    %c0_21 = arith.constant 0 : index
    %c0_22 = arith.constant 0 : index
    %70 = vector.load %arg9[%c0_21, %c0_22] : memref<16x256xf32, #tpu.memory_space<vmem>>, vector<2x128xf32>
    tpu.vector_store %arg9[%c0_21, %c0_22], %66 {strides = array<i32>} : memref<16x256xf32, #tpu.memory_space<vmem>>, vector<2x128xf32>,
    %c14_23 = arith.constant 14 : index
    %c128 = arith.constant 128 : index
    %71 = vector.load %arg9[%c14_23, %c128] : memref<16x256xf32, #tpu.memory_space<vmem>>, vector<2x128xf32>
    tpu.vector_store %arg9[%c14_23, %c128], %68 {strides = array<i32>} : memref<16x256xf32, #tpu.memory_space<vmem>>, vector<2x128xf32>,
    %72 = arith.truncf %69 : vector<2x256xf32> to vector<2x256xbf16>
    %cst_24 = arith.constant dense<0.000000e+00> : vector<2x1024xf32>
    %73 = tpu.matmul %72, %7, %cst_24 {dimension_numbers = #tpu.dot_dimension_numbers<[1], [0], [0], [1], [0, 0, 1, 1], [], []>} : vector<2x256xbf16>, vector<256x1024xbf16>, vector<2x1024xf32> -> vector<2x1024xf32>
    %74 = vector.extract_strided_slice %73 {offsets = [0, 0], sizes = [2, 512], strides = [1, 1]} : vector<2x1024xf32> to vector<2x512xf32>
    %c2 = arith.constant 2 : index
    %c0_25 = arith.constant 0 : index
    %75 = vector.load %arg10[%c2, %c0_25] : memref<16x1024xf32, #tpu.memory_space<vmem>>, vector<2x512xf32>
    %76 = arith.addf %74, %75 : vector<2x512xf32>
    %77 = vector.extract_strided_slice %73 {offsets = [0, 512], sizes = [2, 512], strides = [1, 1]} : vector<2x1024xf32> to vector<2x512xf32>
    %c12 = arith.constant 12 : index
    %c512_26 = arith.constant 512 : index
    %78 = vector.load %arg10[%c12, %c512_26] : memref<16x1024xf32, #tpu.memory_space<vmem>>, vector<2x512xf32>
    %79 = arith.addf %77, %78 : vector<2x512xf32>
    %80 = vector.extract_strided_slice %76 {offsets = [0, 0], sizes = [2, 128], strides = [1, 1]} : vector<2x512xf32> to vector<2x128xf32>
    %81 = arith.negf %80 : vector<2x128xf32>
    %82 = math.exp %81 : vector<2x128xf32>
    %cst_27 = arith.constant 1.000000e+00 : f32
    %83 = vector.broadcast %cst_27 : f32 to vector<2x128xf32>
    %84 = arith.addf %83, %82 : vector<2x128xf32>
    %85 = arith.divf %83, %84 : vector<2x128xf32>
    %86 = vector.extract_strided_slice %76 {offsets = [0, 128], sizes = [2, 128], strides = [1, 1]} : vector<2x512xf32> to vector<2x128xf32>
    %87 = arith.negf %86 : vector<2x128xf32>
    %88 = math.exp %87 : vector<2x128xf32>
    %cst_28 = arith.constant 1.000000e+00 : f32
    %89 = vector.broadcast %cst_28 : f32 to vector<2x128xf32>
    %90 = arith.addf %89, %88 : vector<2x128xf32>
    %91 = arith.divf %89, %90 : vector<2x128xf32>
    %92 = vector.extract_strided_slice %76 {offsets = [0, 256], sizes = [2, 128], strides = [1, 1]} : vector<2x512xf32> to vector<2x128xf32>
    %93 = math.tanh %92 : vector<2x128xf32>
    %94 = vector.extract_strided_slice %76 {offsets = [0, 384], sizes = [2, 128], strides = [1, 1]} : vector<2x512xf32> to vector<2x128xf32>
    %95 = arith.negf %94 : vector<2x128xf32>
    %96 = math.exp %95 : vector<2x128xf32>
    %cst_29 = arith.constant 1.000000e+00 : f32
    %97 = vector.broadcast %cst_29 : f32 to vector<2x128xf32>
    %98 = arith.addf %97, %96 : vector<2x128xf32>
    %99 = arith.divf %97, %98 : vector<2x128xf32>
    %100 = vector.extract_strided_slice %79 {offsets = [0, 0], sizes = [2, 128], strides = [1, 1]} : vector<2x512xf32> to vector<2x128xf32>
    %101 = arith.negf %100 : vector<2x128xf32>
    %102 = math.exp %101 : vector<2x128xf32>
    %cst_30 = arith.constant 1.000000e+00 : f32
    %103 = vector.broadcast %cst_30 : f32 to vector<2x128xf32>
    %104 = arith.addf %103, %102 : vector<2x128xf32>
    %105 = arith.divf %103, %104 : vector<2x128xf32>
    %106 = vector.extract_strided_slice %79 {offsets = [0, 128], sizes = [2, 128], strides = [1, 1]} : vector<2x512xf32> to vector<2x128xf32>
    %107 = arith.negf %106 : vector<2x128xf32>
    %108 = math.exp %107 : vector<2x128xf32>
    %cst_31 = arith.constant 1.000000e+00 : f32
    %109 = vector.broadcast %cst_31 : f32 to vector<2x128xf32>
    %110 = arith.addf %109, %108 : vector<2x128xf32>
    %111 = arith.divf %109, %110 : vector<2x128xf32>
    %112 = vector.extract_strided_slice %79 {offsets = [0, 256], sizes = [2, 128], strides = [1, 1]} : vector<2x512xf32> to vector<2x128xf32>
    %113 = math.tanh %112 : vector<2x128xf32>
    %114 = vector.extract_strided_slice %79 {offsets = [0, 384], sizes = [2, 128], strides = [1, 1]} : vector<2x512xf32> to vector<2x128xf32>
    %115 = arith.negf %114 : vector<2x128xf32>
    %116 = math.exp %115 : vector<2x128xf32>
    %cst_32 = arith.constant 1.000000e+00 : f32
    %117 = vector.broadcast %cst_32 : f32 to vector<2x128xf32>
    %118 = arith.addf %117, %116 : vector<2x128xf32>
    %119 = arith.divf %117, %118 : vector<2x128xf32>
    %120 = arith.mulf %91, %61 : vector<2x128xf32>
    %121 = arith.mulf %85, %93 : vector<2x128xf32>
    %122 = arith.addf %120, %121 : vector<2x128xf32>
    %123 = arith.mulf %111, %64 : vector<2x128xf32>
    %124 = arith.mulf %105, %113 : vector<2x128xf32>
    %125 = arith.addf %123, %124 : vector<2x128xf32>
    %126 = math.tanh %122 : vector<2x128xf32>
    %127 = arith.mulf %99, %126 : vector<2x128xf32>
    %128 = math.tanh %125 : vector<2x128xf32>
    %129 = arith.mulf %119, %128 : vector<2x128xf32>
    %130 = tpu.concatenate %127, %129 in 1 : vector<2x128xf32>, vector<2x128xf32> -> vector<2x256xf32>
    %c2_33 = arith.constant 2 : index
    %c0_34 = arith.constant 0 : index
    %131 = vector.load %arg9[%c2_33, %c0_34] : memref<16x256xf32, #tpu.memory_space<vmem>>, vector<2x128xf32>
    tpu.vector_store %arg9[%c2_33, %c0_34], %127 {strides = array<i32>} : memref<16x256xf32, #tpu.memory_space<vmem>>, vector<2x128xf32>,
    %c12_35 = arith.constant 12 : index
    %c128_36 = arith.constant 128 : index
    %132 = vector.load %arg9[%c12_35, %c128_36] : memref<16x256xf32, #tpu.memory_space<vmem>>, vector<2x128xf32>
    tpu.vector_store %arg9[%c12_35, %c128_36], %129 {strides = array<i32>} : memref<16x256xf32, #tpu.memory_space<vmem>>, vector<2x128xf32>,
    %133 = arith.truncf %130 : vector<2x256xf32> to vector<2x256xbf16>
    %cst_37 = arith.constant dense<0.000000e+00> : vector<2x1024xf32>
    %134 = tpu.matmul %133, %7, %cst_37 {dimension_numbers = #tpu.dot_dimension_numbers<[1], [0], [0], [1], [0, 0, 1, 1], [], []>} : vector<2x256xbf16>, vector<256x1024xbf16>, vector<2x1024xf32> -> vector<2x1024xf32>
    %135 = vector.extract_strided_slice %134 {offsets = [0, 0], sizes = [2, 512], strides = [1, 1]} : vector<2x1024xf32> to vector<2x512xf32>
    %c4 = arith.constant 4 : index
    %c0_38 = arith.constant 0 : index
    %136 = vector.load %arg10[%c4, %c0_38] : memref<16x1024xf32, #tpu.memory_space<vmem>>, vector<2x512xf32>
    %137 = arith.addf %135, %136 : vector<2x512xf32>
    %138 = vector.extract_strided_slice %134 {offsets = [0, 512], sizes = [2, 512], strides = [1, 1]} : vector<2x1024xf32> to vector<2x512xf32>
    %c10 = arith.constant 10 : index
    %c512_39 = arith.constant 512 : index
    %139 = vector.load %arg10[%c10, %c512_39] : memref<16x1024xf32, #tpu.memory_space<vmem>>, vector<2x512xf32>
    %140 = arith.addf %138, %139 : vector<2x512xf32>
    %141 = vector.extract_strided_slice %137 {offsets = [0, 0], sizes = [2, 128], strides = [1, 1]} : vector<2x512xf32> to vector<2x128xf32>
    %142 = arith.negf %141 : vector<2x128xf32>
    %143 = math.exp %142 : vector<2x128xf32>
    %cst_40 = arith.constant 1.000000e+00 : f32
    %144 = vector.broadcast %cst_40 : f32 to vector<2x128xf32>
    %145 = arith.addf %144, %143 : vector<2x128xf32>
    %146 = arith.divf %144, %145 : vector<2x128xf32>
    %147 = vector.extract_strided_slice %137 {offsets = [0, 128], sizes = [2, 128], strides = [1, 1]} : vector<2x512xf32> to vector<2x128xf32>
    %148 = arith.negf %147 : vector<2x128xf32>
    %149 = math.exp %148 : vector<2x128xf32>
    %cst_41 = arith.constant 1.000000e+00 : f32
    %150 = vector.broadcast %cst_41 : f32 to vector<2x128xf32>
    %151 = arith.addf %150, %149 : vector<2x128xf32>
    %152 = arith.divf %150, %151 : vector<2x128xf32>
    %153 = vector.extract_strided_slice %137 {offsets = [0, 256], sizes = [2, 128], strides = [1, 1]} : vector<2x512xf32> to vector<2x128xf32>
    %154 = math.tanh %153 : vector<2x128xf32>
    %155 = vector.extract_strided_slice %137 {offsets = [0, 384], sizes = [2, 128], strides = [1, 1]} : vector<2x512xf32> to vector<2x128xf32>
    %156 = arith.negf %155 : vector<2x128xf32>
    %157 = math.exp %156 : vector<2x128xf32>
    %cst_42 = arith.constant 1.000000e+00 : f32
    %158 = vector.broadcast %cst_42 : f32 to vector<2x128xf32>
    %159 = arith.addf %158, %157 : vector<2x128xf32>
    %160 = arith.divf %158, %159 : vector<2x128xf32>
    %161 = vector.extract_strided_slice %140 {offsets = [0, 0], sizes = [2, 128], strides = [1, 1]} : vector<2x512xf32> to vector<2x128xf32>
    %162 = arith.negf %161 : vector<2x128xf32>
    %163 = math.exp %162 : vector<2x128xf32>
    %cst_43 = arith.constant 1.000000e+00 : f32
    %164 = vector.broadcast %cst_43 : f32 to vector<2x128xf32>
    %165 = arith.addf %164, %163 : vector<2x128xf32>
    %166 = arith.divf %164, %165 : vector<2x128xf32>
    %167 = vector.extract_strided_slice %140 {offsets = [0, 128], sizes = [2, 128], strides = [1, 1]} : vector<2x512xf32> to vector<2x128xf32>
    %168 = arith.negf %167 : vector<2x128xf32>
    %169 = math.exp %168 : vector<2x128xf32>
    %cst_44 = arith.constant 1.000000e+00 : f32
    %170 = vector.broadcast %cst_44 : f32 to vector<2x128xf32>
    %171 = arith.addf %170, %169 : vector<2x128xf32>
    %172 = arith.divf %170, %171 : vector<2x128xf32>
    %173 = vector.extract_strided_slice %140 {offsets = [0, 256], sizes = [2, 128], strides = [1, 1]} : vector<2x512xf32> to vector<2x128xf32>
    %174 = math.tanh %173 : vector<2x128xf32>
    %175 = vector.extract_strided_slice %140 {offsets = [0, 384], sizes = [2, 128], strides = [1, 1]} : vector<2x512xf32> to vector<2x128xf32>
    %176 = arith.negf %175 : vector<2x128xf32>
    %177 = math.exp %176 : vector<2x128xf32>
    %cst_45 = arith.constant 1.000000e+00 : f32
    %178 = vector.broadcast %cst_45 : f32 to vector<2x128xf32>
    %179 = arith.addf %178, %177 : vector<2x128xf32>
    %180 = arith.divf %178, %179 : vector<2x128xf32>
    %181 = arith.mulf %152, %122 : vector<2x128xf32>
    %182 = arith.mulf %146, %154 : vector<2x128xf32>
    %183 = arith.addf %181, %182 : vector<2x128xf32>
    %184 = arith.mulf %172, %125 : vector<2x128xf32>
    %185 = arith.mulf %166, %174 : vector<2x128xf32>
    %186 = arith.addf %184, %185 : vector<2x128xf32>
    %187 = math.tanh %183 : vector<2x128xf32>
    %188 = arith.mulf %160, %187 : vector<2x128xf32>
    %189 = math.tanh %186 : vector<2x128xf32>
    %190 = arith.mulf %180, %189 : vector<2x128xf32>
    %191 = tpu.concatenate %188, %190 in 1 : vector<2x128xf32>, vector<2x128xf32> -> vector<2x256xf32>
    %c4_46 = arith.constant 4 : index
    %c0_47 = arith.constant 0 : index
    %192 = vector.load %arg9[%c4_46, %c0_47] : memref<16x256xf32, #tpu.memory_space<vmem>>, vector<2x128xf32>
    tpu.vector_store %arg9[%c4_46, %c0_47], %188 {strides = array<i32>} : memref<16x256xf32, #tpu.memory_space<vmem>>, vector<2x128xf32>,
    %c10_48 = arith.constant 10 : index
    %c128_49 = arith.constant 128 : index
    %193 = vector.load %arg9[%c10_48, %c128_49] : memref<16x256xf32, #tpu.memory_space<vmem>>, vector<2x128xf32>
    tpu.vector_store %arg9[%c10_48, %c128_49], %190 {strides = array<i32>} : memref<16x256xf32, #tpu.memory_space<vmem>>, vector<2x128xf32>,
    %194 = arith.truncf %191 : vector<2x256xf32> to vector<2x256xbf16>
    %cst_50 = arith.constant dense<0.000000e+00> : vector<2x1024xf32>
    %195 = tpu.matmul %194, %7, %cst_50 {dimension_numbers = #tpu.dot_dimension_numbers<[1], [0], [0], [1], [0, 0, 1, 1], [], []>} : vector<2x256xbf16>, vector<256x1024xbf16>, vector<2x1024xf32> -> vector<2x1024xf32>
    %196 = vector.extract_strided_slice %195 {offsets = [0, 0], sizes = [2, 512], strides = [1, 1]} : vector<2x1024xf32> to vector<2x512xf32>
    %c6 = arith.constant 6 : index
    %c0_51 = arith.constant 0 : index
    %197 = vector.load %arg10[%c6, %c0_51] : memref<16x1024xf32, #tpu.memory_space<vmem>>, vector<2x512xf32>
    %198 = arith.addf %196, %197 : vector<2x512xf32>
    %199 = vector.extract_strided_slice %195 {offsets = [0, 512], sizes = [2, 512], strides = [1, 1]} : vector<2x1024xf32> to vector<2x512xf32>
    %c8 = arith.constant 8 : index
    %c512_52 = arith.constant 512 : index
    %200 = vector.load %arg10[%c8, %c512_52] : memref<16x1024xf32, #tpu.memory_space<vmem>>, vector<2x512xf32>
    %201 = arith.addf %199, %200 : vector<2x512xf32>
    %202 = vector.extract_strided_slice %198 {offsets = [0, 0], sizes = [2, 128], strides = [1, 1]} : vector<2x512xf32> to vector<2x128xf32>
    %203 = arith.negf %202 : vector<2x128xf32>
    %204 = math.exp %203 : vector<2x128xf32>
    %cst_53 = arith.constant 1.000000e+00 : f32
    %205 = vector.broadcast %cst_53 : f32 to vector<2x128xf32>
    %206 = arith.addf %205, %204 : vector<2x128xf32>
    %207 = arith.divf %205, %206 : vector<2x128xf32>
    %208 = vector.extract_strided_slice %198 {offsets = [0, 128], sizes = [2, 128], strides = [1, 1]} : vector<2x512xf32> to vector<2x128xf32>
    %209 = arith.negf %208 : vector<2x128xf32>
    %210 = math.exp %209 : vector<2x128xf32>
    %cst_54 = arith.constant 1.000000e+00 : f32
    %211 = vector.broadcast %cst_54 : f32 to vector<2x128xf32>
    %212 = arith.addf %211, %210 : vector<2x128xf32>
    %213 = arith.divf %211, %212 : vector<2x128xf32>
    %214 = vector.extract_strided_slice %198 {offsets = [0, 256], sizes = [2, 128], strides = [1, 1]} : vector<2x512xf32> to vector<2x128xf32>
    %215 = math.tanh %214 : vector<2x128xf32>
    %216 = vector.extract_strided_slice %198 {offsets = [0, 384], sizes = [2, 128], strides = [1, 1]} : vector<2x512xf32> to vector<2x128xf32>
    %217 = arith.negf %216 : vector<2x128xf32>
    %218 = math.exp %217 : vector<2x128xf32>
    %cst_55 = arith.constant 1.000000e+00 : f32
    %219 = vector.broadcast %cst_55 : f32 to vector<2x128xf32>
    %220 = arith.addf %219, %218 : vector<2x128xf32>
    %221 = arith.divf %219, %220 : vector<2x128xf32>
    %222 = vector.extract_strided_slice %201 {offsets = [0, 0], sizes = [2, 128], strides = [1, 1]} : vector<2x512xf32> to vector<2x128xf32>
    %223 = arith.negf %222 : vector<2x128xf32>
    %224 = math.exp %223 : vector<2x128xf32>
    %cst_56 = arith.constant 1.000000e+00 : f32
    %225 = vector.broadcast %cst_56 : f32 to vector<2x128xf32>
    %226 = arith.addf %225, %224 : vector<2x128xf32>
    %227 = arith.divf %225, %226 : vector<2x128xf32>
    %228 = vector.extract_strided_slice %201 {offsets = [0, 128], sizes = [2, 128], strides = [1, 1]} : vector<2x512xf32> to vector<2x128xf32>
    %229 = arith.negf %228 : vector<2x128xf32>
    %230 = math.exp %229 : vector<2x128xf32>
    %cst_57 = arith.constant 1.000000e+00 : f32
    %231 = vector.broadcast %cst_57 : f32 to vector<2x128xf32>
    %232 = arith.addf %231, %230 : vector<2x128xf32>
    %233 = arith.divf %231, %232 : vector<2x128xf32>
    %234 = vector.extract_strided_slice %201 {offsets = [0, 256], sizes = [2, 128], strides = [1, 1]} : vector<2x512xf32> to vector<2x128xf32>
    %235 = math.tanh %234 : vector<2x128xf32>
    %236 = vector.extract_strided_slice %201 {offsets = [0, 384], sizes = [2, 128], strides = [1, 1]} : vector<2x512xf32> to vector<2x128xf32>
    %237 = arith.negf %236 : vector<2x128xf32>
    %238 = math.exp %237 : vector<2x128xf32>
    %cst_58 = arith.constant 1.000000e+00 : f32
    %239 = vector.broadcast %cst_58 : f32 to vector<2x128xf32>
    %240 = arith.addf %239, %238 : vector<2x128xf32>
    %241 = arith.divf %239, %240 : vector<2x128xf32>
    %242 = arith.mulf %213, %183 : vector<2x128xf32>
    %243 = arith.mulf %207, %215 : vector<2x128xf32>
    %244 = arith.addf %242, %243 : vector<2x128xf32>
    %245 = arith.mulf %233, %186 : vector<2x128xf32>
    %246 = arith.mulf %227, %235 : vector<2x128xf32>
    %247 = arith.addf %245, %246 : vector<2x128xf32>
    %248 = math.tanh %244 : vector<2x128xf32>
    %249 = arith.mulf %221, %248 : vector<2x128xf32>
    %250 = math.tanh %247 : vector<2x128xf32>
    %251 = arith.mulf %241, %250 : vector<2x128xf32>
    %252 = tpu.concatenate %249, %251 in 1 : vector<2x128xf32>, vector<2x128xf32> -> vector<2x256xf32>
    %c6_59 = arith.constant 6 : index
    %c0_60 = arith.constant 0 : index
    %253 = vector.load %arg9[%c6_59, %c0_60] : memref<16x256xf32, #tpu.memory_space<vmem>>, vector<2x128xf32>
    tpu.vector_store %arg9[%c6_59, %c0_60], %249 {strides = array<i32>} : memref<16x256xf32, #tpu.memory_space<vmem>>, vector<2x128xf32>,
    %c8_61 = arith.constant 8 : index
    %c128_62 = arith.constant 128 : index
    %254 = vector.load %arg9[%c8_61, %c128_62] : memref<16x256xf32, #tpu.memory_space<vmem>>, vector<2x128xf32>
    tpu.vector_store %arg9[%c8_61, %c128_62], %251 {strides = array<i32>} : memref<16x256xf32, #tpu.memory_space<vmem>>, vector<2x128xf32>,
    %255 = arith.truncf %252 : vector<2x256xf32> to vector<2x256xbf16>
    %cst_63 = arith.constant dense<0.000000e+00> : vector<2x1024xf32>
    %256 = tpu.matmul %255, %7, %cst_63 {dimension_numbers = #tpu.dot_dimension_numbers<[1], [0], [0], [1], [0, 0, 1, 1], [], []>} : vector<2x256xbf16>, vector<256x1024xbf16>, vector<2x1024xf32> -> vector<2x1024xf32>
    %257 = vector.extract_strided_slice %256 {offsets = [0, 0], sizes = [2, 512], strides = [1, 1]} : vector<2x1024xf32> to vector<2x512xf32>
    %c8_64 = arith.constant 8 : index
    %c0_65 = arith.constant 0 : index
    %258 = vector.load %arg10[%c8_64, %c0_65] : memref<16x1024xf32, #tpu.memory_space<vmem>>, vector<2x512xf32>
    %259 = arith.addf %257, %258 : vector<2x512xf32>
    %260 = vector.extract_strided_slice %256 {offsets = [0, 512], sizes = [2, 512], strides = [1, 1]} : vector<2x1024xf32> to vector<2x512xf32>
    %c6_66 = arith.constant 6 : index
    %c512_67 = arith.constant 512 : index
    %261 = vector.load %arg10[%c6_66, %c512_67] : memref<16x1024xf32, #tpu.memory_space<vmem>>, vector<2x512xf32>
    %262 = arith.addf %260, %261 : vector<2x512xf32>
    %263 = vector.extract_strided_slice %259 {offsets = [0, 0], sizes = [2, 128], strides = [1, 1]} : vector<2x512xf32> to vector<2x128xf32>
    %264 = arith.negf %263 : vector<2x128xf32>
    %265 = math.exp %264 : vector<2x128xf32>
    %cst_68 = arith.constant 1.000000e+00 : f32
    %266 = vector.broadcast %cst_68 : f32 to vector<2x128xf32>
    %267 = arith.addf %266, %265 : vector<2x128xf32>
    %268 = arith.divf %266, %267 : vector<2x128xf32>
    %269 = vector.extract_strided_slice %259 {offsets = [0, 128], sizes = [2, 128], strides = [1, 1]} : vector<2x512xf32> to vector<2x128xf32>
    %270 = arith.negf %269 : vector<2x128xf32>
    %271 = math.exp %270 : vector<2x128xf32>
    %cst_69 = arith.constant 1.000000e+00 : f32
    %272 = vector.broadcast %cst_69 : f32 to vector<2x128xf32>
    %273 = arith.addf %272, %271 : vector<2x128xf32>
    %274 = arith.divf %272, %273 : vector<2x128xf32>
    %275 = vector.extract_strided_slice %259 {offsets = [0, 256], sizes = [2, 128], strides = [1, 1]} : vector<2x512xf32> to vector<2x128xf32>
    %276 = math.tanh %275 : vector<2x128xf32>
    %277 = vector.extract_strided_slice %259 {offsets = [0, 384], sizes = [2, 128], strides = [1, 1]} : vector<2x512xf32> to vector<2x128xf32>
    %278 = arith.negf %277 : vector<2x128xf32>
    %279 = math.exp %278 : vector<2x128xf32>
    %cst_70 = arith.constant 1.000000e+00 : f32
    %280 = vector.broadcast %cst_70 : f32 to vector<2x128xf32>
    %281 = arith.addf %280, %279 : vector<2x128xf32>
    %282 = arith.divf %280, %281 : vector<2x128xf32>
    %283 = vector.extract_strided_slice %262 {offsets = [0, 0], sizes = [2, 128], strides = [1, 1]} : vector<2x512xf32> to vector<2x128xf32>
    %284 = arith.negf %283 : vector<2x128xf32>
    %285 = math.exp %284 : vector<2x128xf32>
    %cst_71 = arith.constant 1.000000e+00 : f32
    %286 = vector.broadcast %cst_71 : f32 to vector<2x128xf32>
    %287 = arith.addf %286, %285 : vector<2x128xf32>
    %288 = arith.divf %286, %287 : vector<2x128xf32>
    %289 = vector.extract_strided_slice %262 {offsets = [0, 128], sizes = [2, 128], strides = [1, 1]} : vector<2x512xf32> to vector<2x128xf32>
    %290 = arith.negf %289 : vector<2x128xf32>
    %291 = math.exp %290 : vector<2x128xf32>
    %cst_72 = arith.constant 1.000000e+00 : f32
    %292 = vector.broadcast %cst_72 : f32 to vector<2x128xf32>
    %293 = arith.addf %292, %291 : vector<2x128xf32>
    %294 = arith.divf %292, %293 : vector<2x128xf32>
    %295 = vector.extract_strided_slice %262 {offsets = [0, 256], sizes = [2, 128], strides = [1, 1]} : vector<2x512xf32> to vector<2x128xf32>
    %296 = math.tanh %295 : vector<2x128xf32>
    %297 = vector.extract_strided_slice %262 {offsets = [0, 384], sizes = [2, 128], strides = [1, 1]} : vector<2x512xf32> to vector<2x128xf32>
    %298 = arith.negf %297 : vector<2x128xf32>
    %299 = math.exp %298 : vector<2x128xf32>
    %cst_73 = arith.constant 1.000000e+00 : f32
    %300 = vector.broadcast %cst_73 : f32 to vector<2x128xf32>
    %301 = arith.addf %300, %299 : vector<2x128xf32>
    %302 = arith.divf %300, %301 : vector<2x128xf32>
    %303 = arith.mulf %274, %244 : vector<2x128xf32>
    %304 = arith.mulf %268, %276 : vector<2x128xf32>
    %305 = arith.addf %303, %304 : vector<2x128xf32>
    %306 = arith.mulf %294, %247 : vector<2x128xf32>
    %307 = arith.mulf %288, %296 : vector<2x128xf32>
    %308 = arith.addf %306, %307 : vector<2x128xf32>
    %309 = math.tanh %305 : vector<2x128xf32>
    %310 = arith.mulf %282, %309 : vector<2x128xf32>
    %311 = math.tanh %308 : vector<2x128xf32>
    %312 = arith.mulf %302, %311 : vector<2x128xf32>
    %313 = tpu.concatenate %310, %312 in 1 : vector<2x128xf32>, vector<2x128xf32> -> vector<2x256xf32>
    %c8_74 = arith.constant 8 : index
    %c0_75 = arith.constant 0 : index
    %314 = vector.load %arg9[%c8_74, %c0_75] : memref<16x256xf32, #tpu.memory_space<vmem>>, vector<2x128xf32>
    tpu.vector_store %arg9[%c8_74, %c0_75], %310 {strides = array<i32>} : memref<16x256xf32, #tpu.memory_space<vmem>>, vector<2x128xf32>,
    %c6_76 = arith.constant 6 : index
    %c128_77 = arith.constant 128 : index
    %315 = vector.load %arg9[%c6_76, %c128_77] : memref<16x256xf32, #tpu.memory_space<vmem>>, vector<2x128xf32>
    tpu.vector_store %arg9[%c6_76, %c128_77], %312 {strides = array<i32>} : memref<16x256xf32, #tpu.memory_space<vmem>>, vector<2x128xf32>,
    %316 = arith.truncf %313 : vector<2x256xf32> to vector<2x256xbf16>
    %cst_78 = arith.constant dense<0.000000e+00> : vector<2x1024xf32>
    %317 = tpu.matmul %316, %7, %cst_78 {dimension_numbers = #tpu.dot_dimension_numbers<[1], [0], [0], [1], [0, 0, 1, 1], [], []>} : vector<2x256xbf16>, vector<256x1024xbf16>, vector<2x1024xf32> -> vector<2x1024xf32>
    %318 = vector.extract_strided_slice %317 {offsets = [0, 0], sizes = [2, 512], strides = [1, 1]} : vector<2x1024xf32> to vector<2x512xf32>
    %c10_79 = arith.constant 10 : index
    %c0_80 = arith.constant 0 : index
    %319 = vector.load %arg10[%c10_79, %c0_80] : memref<16x1024xf32, #tpu.memory_space<vmem>>, vector<2x512xf32>
    %320 = arith.addf %318, %319 : vector<2x512xf32>
    %321 = vector.extract_strided_slice %317 {offsets = [0, 512], sizes = [2, 512], strides = [1, 1]} : vector<2x1024xf32> to vector<2x512xf32>
    %c4_81 = arith.constant 4 : index
    %c512_82 = arith.constant 512 : index
    %322 = vector.load %arg10[%c4_81, %c512_82] : memref<16x1024xf32, #tpu.memory_space<vmem>>, vector<2x512xf32>
    %323 = arith.addf %321, %322 : vector<2x512xf32>
    %324 = vector.extract_strided_slice %320 {offsets = [0, 0], sizes = [2, 128], strides = [1, 1]} : vector<2x512xf32> to vector<2x128xf32>
    %325 = arith.negf %324 : vector<2x128xf32>
    %326 = math.exp %325 : vector<2x128xf32>
    %cst_83 = arith.constant 1.000000e+00 : f32
    %327 = vector.broadcast %cst_83 : f32 to vector<2x128xf32>
    %328 = arith.addf %327, %326 : vector<2x128xf32>
    %329 = arith.divf %327, %328 : vector<2x128xf32>
    %330 = vector.extract_strided_slice %320 {offsets = [0, 128], sizes = [2, 128], strides = [1, 1]} : vector<2x512xf32> to vector<2x128xf32>
    %331 = arith.negf %330 : vector<2x128xf32>
    %332 = math.exp %331 : vector<2x128xf32>
    %cst_84 = arith.constant 1.000000e+00 : f32
    %333 = vector.broadcast %cst_84 : f32 to vector<2x128xf32>
    %334 = arith.addf %333, %332 : vector<2x128xf32>
    %335 = arith.divf %333, %334 : vector<2x128xf32>
    %336 = vector.extract_strided_slice %320 {offsets = [0, 256], sizes = [2, 128], strides = [1, 1]} : vector<2x512xf32> to vector<2x128xf32>
    %337 = math.tanh %336 : vector<2x128xf32>
    %338 = vector.extract_strided_slice %320 {offsets = [0, 384], sizes = [2, 128], strides = [1, 1]} : vector<2x512xf32> to vector<2x128xf32>
    %339 = arith.negf %338 : vector<2x128xf32>
    %340 = math.exp %339 : vector<2x128xf32>
    %cst_85 = arith.constant 1.000000e+00 : f32
    %341 = vector.broadcast %cst_85 : f32 to vector<2x128xf32>
    %342 = arith.addf %341, %340 : vector<2x128xf32>
    %343 = arith.divf %341, %342 : vector<2x128xf32>
    %344 = vector.extract_strided_slice %323 {offsets = [0, 0], sizes = [2, 128], strides = [1, 1]} : vector<2x512xf32> to vector<2x128xf32>
    %345 = arith.negf %344 : vector<2x128xf32>
    %346 = math.exp %345 : vector<2x128xf32>
    %cst_86 = arith.constant 1.000000e+00 : f32
    %347 = vector.broadcast %cst_86 : f32 to vector<2x128xf32>
    %348 = arith.addf %347, %346 : vector<2x128xf32>
    %349 = arith.divf %347, %348 : vector<2x128xf32>
    %350 = vector.extract_strided_slice %323 {offsets = [0, 128], sizes = [2, 128], strides = [1, 1]} : vector<2x512xf32> to vector<2x128xf32>
    %351 = arith.negf %350 : vector<2x128xf32>
    %352 = math.exp %351 : vector<2x128xf32>
    %cst_87 = arith.constant 1.000000e+00 : f32
    %353 = vector.broadcast %cst_87 : f32 to vector<2x128xf32>
    %354 = arith.addf %353, %352 : vector<2x128xf32>
    %355 = arith.divf %353, %354 : vector<2x128xf32>
    %356 = vector.extract_strided_slice %323 {offsets = [0, 256], sizes = [2, 128], strides = [1, 1]} : vector<2x512xf32> to vector<2x128xf32>
    %357 = math.tanh %356 : vector<2x128xf32>
    %358 = vector.extract_strided_slice %323 {offsets = [0, 384], sizes = [2, 128], strides = [1, 1]} : vector<2x512xf32> to vector<2x128xf32>
    %359 = arith.negf %358 : vector<2x128xf32>
    %360 = math.exp %359 : vector<2x128xf32>
    %cst_88 = arith.constant 1.000000e+00 : f32
    %361 = vector.broadcast %cst_88 : f32 to vector<2x128xf32>
    %362 = arith.addf %361, %360 : vector<2x128xf32>
    %363 = arith.divf %361, %362 : vector<2x128xf32>
    %364 = arith.mulf %335, %305 : vector<2x128xf32>
    %365 = arith.mulf %329, %337 : vector<2x128xf32>
    %366 = arith.addf %364, %365 : vector<2x128xf32>
    %367 = arith.mulf %355, %308 : vector<2x128xf32>
    %368 = arith.mulf %349, %357 : vector<2x128xf32>
    %369 = arith.addf %367, %368 : vector<2x128xf32>
    %370 = math.tanh %366 : vector<2x128xf32>
    %371 = arith.mulf %343, %370 : vector<2x128xf32>
    %372 = math.tanh %369 : vector<2x128xf32>
    %373 = arith.mulf %363, %372 : vector<2x128xf32>
    %374 = tpu.concatenate %371, %373 in 1 : vector<2x128xf32>, vector<2x128xf32> -> vector<2x256xf32>
    %c10_89 = arith.constant 10 : index
    %c0_90 = arith.constant 0 : index
    %375 = vector.load %arg9[%c10_89, %c0_90] : memref<16x256xf32, #tpu.memory_space<vmem>>, vector<2x128xf32>
    tpu.vector_store %arg9[%c10_89, %c0_90], %371 {strides = array<i32>} : memref<16x256xf32, #tpu.memory_space<vmem>>, vector<2x128xf32>,
    %c4_91 = arith.constant 4 : index
    %c128_92 = arith.constant 128 : index
    %376 = vector.load %arg9[%c4_91, %c128_92] : memref<16x256xf32, #tpu.memory_space<vmem>>, vector<2x128xf32>
    tpu.vector_store %arg9[%c4_91, %c128_92], %373 {strides = array<i32>} : memref<16x256xf32, #tpu.memory_space<vmem>>, vector<2x128xf32>,
    %377 = arith.truncf %374 : vector<2x256xf32> to vector<2x256xbf16>
    %cst_93 = arith.constant dense<0.000000e+00> : vector<2x1024xf32>
    %378 = tpu.matmul %377, %7, %cst_93 {dimension_numbers = #tpu.dot_dimension_numbers<[1], [0], [0], [1], [0, 0, 1, 1], [], []>} : vector<2x256xbf16>, vector<256x1024xbf16>, vector<2x1024xf32> -> vector<2x1024xf32>
    %379 = vector.extract_strided_slice %378 {offsets = [0, 0], sizes = [2, 512], strides = [1, 1]} : vector<2x1024xf32> to vector<2x512xf32>
    %c12_94 = arith.constant 12 : index
    %c0_95 = arith.constant 0 : index
    %380 = vector.load %arg10[%c12_94, %c0_95] : memref<16x1024xf32, #tpu.memory_space<vmem>>, vector<2x512xf32>
    %381 = arith.addf %379, %380 : vector<2x512xf32>
    %382 = vector.extract_strided_slice %378 {offsets = [0, 512], sizes = [2, 512], strides = [1, 1]} : vector<2x1024xf32> to vector<2x512xf32>
    %c2_96 = arith.constant 2 : index
    %c512_97 = arith.constant 512 : index
    %383 = vector.load %arg10[%c2_96, %c512_97] : memref<16x1024xf32, #tpu.memory_space<vmem>>, vector<2x512xf32>
    %384 = arith.addf %382, %383 : vector<2x512xf32>
    %385 = vector.extract_strided_slice %381 {offsets = [0, 0], sizes = [2, 128], strides = [1, 1]} : vector<2x512xf32> to vector<2x128xf32>
    %386 = arith.negf %385 : vector<2x128xf32>
    %387 = math.exp %386 : vector<2x128xf32>
    %cst_98 = arith.constant 1.000000e+00 : f32
    %388 = vector.broadcast %cst_98 : f32 to vector<2x128xf32>
    %389 = arith.addf %388, %387 : vector<2x128xf32>
    %390 = arith.divf %388, %389 : vector<2x128xf32>
    %391 = vector.extract_strided_slice %381 {offsets = [0, 128], sizes = [2, 128], strides = [1, 1]} : vector<2x512xf32> to vector<2x128xf32>
    %392 = arith.negf %391 : vector<2x128xf32>
    %393 = math.exp %392 : vector<2x128xf32>
    %cst_99 = arith.constant 1.000000e+00 : f32
    %394 = vector.broadcast %cst_99 : f32 to vector<2x128xf32>
    %395 = arith.addf %394, %393 : vector<2x128xf32>
    %396 = arith.divf %394, %395 : vector<2x128xf32>
    %397 = vector.extract_strided_slice %381 {offsets = [0, 256], sizes = [2, 128], strides = [1, 1]} : vector<2x512xf32> to vector<2x128xf32>
    %398 = math.tanh %397 : vector<2x128xf32>
    %399 = vector.extract_strided_slice %381 {offsets = [0, 384], sizes = [2, 128], strides = [1, 1]} : vector<2x512xf32> to vector<2x128xf32>
    %400 = arith.negf %399 : vector<2x128xf32>
    %401 = math.exp %400 : vector<2x128xf32>
    %cst_100 = arith.constant 1.000000e+00 : f32
    %402 = vector.broadcast %cst_100 : f32 to vector<2x128xf32>
    %403 = arith.addf %402, %401 : vector<2x128xf32>
    %404 = arith.divf %402, %403 : vector<2x128xf32>
    %405 = vector.extract_strided_slice %384 {offsets = [0, 0], sizes = [2, 128], strides = [1, 1]} : vector<2x512xf32> to vector<2x128xf32>
    %406 = arith.negf %405 : vector<2x128xf32>
    %407 = math.exp %406 : vector<2x128xf32>
    %cst_101 = arith.constant 1.000000e+00 : f32
    %408 = vector.broadcast %cst_101 : f32 to vector<2x128xf32>
    %409 = arith.addf %408, %407 : vector<2x128xf32>
    %410 = arith.divf %408, %409 : vector<2x128xf32>
    %411 = vector.extract_strided_slice %384 {offsets = [0, 128], sizes = [2, 128], strides = [1, 1]} : vector<2x512xf32> to vector<2x128xf32>
    %412 = arith.negf %411 : vector<2x128xf32>
    %413 = math.exp %412 : vector<2x128xf32>
    %cst_102 = arith.constant 1.000000e+00 : f32
    %414 = vector.broadcast %cst_102 : f32 to vector<2x128xf32>
    %415 = arith.addf %414, %413 : vector<2x128xf32>
    %416 = arith.divf %414, %415 : vector<2x128xf32>
    %417 = vector.extract_strided_slice %384 {offsets = [0, 256], sizes = [2, 128], strides = [1, 1]} : vector<2x512xf32> to vector<2x128xf32>
    %418 = math.tanh %417 : vector<2x128xf32>
    %419 = vector.extract_strided_slice %384 {offsets = [0, 384], sizes = [2, 128], strides = [1, 1]} : vector<2x512xf32> to vector<2x128xf32>
    %420 = arith.negf %419 : vector<2x128xf32>
    %421 = math.exp %420 : vector<2x128xf32>
    %cst_103 = arith.constant 1.000000e+00 : f32
    %422 = vector.broadcast %cst_103 : f32 to vector<2x128xf32>
    %423 = arith.addf %422, %421 : vector<2x128xf32>
    %424 = arith.divf %422, %423 : vector<2x128xf32>
    %425 = arith.mulf %396, %366 : vector<2x128xf32>
    %426 = arith.mulf %390, %398 : vector<2x128xf32>
    %427 = arith.addf %425, %426 : vector<2x128xf32>
    %428 = arith.mulf %416, %369 : vector<2x128xf32>
    %429 = arith.mulf %410, %418 : vector<2x128xf32>
    %430 = arith.addf %428, %429 : vector<2x128xf32>
    %431 = math.tanh %427 : vector<2x128xf32>
    %432 = arith.mulf %404, %431 : vector<2x128xf32>
    %433 = math.tanh %430 : vector<2x128xf32>
    %434 = arith.mulf %424, %433 : vector<2x128xf32>
    %435 = tpu.concatenate %432, %434 in 1 : vector<2x128xf32>, vector<2x128xf32> -> vector<2x256xf32>
    %c12_104 = arith.constant 12 : index
    %c0_105 = arith.constant 0 : index
    %436 = vector.load %arg9[%c12_104, %c0_105] : memref<16x256xf32, #tpu.memory_space<vmem>>, vector<2x128xf32>
    tpu.vector_store %arg9[%c12_104, %c0_105], %432 {strides = array<i32>} : memref<16x256xf32, #tpu.memory_space<vmem>>, vector<2x128xf32>,
    %c2_106 = arith.constant 2 : index
    %c128_107 = arith.constant 128 : index
    %437 = vector.load %arg9[%c2_106, %c128_107] : memref<16x256xf32, #tpu.memory_space<vmem>>, vector<2x128xf32>
    tpu.vector_store %arg9[%c2_106, %c128_107], %434 {strides = array<i32>} : memref<16x256xf32, #tpu.memory_space<vmem>>, vector<2x128xf32>,
    %438 = arith.truncf %435 : vector<2x256xf32> to vector<2x256xbf16>
    %cst_108 = arith.constant dense<0.000000e+00> : vector<2x1024xf32>
    %439 = tpu.matmul %438, %7, %cst_108 {dimension_numbers = #tpu.dot_dimension_numbers<[1], [0], [0], [1], [0, 0, 1, 1], [], []>} : vector<2x256xbf16>, vector<256x1024xbf16>, vector<2x1024xf32> -> vector<2x1024xf32>
    %440 = vector.extract_strided_slice %439 {offsets = [0, 0], sizes = [2, 512], strides = [1, 1]} : vector<2x1024xf32> to vector<2x512xf32>
    %c14_109 = arith.constant 14 : index
    %c0_110 = arith.constant 0 : index
    %441 = vector.load %arg10[%c14_109, %c0_110] : memref<16x1024xf32, #tpu.memory_space<vmem>>, vector<2x512xf32>
    %442 = arith.addf %440, %441 : vector<2x512xf32>
    %443 = vector.extract_strided_slice %439 {offsets = [0, 512], sizes = [2, 512], strides = [1, 1]} : vector<2x1024xf32> to vector<2x512xf32>
    %c0_111 = arith.constant 0 : index
    %c512_112 = arith.constant 512 : index
    %444 = vector.load %arg10[%c0_111, %c512_112] : memref<16x1024xf32, #tpu.memory_space<vmem>>, vector<2x512xf32>
    %445 = arith.addf %443, %444 : vector<2x512xf32>
    %446 = vector.extract_strided_slice %442 {offsets = [0, 0], sizes = [2, 128], strides = [1, 1]} : vector<2x512xf32> to vector<2x128xf32>
    %447 = arith.negf %446 : vector<2x128xf32>
    %448 = math.exp %447 : vector<2x128xf32>
    %cst_113 = arith.constant 1.000000e+00 : f32
    %449 = vector.broadcast %cst_113 : f32 to vector<2x128xf32>
    %450 = arith.addf %449, %448 : vector<2x128xf32>
    %451 = arith.divf %449, %450 : vector<2x128xf32>
    %452 = vector.extract_strided_slice %442 {offsets = [0, 128], sizes = [2, 128], strides = [1, 1]} : vector<2x512xf32> to vector<2x128xf32>
    %453 = arith.negf %452 : vector<2x128xf32>
    %454 = math.exp %453 : vector<2x128xf32>
    %cst_114 = arith.constant 1.000000e+00 : f32
    %455 = vector.broadcast %cst_114 : f32 to vector<2x128xf32>
    %456 = arith.addf %455, %454 : vector<2x128xf32>
    %457 = arith.divf %455, %456 : vector<2x128xf32>
    %458 = vector.extract_strided_slice %442 {offsets = [0, 256], sizes = [2, 128], strides = [1, 1]} : vector<2x512xf32> to vector<2x128xf32>
    %459 = math.tanh %458 : vector<2x128xf32>
    %460 = vector.extract_strided_slice %442 {offsets = [0, 384], sizes = [2, 128], strides = [1, 1]} : vector<2x512xf32> to vector<2x128xf32>
    %461 = arith.negf %460 : vector<2x128xf32>
    %462 = math.exp %461 : vector<2x128xf32>
    %cst_115 = arith.constant 1.000000e+00 : f32
    %463 = vector.broadcast %cst_115 : f32 to vector<2x128xf32>
    %464 = arith.addf %463, %462 : vector<2x128xf32>
    %465 = arith.divf %463, %464 : vector<2x128xf32>
    %466 = vector.extract_strided_slice %445 {offsets = [0, 0], sizes = [2, 128], strides = [1, 1]} : vector<2x512xf32> to vector<2x128xf32>
    %467 = arith.negf %466 : vector<2x128xf32>
    %468 = math.exp %467 : vector<2x128xf32>
    %cst_116 = arith.constant 1.000000e+00 : f32
    %469 = vector.broadcast %cst_116 : f32 to vector<2x128xf32>
    %470 = arith.addf %469, %468 : vector<2x128xf32>
    %471 = arith.divf %469, %470 : vector<2x128xf32>
    %472 = vector.extract_strided_slice %445 {offsets = [0, 128], sizes = [2, 128], strides = [1, 1]} : vector<2x512xf32> to vector<2x128xf32>
    %473 = arith.negf %472 : vector<2x128xf32>
    %474 = math.exp %473 : vector<2x128xf32>
    %cst_117 = arith.constant 1.000000e+00 : f32
    %475 = vector.broadcast %cst_117 : f32 to vector<2x128xf32>
    %476 = arith.addf %475, %474 : vector<2x128xf32>
    %477 = arith.divf %475, %476 : vector<2x128xf32>
    %478 = vector.extract_strided_slice %445 {offsets = [0, 256], sizes = [2, 128], strides = [1, 1]} : vector<2x512xf32> to vector<2x128xf32>
    %479 = math.tanh %478 : vector<2x128xf32>
    %480 = vector.extract_strided_slice %445 {offsets = [0, 384], sizes = [2, 128], strides = [1, 1]} : vector<2x512xf32> to vector<2x128xf32>
    %481 = arith.negf %480 : vector<2x128xf32>
    %482 = math.exp %481 : vector<2x128xf32>
    %cst_118 = arith.constant 1.000000e+00 : f32
    %483 = vector.broadcast %cst_118 : f32 to vector<2x128xf32>
    %484 = arith.addf %483, %482 : vector<2x128xf32>
    %485 = arith.divf %483, %484 : vector<2x128xf32>
    %486 = arith.mulf %457, %427 : vector<2x128xf32>
    %487 = arith.mulf %451, %459 : vector<2x128xf32>
    %488 = arith.addf %486, %487 : vector<2x128xf32>
    %489 = arith.mulf %477, %430 : vector<2x128xf32>
    %490 = arith.mulf %471, %479 : vector<2x128xf32>
    %491 = arith.addf %489, %490 : vector<2x128xf32>
    %492 = math.tanh %488 : vector<2x128xf32>
    %493 = arith.mulf %465, %492 : vector<2x128xf32>
    %494 = math.tanh %491 : vector<2x128xf32>
    %495 = arith.mulf %485, %494 : vector<2x128xf32>
    %c14_119 = arith.constant 14 : index
    %c0_120 = arith.constant 0 : index
    %496 = vector.load %arg9[%c14_119, %c0_120] : memref<16x256xf32, #tpu.memory_space<vmem>>, vector<2x128xf32>
    tpu.vector_store %arg9[%c14_119, %c0_120], %493 {strides = array<i32>} : memref<16x256xf32, #tpu.memory_space<vmem>>, vector<2x128xf32>,
    %c0_121 = arith.constant 0 : index
    %c128_122 = arith.constant 128 : index
    %497 = vector.load %arg9[%c0_121, %c128_122] : memref<16x256xf32, #tpu.memory_space<vmem>>, vector<2x128xf32>
    tpu.vector_store %arg9[%c0_121, %c128_122], %495 {strides = array<i32>} : memref<16x256xf32, #tpu.memory_space<vmem>>, vector<2x128xf32>,
    %c14_123 = arith.constant 14 : index
    %c0_124 = arith.constant 0 : index
    %498 = vector.load %arg9[%c14_123, %c0_124] : memref<16x256xf32, #tpu.memory_space<vmem>>, vector<2x256xf32>
    %499 = arith.truncf %498 : vector<2x256xf32> to vector<2x256xbf16>
    %c0_125 = arith.constant 0 : index
    %c0_126 = arith.constant 0 : index
    %500 = vector.load %arg4[%c0_125, %c0_126] : memref<256x64xbf16, #tpu.memory_space<vmem>>, vector<256x64xbf16>
    %cst_127 = arith.constant dense<0.000000e+00> : vector<2x64xf32>
    %501 = tpu.matmul %499, %500, %cst_127 {dimension_numbers = #tpu.dot_dimension_numbers<[1], [0], [0], [1], [0, 0, 1, 1], [], []>} : vector<2x256xbf16>, vector<256x64xbf16>, vector<2x64xf32> -> vector<2x64xf32>
    %c0_128 = arith.constant 0 : index
    %c0_129 = arith.constant 0 : index
    %502 = vector.load %arg5[%c0_128, %c0_129] : memref<1x64xf32, #tpu.memory_space<vmem>>, vector<1x64xf32>
    %503 = vector.broadcast %502 : vector<1x64xf32> to vector<2x64xf32>
    %504 = arith.addf %501, %503 : vector<2x64xf32>
    %505 = arith.truncf %504 : vector<2x64xf32> to vector<2x64xbf16>
    %c0_130 = arith.constant 0 : index
    %c0_131 = arith.constant 0 : index
    %506 = vector.load %arg6[%c0_130, %c0_131] : memref<64x4xbf16, #tpu.memory_space<vmem>>, vector<64x4xbf16>
    %cst_132 = arith.constant dense<0.000000e+00> : vector<2x4xf32>
    %507 = tpu.matmul %505, %506, %cst_132 {dimension_numbers = #tpu.dot_dimension_numbers<[1], [0], [0], [1], [0, 0, 1, 1], [], []>} : vector<2x64xbf16>, vector<64x4xbf16>, vector<2x4xf32> -> vector<2x4xf32>
    %c0_133 = arith.constant 0 : index
    %c0_134 = arith.constant 0 : index
    %508 = vector.load %arg7[%c0_133, %c0_134] : memref<1x4xf32, #tpu.memory_space<vmem>>, vector<1x4xf32>
    %509 = vector.broadcast %508 : vector<1x4xf32> to vector<2x4xf32>
    %510 = arith.addf %507, %509 : vector<2x4xf32>
    %cst_135 = arith.constant dense<0xFF800000> : vector<2xf32>
    %511 = vector.multi_reduction <maximumf>, %510, %cst_135 [1] : vector<2x4xf32> to vector<2xf32>
    %512 = vector.shape_cast %511 : vector<2xf32> to vector<2x1xf32>
    %513 = vector.broadcast %512 : vector<2x1xf32> to vector<2x4xf32>
    %514 = arith.subf %510, %513 : vector<2x4xf32>
    %515 = math.exp %514 : vector<2x4xf32>
    %cst_136 = arith.constant dense<0.000000e+00> : vector<2xf32>
    %516 = vector.multi_reduction <add>, %515, %cst_136 [1] : vector<2x4xf32> to vector<2xf32>
    %517 = vector.shape_cast %516 : vector<2xf32> to vector<2x1xf32>
    %518 = math.log %517 : vector<2x1xf32>
    %519 = vector.broadcast %518 : vector<2x1xf32> to vector<2x4xf32>
    %520 = arith.subf %514, %519 : vector<2x4xf32>
    %c0_137 = arith.constant 0 : index
    %c0_138 = arith.constant 0 : index
    %521 = vector.load %arg8[%c0_137, %c0_138] : memref<2x4xf32, #tpu.memory_space<vmem>>, vector<2x4xf32>
    tpu.vector_store %arg8[%c0_137, %c0_138], %520 {strides = array<i32>} : memref<2x4xf32, #tpu.memory_space<vmem>>, vector<2x4xf32>,
    return
  }
}

</mosaic_0001>

<bundles_post_ra>
// kernel: lstm_forward.1
= control target key start
LH: loop header
LB: loop body
LE: loop exit
PB: predicated region body
PF: predicated region fallthrough
CT: control target
= control target key end

     0   :  { %v6016_v8 = vmov 0   ;;  %vm176_vm0 = vcmask 261120   ;;  %s6007_s0 = inlined_call_operand.vmem [shape: bf16[16,32], index: 0, kind: input, shape index: {}]   ;;  %s6008_s1 = inlined_call_operand.vmem [shape: bf16[32,1024], index: 1, kind: input, shape index: {}]   ;;  %s6009_s2 = inlined_call_operand.vmem [shape: bf16[256,1024], index: 2, kind: input, shape index: {}]   ;;  %s6010_s3 = inlined_call_operand.vmem [shape: f32[1,1024], index: 3, kind: input, shape index: {}]   ;;  %s6011_s4 = inlined_call_operand.vmem [shape: bf16[256,64], index: 4, kind: input, shape index: {}]   ;;  %s6012_s5 = inlined_call_operand.vmem [shape: f32[1,64], index: 5, kind: input, shape index: {}]   ;;  %s6013_s6 = inlined_call_operand.vmem [shape: bf16[64,4], index: 6, kind: input, shape index: {}]   ;;  %s6014_s7 = inlined_call_operand.vmem [shape: f32[1,4], index: 7, kind: input, shape index: {}]   ;;  %s6015_s8 = inlined_call_operand.hbm [shape: f32[2,4], index: 8, kind: output, shape index: {}]  }
   0x1   :  { %v41_v0 = vld [vmem:[%s6008_s1 + $0x40] sm:$0xff]  ;;  %v43_v2 = vld [vmem:[%s6008_s1 + $0x50] sm:$0xff]  ;;  %212 = vmatprep.mubr.bf16.mxu1 %v6016_v8  ;;  %298 = vmatprep.mubr.bf16.mxu0 %v6016_v8  ;;  %v42_v15 = vld [vmem:[%s6008_s1 + $0x48] sm:$0xff] }
   0x2   :  { %v45_v1 = vld [vmem:[%s6008_s1 + $0x60] sm:$0xff]  ;;  %v47_v4 = vld [vmem:[%s6008_s1 + $0x70] sm:$0xff]  ;;  %v46_v17 = vld [vmem:[%s6008_s1 + $0x68] sm:$0xff] }
   0x3   :  { %v3477_v3 = vcombine.high %v41_v0, %v45_v1  ;;  %v3476_v5 = vcombine.low %v41_v0, %v45_v1  ;;  %v33_v6 = vld [vmem:[%s6008_s1] sm:$0xff]  ;;  %v3481_v9 = vcombine.high %v43_v2, %v47_v4  ;;  %v3480_v10 = vcombine.low %v43_v2, %v47_v4  ;;  %v35_v12 = vld [vmem:[%s6008_s1 + $0x10] sm:$0xff]  ;;  %v34_v23 = vld [vmem:[%s6008_s1 + $0x8] sm:$0xff] }
   0x4   :  { %v37_v7 = vld [vmem:[%s6008_s1 + $0x20] sm:$0xff]  ;;  %v39_v13 = vld [vmem:[%s6008_s1 + $0x30] sm:$0xff]  ;;  %v3479_v21 = vcombine.high %v42_v15, %v46_v17  ;;  %v38_v24 = vld [vmem:[%s6008_s1 + $0x28] sm:$0xff]  ;;  %v3478_v28 = vcombine.low %v42_v15, %v46_v17 }
   0x5   :  { %v3469_v11 = vcombine.high %v33_v6, %v37_v7  ;;  %192 = vmatprep.subr.bf16.mxu1 %v3477_v3  ;;  %v3473_v14 = vcombine.high %v35_v12, %v39_v13  ;;  %278 = vmatprep.subr.bf16.mxu0 %v3481_v9  ;;  %v3468_v16 = vcombine.low %v33_v6, %v37_v7  ;;  %v424_v18 = vld [vmem:[%s6009_s2 + $0x1c0] sm:$0xff]  ;;  %v44_v32 = vld [vmem:[%s6008_s1 + $0x58] sm:$0xff]  ;;  %v425_v48 = vld [vmem:[%s6009_s2 + $0x1c8] sm:$0xff] }
   0x6   :  { %193 = vmatpush1.bf16.msra.mxu1 %v3476_v5  ;;  %v428_v19 = vld [vmem:[%s6009_s2 + $0x1e0] sm:$0xff]  ;;  %279 = vmatpush1.bf16.msra.mxu0 %v3480_v10  ;;  %v3472_v20 = vcombine.low %v35_v12, %v39_v13  ;;  %v3471_v30 = vcombine.high %v34_v23, %v38_v24  ;;  %v48_v33 = vld [vmem:[%s6008_s1 + $0x78] sm:$0xff]  ;;  %v3470_v36 = vcombine.low %v34_v23, %v38_v24  ;;  %v429_v49 = vld [vmem:[%s6009_s2 + $0x1e8] sm:$0xff] }
   0x7   :  { %194 = vmatprep.subr.bf16.mxu1 %v3469_v11  ;;  %280 = vmatprep.subr.bf16.mxu0 %v3473_v14  ;;  %v4120_v22 = vcombine.high %v424_v18, %v428_v19  ;;  %v4131_v25 = vld [vmem:[%s6007_s0] sm:$0xff]   ;;  %v4139_v29 = vcombine.low %v424_v18, %v428_v19  ;;  %v3483_v38 = vcombine.high %v44_v32, %v48_v33  ;;  %v36_v40 = vld [vmem:[%s6008_s1 + $0x18] sm:$0xff]  ;;  %v417_v56 = vld [vmem:[%s6009_s2 + $0x188] sm:$0xff] }
   0x8   :  { %v416_v26 = vld [vmem:[%s6009_s2 + $0x180] sm:$0xff]  ;;  %v40_v41 = vld [vmem:[%s6008_s1 + $0x38] sm:$0xff]  ;;  %v3482_v44 = vcombine.low %v44_v32, %v48_v33  ;;  %v4204_v54 = vcombine.high %v425_v48, %v429_v49  ;;  %v421_v57 = vld [vmem:[%s6009_s2 + $0x1a8] sm:$0xff]  ;;  %v4221_v60 = vcombine.low %v425_v48, %v429_v49 }
   0x9   :  { %6302 = vst [vmem:[#allocation7_spill] sm:$0xff] %v4120_v22  ;;  %v420_v27 = vld [vmem:[%s6009_s2 + $0x1a0] sm:$0xff]  ;;  %6303 = vst [vmem:[#allocation8_spill] sm:$0xff] %v4139_v29  ;;  %v3475_v46 = vcombine.high %v36_v40, %v40_v41  ;;  %v3474_v52 = vcombine.low %v36_v40, %v40_v41  ;;  %v4227_v62 = vcombine.high %v417_v56, %v421_v57  ;;  %v409_v0 = vld [vmem:[%s6009_s2 + $0x148] sm:$0xff] }
   0xa   :  { %195 = vmatpush1.bf16.msra.mxu1 %v3468_v16  ;;  %281 = vmatpush1.bf16.msra.mxu0 %v3472_v20  ;;  %v4142_v31 = vcombine.high %v416_v26, %v420_v27  ;;  %v408_v34 = vld [vmem:[%s6009_s2 + $0x140] sm:$0xff]  ;;  %v4161_v37 = vcombine.low %v416_v26, %v420_v27  ;;  %6310 = vst [vmem:[#allocation15_spill] sm:$0xff] %v4204_v54  ;;  %6312 = vst [vmem:[#allocation17_spill] sm:$0xff] %v4221_v60  ;;  %v413_v1 = vld [vmem:[%s6009_s2 + $0x168] sm:$0xff] }
   0xb   :  { %235 = vmatprep.subr.bf16.mxu1 %v3479_v21  ;;  %1136 = vmatprep.subr.bf16.mxu0 %v4120_v22  ;;  %v412_v35 = vld [vmem:[%s6009_s2 + $0x160] sm:$0xff]  ;;  %6314 = vst [vmem:[#allocation19_spill] sm:$0xff] %v4227_v62  ;;  %v4247_v4 = vcombine.low %v417_v56, %v421_v57  ;;  %v4254_v6 = vcombine.high %v409_v0, %v413_v1  ;;  %v401_v9 = vld [vmem:[%s6009_s2 + $0x108] sm:$0xff] }
   0xc   :  { %6304 = vst [vmem:[#allocation9_spill] sm:$0xff] %v4142_v31  ;;  %6305 = vst [vmem:[#allocation10_spill] sm:$0xff] %v4161_v37  ;;  %v4165_v39 = vcombine.high %v408_v34, %v412_v35  ;;  %v400_v42 = vld [vmem:[%s6009_s2 + $0x100] sm:$0xff]  ;;  %v4181_v45 = vcombine.low %v408_v34, %v412_v35  ;;  %v405_v10 = vld [vmem:[%s6009_s2 + $0x128] sm:$0xff]  ;;  %v4272_v13 = vcombine.low %v409_v0, %v413_v1 }
   0xd   :  { %3484 = vmatmul.mubr.msk.bf16.vlgmr.msra.gmra.mxu1 %vm176_vm0, %v4131_v25  ;;  %3486 = vmatmul.mubr.msk.bf16.vlgmr.msra.gmra.mxu0 %vm176_vm0, %v4131_v25  ;;  %v404_v43 = vld [vmem:[%s6009_s2 + $0x120] sm:$0xff]  ;;  %6316 = vst [vmem:[#allocation21_spill] sm:$0xff] %v4247_v4  ;;  %6318 = vst [vmem:[#allocation23_spill] sm:$0xff] %v4254_v6  ;;  %v4278_v15 = vcombine.high %v401_v9, %v405_v10  ;;  %v393_v17 = vld [vmem:[%s6009_s2 + $0xc8] sm:$0xff]  ;;  %v4296_v21 = vcombine.low %v401_v9, %v405_v10 }
   0xe   :  { %236 = vmatpush1.bf16.msra.mxu1 %v3478_v28  ;;  %1137 = vmatpush1.bf16.msra.mxu0 %v4139_v29  ;;  %6306 = vst [vmem:[#allocation11_spill] sm:$0xff] %v4165_v39  ;;  %6307 = vst [vmem:[#allocation12_spill] sm:$0xff] %v4181_v45  ;;  %v4184_v47 = vcombine.high %v400_v42, %v404_v43  ;;  %v392_v50 = vld [vmem:[%s6009_s2 + $0xc0] sm:$0xff]  ;;  %v4202_v53 = vcombine.low %v400_v42, %v404_v43  ;;  %v397_v18 = vld [vmem:[%s6009_s2 + $0xe8] sm:$0xff] }
   0xf   :  { %237 = vmatprep.subr.bf16.mxu1 %v3471_v30  ;;  %1138 = vmatprep.subr.bf16.mxu0 %v4142_v31  ;;  %v396_v51 = vld [vmem:[%s6009_s2 + $0xe0] sm:$0xff]  ;;  %6320 = vst [vmem:[#allocation25_spill] sm:$0xff] %v4272_v13  ;;  %6322 = vst [vmem:[#allocation27_spill] sm:$0xff] %v4278_v15  ;;  %v4302_v24 = vcombine.high %v393_v17, %v397_v18  ;;  %v385_v26 = vld [vmem:[%s6009_s2 + $0x88] sm:$0xff]  ;;  %v4320_v32 = vcombine.low %v393_v17, %v397_v18 }
  0x10   :  { %255 = vmatprep.mubr.bf16.mxu1 %v6016_v8  ;;  %1168 = vmatprep.mubr.bf16.mxu0 %v6016_v8  ;;  %6308 = vst [vmem:[#allocation13_spill] sm:$0xff] %v4184_v47  ;;  %6309 = vst [vmem:[#allocation14_spill] sm:$0xff] %v4202_v53  ;;  %v4207_v55 = vcombine.high %v392_v50, %v396_v51  ;;  %v384_v58 = vld [vmem:[%s6009_s2 + $0x80] sm:$0xff]  ;;  %v4225_v61 = vcombine.low %v392_v50, %v396_v51  ;;  %v389_v27 = vld [vmem:[%s6009_s2 + $0xa8] sm:$0xff] }
  0x11   :  { %v388_v59 = vld [vmem:[%s6009_s2 + $0xa0] sm:$0xff]  ;;  %6324 = vst [vmem:[#allocation29_spill] sm:$0xff] %v4296_v21  ;;  %6326 = vst [vmem:[#allocation31_spill] sm:$0xff] %v4302_v24  ;;  %v4326_v34 = vcombine.high %v385_v26, %v389_v27  ;;  %v4344_v42 = vcombine.low %v385_v26, %v389_v27  ;;  %v369_v48 = vld [vmem:[%s6009_s2 + $0x8] sm:$0xff] }
  0x12   :  { %238 = vmatpush1.bf16.msra.mxu1 %v3470_v36  ;;  %1139 = vmatpush1.bf16.msra.mxu0 %v4161_v37  ;;  %6311 = vst [vmem:[#allocation16_spill] sm:$0xff] %v4207_v55  ;;  %6313 = vst [vmem:[#allocation18_spill] sm:$0xff] %v4225_v61  ;;  %v4230_v63 = vcombine.high %v384_v58, %v388_v59  ;;  %v376_v2 = vld [vmem:[%s6009_s2 + $0x40] sm:$0xff]  ;;  %v4252_v5 = vcombine.low %v384_v58, %v388_v59  ;;  %v377_v36 = vld [vmem:[%s6009_s2 + $0x48] sm:$0xff] }
  0x13   :  { %321 = vmatprep.subr.bf16.mxu1 %v3483_v38  ;;  %1140 = vmatprep.subr.bf16.mxu0 %v4165_v39  ;;  %v380_v3 = vld [vmem:[%s6009_s2 + $0x60] sm:$0xff]  ;;  %6328 = vst [vmem:[#allocation33_spill] sm:$0xff] %v4320_v32  ;;  %6330 = vst [vmem:[#allocation35_spill] sm:$0xff] %v4326_v34  ;;  %v381_v38 = vld [vmem:[%s6009_s2 + $0x68] sm:$0xff] }
  0x14   :  { %6315 = vst [vmem:[#allocation20_spill] sm:$0xff] %v4230_v63  ;;  %6317 = vst [vmem:[#allocation22_spill] sm:$0xff] %v4252_v5  ;;  %v4257_v7 = vcombine.high %v376_v2, %v380_v3  ;;  %v368_v11 = vld [vmem:[%s6009_s2] sm:$0xff]  ;;  %v4276_v14 = vcombine.low %v376_v2, %v380_v3  ;;  %v373_v49 = vld [vmem:[%s6009_s2 + $0x28] sm:$0xff] }
  0x15   :  { %3485 = vmatmul.mubr.msk.bf16.vlgmr.msra.gmra.mxu1 %vm176_vm0, %v4131_v25  ;;  %v372_v12 = vld [vmem:[%s6009_s2 + $0x20] sm:$0xff]  ;;  %6332 = vst [vmem:[#allocation37_spill] sm:$0xff] %v4344_v42  ;;  %v489_v56 = vld [vmem:[%s6009_s2 + $0x3c8] sm:$0xff]  ;;  %v4377_v58 = vcombine.high %v369_v48, %v373_v49  ;;  %v4392_v3 = vcombine.low %v369_v48, %v373_v49 }
  0x16   :  { %322 = vmatpush1.bf16.msra.mxu1 %v3482_v44  ;;  %341 = vmatprep.mubr.bf16.mxu1 %v6016_v8  ;;  %6319 = vst [vmem:[#allocation24_spill] sm:$0xff] %v4257_v7  ;;  %6321 = vst [vmem:[#allocation26_spill] sm:$0xff] %v4276_v14  ;;  %v4281_v16 = vcombine.high %v368_v11, %v372_v12  ;;  %v488_v19 = vld [vmem:[%s6009_s2 + $0x3c0] sm:$0xff]  ;;  %v4300_v23 = vcombine.low %v368_v11, %v372_v12  ;;  %v493_v1 = vld [vmem:[%s6009_s2 + $0x3e8] sm:$0xff] }
  0x17   :  { %1141 = vmatpush1.bf16.msra.mxu0 %v4181_v45  ;;  %323 = vmatprep.subr.bf16.mxu1 %v3475_v46  ;;  %v492_v20 = vld [vmem:[%s6009_s2 + $0x3e0] sm:$0xff]  ;;  %v4350_v44 = vcombine.high %v377_v36, %v381_v38  ;;  %6338 = vst [vmem:[#allocation43_spill] sm:$0xff] %v4377_v58  ;;  %6340 = vst [vmem:[#allocation45_spill] sm:$0xff] %v4392_v3  ;;  %v481_v9 = vld [vmem:[%s6009_s2 + $0x388] sm:$0xff]  ;;  %v4404_v12 = vcombine.high %v489_v56, %v493_v1 }
  0x18   :  { %1142 = vmatprep.subr.bf16.mxu0 %v4184_v47  ;;  %6323 = vst [vmem:[#allocation28_spill] sm:$0xff] %v4281_v16  ;;  %6325 = vst [vmem:[#allocation30_spill] sm:$0xff] %v4300_v23  ;;  %v480_v28 = vld [vmem:[%s6009_s2 + $0x380] sm:$0xff]  ;;  %v4324_v33 = vcombine.low %v488_v19, %v492_v20  ;;  %v485_v10 = vld [vmem:[%s6009_s2 + $0x3a8] sm:$0xff] }
  0x19   :  { %v484_v30 = vld [vmem:[%s6009_s2 + $0x3a0] sm:$0xff]  ;;  %6334 = vst [vmem:[#allocation39_spill] sm:$0xff] %v4350_v44  ;;  %6342 = vst [vmem:[#allocation47_spill] sm:$0xff] %v4404_v12  ;;  %v473_v26 = vld [vmem:[%s6009_s2 + $0x348] sm:$0xff] }
  0x1a   :  { %324 = vmatpush1.bf16.msra.mxu1 %v3474_v52  ;;  %6329 = vst [vmem:[#allocation34_spill] sm:$0xff] %v4324_v33  ;;  %v4329_v35 = vcombine.high %v480_v28, %v484_v30  ;;  %v472_v40 = vld [vmem:[%s6009_s2 + $0x340] sm:$0xff]  ;;  %v4348_v43 = vcombine.low %v480_v28, %v484_v30  ;;  %v4368_v52 = vcombine.low %v377_v36, %v381_v38  ;;  %v477_v27 = vld [vmem:[%s6009_s2 + $0x368] sm:$0xff] }
  0x1b   :  { %1143 = vmatpush1.bf16.msra.mxu0 %v4202_v53  ;;  %1177 = vmatprep.subr.bf16.mxu1 %v4204_v54  ;;  %v476_v41 = vld [vmem:[%s6009_s2 + $0x360] sm:$0xff]  ;;  %v4428_v30 = vcombine.high %v481_v9, %v485_v10  ;;  %v465_v48 = vld [vmem:[%s6009_s2 + $0x308] sm:$0xff] }
  0x1c   :  { %1144 = vmatprep.subr.bf16.mxu0 %v4207_v55  ;;  %6331 = vst [vmem:[#allocation36_spill] sm:$0xff] %v4329_v35  ;;  %6333 = vst [vmem:[#allocation38_spill] sm:$0xff] %v4348_v43  ;;  %v4353_v46 = vcombine.high %v472_v40, %v476_v41  ;;  %v464_v50 = vld [vmem:[%s6009_s2 + $0x300] sm:$0xff]  ;;  %v4375_v57 = vcombine.low %v472_v40, %v476_v41  ;;  %v4440_v41 = vcombine.low %v481_v9, %v485_v10  ;;  %v469_v49 = vld [vmem:[%s6009_s2 + $0x328] sm:$0xff] }
  0x1d   :  { %3487 = vmatmul.mubr.msk.bf16.vlgmr.msra.gmra.mxu1 %vm176_vm0, %v4131_v25  ;;  %v4305_v25 = vcombine.high %v488_v19, %v492_v20  ;;  %v468_v51 = vld [vmem:[%s6009_s2 + $0x320] sm:$0xff]  ;;  %6336 = vst [vmem:[#allocation41_spill] sm:$0xff] %v4368_v52  ;;  %v4416_v20 = vcombine.low %v489_v56, %v493_v1  ;;  %6346 = vst [vmem:[#allocation51_spill] sm:$0xff] %v4428_v30 }
  0x1e   :  { %1178 = vmatpush1.bf16.msra.mxu1 %v4221_v60  ;;  %1209 = vmatprep.mubr.bf16.mxu1 %v6016_v8  ;;  %6335 = vst [vmem:[#allocation40_spill] sm:$0xff] %v4353_v46  ;;  %6337 = vst [vmem:[#allocation42_spill] sm:$0xff] %v4375_v57  ;;  %v456_v59 = vld [vmem:[%s6009_s2 + $0x2c0] sm:$0xff]  ;;  %v4389_v2 = vcombine.high %v464_v50, %v468_v51  ;;  %v4402_v11 = vcombine.low %v464_v50, %v468_v51 }
  0x1f   :  { %1145 = vmatpush1.bf16.msra.mxu0 %v4225_v61  ;;  %1179 = vmatprep.subr.bf16.mxu1 %v4227_v62  ;;  %6327 = vst [vmem:[#allocation32_spill] sm:$0xff] %v4305_v25  ;;  %v460_v0 = vld [vmem:[%s6009_s2 + $0x2e0] sm:$0xff]  ;;  %6344 = vst [vmem:[#allocation49_spill] sm:$0xff] %v4416_v20  ;;  %v4452_v51 = vcombine.high %v473_v26, %v477_v27 }
  0x20   :  { %1146 = vmatprep.subr.bf16.mxu0 %v4230_v63  ;;  %6339 = vst [vmem:[#allocation44_spill] sm:$0xff] %v4389_v2  ;;  %6341 = vst [vmem:[#allocation46_spill] sm:$0xff] %v4402_v11  ;;  %v448_v17 = vld [vmem:[%s6009_s2 + $0x280] sm:$0xff]  ;;  %v4413_v19 = vcombine.high %v456_v59, %v460_v0  ;;  %v4426_v28 = vcombine.low %v456_v59, %v460_v0 }
  0x21   :  { %v452_v18 = vld [vmem:[%s6009_s2 + $0x2a0] sm:$0xff]  ;;  %6348 = vst [vmem:[#allocation53_spill] sm:$0xff] %v4440_v41  ;;  %6350 = vst [vmem:[#allocation55_spill] sm:$0xff] %v4452_v51 }
  0x22   :  { %1180 = vmatpush1.bf16.msra.mxu1 %v4247_v4  ;;  %6343 = vst [vmem:[#allocation48_spill] sm:$0xff] %v4413_v19  ;;  %6345 = vst [vmem:[#allocation50_spill] sm:$0xff] %v4426_v28  ;;  %v440_v36 = vld [vmem:[%s6009_s2 + $0x240] sm:$0xff]  ;;  %v4437_v40 = vcombine.high %v448_v17, %v452_v18  ;;  %v4450_v50 = vcombine.low %v448_v17, %v452_v18 }
  0x23   :  { %1147 = vmatpush1.bf16.msra.mxu0 %v4252_v5  ;;  %1181 = vmatprep.subr.bf16.mxu1 %v4254_v6  ;;  %v444_v38 = vld [vmem:[%s6009_s2 + $0x260] sm:$0xff] }
  0x24   :  { %1148 = vmatprep.subr.bf16.mxu0 %v4257_v7  ;;  %6347 = vst [vmem:[#allocation52_spill] sm:$0xff] %v4437_v40  ;;  %6349 = vst [vmem:[#allocation54_spill] sm:$0xff] %v4450_v50  ;;  %v4455_v56 = vcombine.high %v440_v36, %v444_v38 }
  0x26   :  { %1182 = vmatpush1.bf16.msra.mxu1 %v4272_v13  ;;  %6351 = vst [vmem:[#allocation56_spill] sm:$0xff] %v4455_v56 }
  0x27   :  { %1149 = vmatpush1.bf16.msra.mxu0 %v4276_v14  ;;  %1183 = vmatprep.subr.bf16.mxu1 %v4278_v15 }
  0x28   :  { %1150 = vmatprep.subr.bf16.mxu0 %v4281_v16 }
  0x2a   :  { %1184 = vmatpush1.bf16.msra.mxu1 %v4296_v21 }
  0x2b   :  { %1151 = vmatpush1.bf16.msra.mxu0 %v4300_v23  ;;  %1185 = vmatprep.subr.bf16.mxu1 %v4302_v24 }
  0x2c   :  { %1152 = vmatprep.subr.bf16.mxu0 %v4305_v25 }
  0x2e   :  { %1186 = vmatpush1.bf16.msra.mxu1 %v4320_v32 }
  0x2f   :  { %1153 = vmatpush2.bf16.msra.mxu0 %v4324_v33  ;;  %1187 = vmatprep.subr.bf16.mxu1 %v4326_v34 }
  0x30   :  { %1154 = vmatprep.subr.bf16.mxu0 %v4329_v35 }
  0x32   :  { %1188 = vmatpush1.bf16.msra.mxu1 %v4344_v42 }
  0x33   :  { %1155 = vmatpush2.bf16.msra.mxu0 %v4348_v43  ;;  %1189 = vmatprep.subr.bf16.mxu1 %v4350_v44 }
  0x34   :  { %1156 = vmatprep.subr.bf16.mxu0 %v4353_v46 }
  0x36   :  { %1190 = vmatpush1.bf16.msra.mxu1 %v4368_v52 }
  0x37   :  { %1157 = vmatpush2.bf16.msra.mxu0 %v4375_v57  ;;  %1191 = vmatprep.subr.bf16.mxu1 %v4377_v58 }
  0x38   :  { %1158 = vmatprep.subr.bf16.mxu0 %v4389_v2 }
  0x3a   :  { %1192 = vmatpush1.bf16.msra.mxu1 %v4392_v3 }
  0x3b   :  { %1159 = vmatpush2.bf16.msra.mxu0 %v4402_v11  ;;  %1193 = vmatprep.subr.bf16.mxu1 %v4404_v12 }
  0x3c   :  { %1160 = vmatprep.subr.bf16.mxu0 %v4413_v19 }
  0x3e   :  { %1194 = vmatpush2.bf16.msra.mxu1 %v4416_v20 }
  0x3f   :  { %1161 = vmatpush2.bf16.msra.mxu0 %v4426_v28  ;;  %1195 = vmatprep.subr.bf16.mxu1 %v4428_v30 }
  0x40   :  { %1162 = vmatprep.subr.bf16.mxu0 %v4437_v40 }
  0x41   :  { %13 = vsyncpa [#allocation5], 0  ;;  %v432_v59 = vld [vmem:[%s6009_s2 + $0x200] sm:$0xff]  ;;  %v4464_v1 = vcombine.low %v473_v26, %v477_v27  ;;  %v4468_v9 = vcombine.low %v440_v36, %v444_v38  ;;  %v4470_v10 = vcombine.high %v465_v48, %v469_v49  ;;  %v457_v18 = vld [vmem:[%s6009_s2 + $0x2c8] sm:$0xff]  ;;  %v4488_v38 = vcombine.low %v465_v48, %v469_v49 }
  0x42   :  { %v436_v0 = vld [vmem:[%s6009_s2 + $0x220] sm:$0xff]  ;;  %1196 = vmatpush2.bf16.msra.mxu1 %v4440_v41  ;;  %v461_v26 = vld [vmem:[%s6009_s2 + $0x2e8] sm:$0xff]  ;;  %v426_v27 = vld [vmem:[%s6009_s2 + $0x1d0] sm:$0xff]  ;;  %vm4035_vm1 = vmmov 0   ;;  %vm3395_vm2 = vcmask 523264   ;;  %vm3439_vm3 = vcmask 25600  }
  0x43   :  { %6352 = vst [vmem:[#allocation57_spill] sm:$0xff] %v4464_v1  ;;  %1163 = vmatpush2.bf16.msra.mxu0 %v4450_v50  ;;  %1197 = vmatprep.subr.bf16.mxu1 %v4452_v51  ;;  %6353 = vst [vmem:[#allocation58_spill] sm:$0xff] %v4468_v9  ;;  %v4473_v17 = vcombine.high %v432_v59, %v436_v0  ;;  %v430_v36 = vld [vmem:[%s6009_s2 + $0x1f0] sm:$0xff]  ;;  %v4492_v8 = vcombine.low %v432_v59, %v436_v0  ;;  %v449_v51 = vld [vmem:[%s6009_s2 + $0x288] sm:$0xff] }
  0x44   :  { %6354 = vst [vmem:[#allocation59_spill] sm:$0xff] %v4470_v10  ;;  %1164 = vmatprep.subr.bf16.mxu0 %v4455_v56  ;;  %6356 = vst [vmem:[#allocation61_spill] sm:$0xff] %v4488_v38  ;;  %v4494_v56 = vcombine.high %v457_v18, %v461_v26  ;;  %v4497_v50 = vcombine.high %v426_v27, %v430_v36  ;;  %v453_v48 = vld [vmem:[%s6009_s2 + $0x2a8] sm:$0xff]  ;;  %v418_v49 = vld [vmem:[%s6009_s2 + $0x190] sm:$0xff]  ;;  %v4512_v0 = vcombine.low %v457_v18, %v461_v26 }
  0x45   :  { %6355 = vst [vmem:[#allocation60_spill] sm:$0xff] %v4473_v17  ;;  %6357 = vst [vmem:[#allocation62_spill] sm:$0xff] %v4492_v8  ;;  %v422_v59 = vld [vmem:[%s6009_s2 + $0x1b0] sm:$0xff]  ;;  %v445_v18 = vld [vmem:[%s6009_s2 + $0x268] sm:$0xff] }
  0x46   :  { %1198 = vmatpush2.bf16.msra.mxu1 %v4464_v1  ;;  %6358 = vst [vmem:[#allocation63_spill] sm:$0xff] %v4494_v56  ;;  %6359 = vst [vmem:[#allocation64_spill] sm:$0xff] %v4497_v50  ;;  %v441_v1 = vld [vmem:[%s6009_s2 + $0x248] sm:$0xff]  ;;  %v410_v26 = vld [vmem:[%s6009_s2 + $0x150] sm:$0xff] }
  0x47   :  { %1165 = vmatpush2.bf16.msra.mxu0 %v4468_v9  ;;  %1199 = vmatprep.subr.bf16.mxu1 %v4470_v10  ;;  %6360 = vst [vmem:[#allocation65_spill] sm:$0xff] %v4512_v0  ;;  %v4518_v9 = vcombine.high %v449_v51, %v453_v48  ;;  %v4521_v10 = vcombine.high %v418_v49, %v422_v59  ;;  %v433_v41 = vld [vmem:[%s6009_s2 + $0x208] sm:$0xff] }
  0x48   :  { %1166 = vmatprep.subr.bf16.mxu0 %v4473_v17  ;;  %v4516_v17 = vcombine.low %v426_v27, %v430_v36  ;;  %v414_v27 = vld [vmem:[%s6009_s2 + $0x170] sm:$0xff]  ;;  %v6364_v36 = vmov 0  }
  0x49   :  { %6362 = vst [vmem:[#allocation67_spill] sm:$0xff] %v4518_v9  ;;  %6363 = vst [vmem:[#allocation68_spill] sm:$0xff] %v4521_v10 }
  0x4a   :  { %1200 = vmatpush2.bf16.msra.mxu1 %v4488_v38  ;;  %6361 = vst [vmem:[#allocation66_spill] sm:$0xff] %v4516_v17  ;;  %v4546_v38 = vcombine.high %v410_v26, %v414_v27 }
  0x4b   :  { %1167 = vmatpush2.bf16.msra.mxu0 %v4492_v8  ;;  %1201 = vmatprep.subr.bf16.mxu1 %v4494_v56  ;;  %v4541_v8 = vcombine.low %v418_v49, %v422_v59  ;;  %v4543_v56 = vcombine.high %v441_v1, %v445_v18  ;;  %v406_v49 = vld [vmem:[%s6009_s2 + $0x130] sm:$0xff]  ;;  %v4562_v59 = vcombine.low %v441_v1, %v445_v18  ;;  %v431_v1 = vld [vmem:[%s6009_s2 + $0x1f8] sm:$0xff] }
  0x4c   :  { %1218 = vmatprep.subr.bf16.mxu0 %v4497_v50  ;;  %v4537_v50 = vcombine.low %v449_v51, %v453_v48  ;;  %6368 = vst [vmem:[#allocation72_spill] sm:$0xff] %v4546_v38  ;;  %v437_v51 = vld [vmem:[%s6009_s2 + $0x228] sm:$0xff]  ;;  %v402_v48 = vld [vmem:[%s6009_s2 + $0x110] sm:$0xff] }
  0x4d   :  { %6366 = vst [vmem:[#allocation70_spill] sm:$0xff] %v4541_v8  ;;  %6367 = vst [vmem:[#allocation71_spill] sm:$0xff] %v4543_v56  ;;  %v394_v18 = vld [vmem:[%s6009_s2 + $0xd0] sm:$0xff] }
  0x4e   :  { %1169 = vmatmul.mubr.bf16.vlgmr.msra.gmra.mxu0 %v6364_v36  ;;  %1202 = vmatpush2.bf16.msra.mxu1 %v4512_v0  ;;  %6365 = vst [vmem:[#allocation69_spill] sm:$0xff] %v4537_v50  ;;  %6369 = vst [vmem:[#allocation73_spill] sm:$0xff] %v4562_v59  ;;  %v427_v0 = vld [vmem:[%s6009_s2 + $0x1d8] sm:$0xff] }
  0x4f   :  { %1219 = vmatpush1.bf16.msra.mxu0 %v4516_v17  ;;  %1203 = vmatprep.subr.bf16.mxu1 %v4518_v9  ;;  %v4568_v17 = vcombine.high %v433_v41, %v437_v51  ;;  %v4571_v9 = vcombine.high %v402_v48, %v406_v49 }
  0x50   :  { %1220 = vmatprep.subr.bf16.mxu0 %v4521_v10  ;;  %1250 = vmatprep.mubr.bf16.mxu0 %v6364_v36  ;;  %v4566_v10 = vcombine.low %v410_v26, %v414_v27  ;;  %v398_v26 = vld [vmem:[%s6009_s2 + $0xf0] sm:$0xff]  ;;  %v4586_v27 = vcombine.low %v433_v41, %v437_v51  ;;  %v423_v41 = vld [vmem:[%s6009_s2 + $0x1b8] sm:$0xff] }
  0x51   :  { %6371 = vst [vmem:[#allocation75_spill] sm:$0xff] %v4568_v17  ;;  %6372 = vst [vmem:[#allocation76_spill] sm:$0xff] %v4571_v9  ;;  %v386_v51 = vld [vmem:[%s6009_s2 + $0x90] sm:$0xff] }
  0x52   :  { %1204 = vmatpush2.bf16.msra.mxu1 %v4537_v50  ;;  %6370 = vst [vmem:[#allocation74_spill] sm:$0xff] %v4566_v10  ;;  %6373 = vst [vmem:[#allocation77_spill] sm:$0xff] %v4586_v27  ;;  %v419_v50 = vld [vmem:[%s6009_s2 + $0x198] sm:$0xff] }
  0x53   :  { %1221 = vmatpush1.bf16.msra.mxu0 %v4541_v8  ;;  %1205 = vmatprep.subr.bf16.mxu1 %v4543_v56  ;;  %v4592_v8 = vcombine.high %v427_v0, %v431_v1  ;;  %v4595_v56 = vcombine.high %v394_v18, %v398_v26 }
  0x54   :  { %1222 = vmatprep.subr.bf16.mxu0 %v4546_v38  ;;  %v4590_v38 = vcombine.low %v402_v48, %v406_v49  ;;  %v390_v48 = vld [vmem:[%s6009_s2 + $0xb0] sm:$0xff]  ;;  %v4610_v49 = vcombine.low %v427_v0, %v431_v1  ;;  %v415_v0 = vld [vmem:[%s6009_s2 + $0x178] sm:$0xff] }
  0x55   :  { %6375 = vst [vmem:[#allocation79_spill] sm:$0xff] %v4592_v8  ;;  %6376 = vst [vmem:[#allocation80_spill] sm:$0xff] %v4595_v56  ;;  %v378_v1 = vld [vmem:[%s6009_s2 + $0x50] sm:$0xff] }
  0x56   :  { %1206 = vmatpush2.bf16.msra.mxu1 %v4562_v59  ;;  %6374 = vst [vmem:[#allocation78_spill] sm:$0xff] %v4590_v38  ;;  %6377 = vst [vmem:[#allocation81_spill] sm:$0xff] %v4610_v49  ;;  %v411_v59 = vld [vmem:[%s6009_s2 + $0x158] sm:$0xff] }
  0x57   :  { %1223 = vmatpush1.bf16.msra.mxu0 %v4566_v10  ;;  %1207 = vmatprep.subr.bf16.mxu1 %v4568_v17  ;;  %v4616_v10 = vcombine.high %v419_v50, %v423_v41  ;;  %v4619_v17 = vcombine.high %v386_v51, %v390_v48 }
  0x58   :  { %1224 = vmatprep.subr.bf16.mxu0 %v4571_v9  ;;  %v4614_v9 = vcombine.low %v394_v18, %v398_v26  ;;  %v382_v18 = vld [vmem:[%s6009_s2 + $0x70] sm:$0xff]  ;;  %v4635_v26 = vcombine.low %v419_v50, %v423_v41  ;;  %v407_v50 = vld [vmem:[%s6009_s2 + $0x138] sm:$0xff] }
  0x59   :  { %6379 = vst [vmem:[#allocation83_spill] sm:$0xff] %v4616_v10  ;;  %6380 = vst [vmem:[#allocation84_spill] sm:$0xff] %v4619_v17  ;;  %v370_v41 = vld [vmem:[%s6009_s2 + $0x10] sm:$0xff] }
  0x5a   :  { %1208 = vmatpush2.bf16.msra.mxu1 %v4586_v27  ;;  %6378 = vst [vmem:[#allocation82_spill] sm:$0xff] %v4614_v9  ;;  %6381 = vst [vmem:[#allocation85_spill] sm:$0xff] %v4635_v26  ;;  %v395_v27 = vld [vmem:[%s6009_s2 + $0xd8] sm:$0xff] }
  0x5b   :  { %1225 = vmatpush1.bf16.msra.mxu0 %v4590_v38  ;;  %1259 = vmatprep.subr.bf16.mxu1 %v4592_v8  ;;  %v4642_v38 = vcombine.high %v411_v59, %v415_v0  ;;  %v4645_v8 = vcombine.high %v378_v1, %v382_v18 }
  0x5c   :  { %1226 = vmatprep.subr.bf16.mxu0 %v4595_v56  ;;  %v4640_v56 = vcombine.low %v386_v51, %v390_v48  ;;  %v374_v51 = vld [vmem:[%s6009_s2 + $0x30] sm:$0xff]  ;;  %v4660_v48 = vcombine.low %v411_v59, %v415_v0  ;;  %v399_v59 = vld [vmem:[%s6009_s2 + $0xf8] sm:$0xff] }
  0x5d   :  { %1210 = vmatmul.mubr.bf16.vlgmr.msra.gmra.mxu1 %v6364_v36  ;;  %6383 = vst [vmem:[#allocation87_spill] sm:$0xff] %v4642_v38  ;;  %6384 = vst [vmem:[#allocation88_spill] sm:$0xff] %v4645_v8  ;;  %v490_v0 = vld [vmem:[%s6009_s2 + $0x3d0] sm:$0xff] }
  0x5e   :  { %1260 = vmatpush1.bf16.msra.mxu1 %v4610_v49  ;;  %1291 = vmatprep.mubr.bf16.mxu1 %v6364_v36  ;;  %6382 = vst [vmem:[#allocation86_spill] sm:$0xff] %v4640_v56  ;;  %v403_v49 = vld [vmem:[%s6009_s2 + $0x118] sm:$0xff]  ;;  %6385 = vst [vmem:[#allocation89_spill] sm:$0xff] %v4660_v48 }
  0x5f   :  { %1227 = vmatpush1.bf16.msra.mxu0 %v4614_v9  ;;  %1261 = vmatprep.subr.bf16.mxu1 %v4616_v10  ;;  %v4666_v9 = vcombine.high %v403_v49, %v407_v50  ;;  %v4669_v10 = vcombine.high %v370_v41, %v374_v51 }
  0x60   :  { %1228 = vmatprep.subr.bf16.mxu0 %v4619_v17  ;;  %v4664_v17 = vcombine.low %v378_v1, %v382_v18  ;;  %v494_v1 = vld [vmem:[%s6009_s2 + $0x3f0] sm:$0xff]  ;;  %v4684_v18 = vcombine.low %v403_v49, %v407_v50  ;;  %v391_v49 = vld [vmem:[%s6009_s2 + $0xb8] sm:$0xff] }
  0x61   :  { %6387 = vst [vmem:[#allocation91_spill] sm:$0xff] %v4666_v9  ;;  %6388 = vst [vmem:[#allocation92_spill] sm:$0xff] %v4669_v10  ;;  %v482_v50 = vld [vmem:[%s6009_s2 + $0x390] sm:$0xff] }
  0x62   :  { %1262 = vmatpush1.bf16.msra.mxu1 %v4635_v26  ;;  %6386 = vst [vmem:[#allocation90_spill] sm:$0xff] %v4664_v17  ;;  %6389 = vst [vmem:[#allocation93_spill] sm:$0xff] %v4684_v18  ;;  %v387_v26 = vld [vmem:[%s6009_s2 + $0x98] sm:$0xff] }
  0x63   :  { %1229 = vmatpush1.bf16.msra.mxu0 %v4640_v56  ;;  %1263 = vmatprep.subr.bf16.mxu1 %v4642_v38  ;;  %v4690_v56 = vcombine.high %v395_v27, %v399_v59  ;;  %v4693_v38 = vcombine.high %v490_v0, %v494_v1 }
  0x64   :  { %1230 = vmatprep.subr.bf16.mxu0 %v4645_v8  ;;  %v4688_v8 = vcombine.low %v370_v41, %v374_v51  ;;  %v486_v41 = vld [vmem:[%s6009_s2 + $0x3b0] sm:$0xff]  ;;  %v4708_v51 = vcombine.low %v395_v27, %v399_v59  ;;  %v383_v27 = vld [vmem:[%s6009_s2 + $0x78] sm:$0xff] }
  0x65   :  { %6391 = vst [vmem:[#allocation95_spill] sm:$0xff] %v4690_v56  ;;  %6392 = vst [vmem:[#allocation96_spill] sm:$0xff] %v4693_v38  ;;  %v474_v59 = vld [vmem:[%s6009_s2 + $0x350] sm:$0xff] }
  0x66   :  { %1264 = vmatpush1.bf16.msra.mxu1 %v4660_v48  ;;  %6390 = vst [vmem:[#allocation94_spill] sm:$0xff] %v4688_v8  ;;  %6393 = vst [vmem:[#allocation97_spill] sm:$0xff] %v4708_v51  ;;  %v379_v48 = vld [vmem:[%s6009_s2 + $0x58] sm:$0xff] }
  0x67   :  { %1231 = vmatpush1.bf16.msra.mxu0 %v4664_v17  ;;  %1265 = vmatprep.subr.bf16.mxu1 %v4666_v9  ;;  %v4714_v17 = vcombine.high %v387_v26, %v391_v49  ;;  %v4717_v9 = vcombine.high %v482_v50, %v486_v41 }
  0x68   :  { %1232 = vmatprep.subr.bf16.mxu0 %v4669_v10  ;;  %v4712_v10 = vcombine.low %v490_v0, %v494_v1  ;;  %v478_v0 = vld [vmem:[%s6009_s2 + $0x370] sm:$0xff]  ;;  %v4732_v1 = vcombine.low %v387_v26, %v391_v49  ;;  %v375_v26 = vld [vmem:[%s6009_s2 + $0x38] sm:$0xff] }
  0x69   :  { %6395 = vst [vmem:[#allocation99_spill] sm:$0xff] %v4714_v17  ;;  %6396 = vst [vmem:[#allocation100_spill] sm:$0xff] %v4717_v9  ;;  %v466_v49 = vld [vmem:[%s6009_s2 + $0x310] sm:$0xff] }
  0x6a   :  { %1266 = vmatpush1.bf16.msra.mxu1 %v4684_v18  ;;  %6394 = vst [vmem:[#allocation98_spill] sm:$0xff] %v4712_v10  ;;  %6397 = vst [vmem:[#allocation101_spill] sm:$0xff] %v4732_v1  ;;  %v371_v18 = vld [vmem:[%s6009_s2 + $0x18] sm:$0xff] }
  0x6b   :  { %1233 = vmatpush1.bf16.msra.mxu0 %v4688_v8  ;;  %1267 = vmatprep.subr.bf16.mxu1 %v4690_v56  ;;  %v4738_v8 = vcombine.high %v379_v48, %v383_v27  ;;  %v4741_v56 = vcombine.high %v474_v59, %v478_v0 }
  0x6c   :  { %1234 = vmatprep.subr.bf16.mxu0 %v4693_v38  ;;  %v4736_v38 = vcombine.low %v482_v50, %v486_v41  ;;  %v470_v50 = vld [vmem:[%s6009_s2 + $0x330] sm:$0xff]  ;;  %v4756_v41 = vcombine.low %v379_v48, %v383_v27  ;;  %v495_v48 = vld [vmem:[%s6009_s2 + $0x3f8] sm:$0xff] }
  0x6d   :  { %6399 = vst [vmem:[#allocation103_spill] sm:$0xff] %v4738_v8  ;;  %6400 = vst [vmem:[#allocation104_spill] sm:$0xff] %v4741_v56  ;;  %v458_v27 = vld [vmem:[%s6009_s2 + $0x2d0] sm:$0xff] }
  0x6e   :  { %1268 = vmatpush1.bf16.msra.mxu1 %v4708_v51  ;;  %6398 = vst [vmem:[#allocation102_spill] sm:$0xff] %v4736_v38  ;;  %6401 = vst [vmem:[#allocation105_spill] sm:$0xff] %v4756_v41  ;;  %v491_v51 = vld [vmem:[%s6009_s2 + $0x3d8] sm:$0xff] }
  0x6f   :  { %1235 = vmatpush2.bf16.msra.mxu0 %v4712_v10  ;;  %1269 = vmatprep.subr.bf16.mxu1 %v4714_v17  ;;  %v4762_v10 = vcombine.high %v371_v18, %v375_v26  ;;  %v4765_v17 = vcombine.high %v466_v49, %v470_v50 }
  0x70   :  { %1236 = vmatprep.subr.bf16.mxu0 %v4717_v9  ;;  %v4760_v9 = vcombine.low %v474_v59, %v478_v0  ;;  %v462_v59 = vld [vmem:[%s6009_s2 + $0x2f0] sm:$0xff]  ;;  %v4780_v0 = vcombine.low %v371_v18, %v375_v26  ;;  %v487_v18 = vld [vmem:[%s6009_s2 + $0x3b8] sm:$0xff] }
  0x71   :  { %6403 = vst [vmem:[#allocation107_spill] sm:$0xff] %v4762_v10  ;;  %6404 = vst [vmem:[#allocation108_spill] sm:$0xff] %v4765_v17  ;;  %v450_v26 = vld [vmem:[%s6009_s2 + $0x290] sm:$0xff] }
  0x72   :  { %1270 = vmatpush1.bf16.msra.mxu1 %v4732_v1  ;;  %6402 = vst [vmem:[#allocation106_spill] sm:$0xff] %v4760_v9  ;;  %6405 = vst [vmem:[#allocation109_spill] sm:$0xff] %v4780_v0  ;;  %v483_v1 = vld [vmem:[%s6009_s2 + $0x398] sm:$0xff] }
  0x73   :  { %1237 = vmatpush2.bf16.msra.mxu0 %v4736_v38  ;;  %1271 = vmatprep.subr.bf16.mxu1 %v4738_v8  ;;  %v4786_v38 = vcombine.high %v491_v51, %v495_v48  ;;  %v4789_v8 = vcombine.high %v458_v27, %v462_v59 }
  0x74   :  { %1238 = vmatprep.subr.bf16.mxu0 %v4741_v56  ;;  %v4784_v56 = vcombine.low %v466_v49, %v470_v50  ;;  %v454_v49 = vld [vmem:[%s6009_s2 + $0x2b0] sm:$0xff]  ;;  %v4804_v50 = vcombine.low %v491_v51, %v495_v48  ;;  %v479_v51 = vld [vmem:[%s6009_s2 + $0x378] sm:$0xff] }
  0x75   :  { %6407 = vst [vmem:[#allocation111_spill] sm:$0xff] %v4786_v38  ;;  %6408 = vst [vmem:[#allocation112_spill] sm:$0xff] %v4789_v8  ;;  %v442_v48 = vld [vmem:[%s6009_s2 + $0x250] sm:$0xff] }
  0x76   :  { %1272 = vmatpush1.bf16.msra.mxu1 %v4756_v41  ;;  %6406 = vst [vmem:[#allocation110_spill] sm:$0xff] %v4784_v56  ;;  %6409 = vst [vmem:[#allocation113_spill] sm:$0xff] %v4804_v50  ;;  %v475_v41 = vld [vmem:[%s6009_s2 + $0x358] sm:$0xff] }
  0x77   :  { %1239 = vmatpush2.bf16.msra.mxu0 %v4760_v9  ;;  %1273 = vmatprep.subr.bf16.mxu1 %v4762_v10  ;;  %v4810_v9 = vcombine.high %v483_v1, %v487_v18  ;;  %v4813_v10 = vcombine.high %v450_v26, %v454_v49 }
  0x78   :  { %1240 = vmatprep.subr.bf16.mxu0 %v4765_v17  ;;  %v4808_v17 = vcombine.low %v458_v27, %v462_v59  ;;  %v446_v27 = vld [vmem:[%s6009_s2 + $0x270] sm:$0xff]  ;;  %v4828_v59 = vcombine.low %v483_v1, %v487_v18  ;;  %v471_v1 = vld [vmem:[%s6009_s2 + $0x338] sm:$0xff] }
  0x79   :  { %6411 = vst [vmem:[#allocation115_spill] sm:$0xff] %v4810_v9  ;;  %6412 = vst [vmem:[#allocation116_spill] sm:$0xff] %v4813_v10  ;;  %v434_v18 = vld [vmem:[%s6009_s2 + $0x210] sm:$0xff] }
  0x7a   :  { %1274 = vmatpush1.bf16.msra.mxu1 %v4780_v0  ;;  %6410 = vst [vmem:[#allocation114_spill] sm:$0xff] %v4808_v17  ;;  %6413 = vst [vmem:[#allocation117_spill] sm:$0xff] %v4828_v59  ;;  %v467_v0 = vld [vmem:[%s6009_s2 + $0x318] sm:$0xff] }
  0x7b   :  { %1241 = vmatpush2.bf16.msra.mxu0 %v4784_v56  ;;  %1275 = vmatprep.subr.bf16.mxu1 %v4786_v38  ;;  %v4834_v56 = vcombine.high %v475_v41, %v479_v51  ;;  %v4837_v38 = vcombine.high %v442_v48, %v446_v27 }
  0x7c   :  { %1242 = vmatprep.subr.bf16.mxu0 %v4789_v8  ;;  %v4832_v8 = vcombine.low %v450_v26, %v454_v49  ;;  %v438_v26 = vld [vmem:[%s6009_s2 + $0x230] sm:$0xff]  ;;  %v4852_v49 = vcombine.low %v475_v41, %v479_v51  ;;  %v463_v41 = vld [vmem:[%s6009_s2 + $0x2f8] sm:$0xff]  ;;  %v4870_v51 = vcombine.low %v467_v0, %v471_v1 }
  0x7d   :  { %6415 = vst [vmem:[#allocation119_spill] sm:$0xff] %v4834_v56  ;;  %6416 = vst [vmem:[#allocation120_spill] sm:$0xff] %v4837_v38 }
  0x7e   :  { %1276 = vmatpush2.bf16.msra.mxu1 %v4804_v50  ;;  %6414 = vst [vmem:[#allocation118_spill] sm:$0xff] %v4832_v8  ;;  %6417 = vst [vmem:[#allocation121_spill] sm:$0xff] %v4852_v49  ;;  %v459_v50 = vld [vmem:[%s6009_s2 + $0x2d8] sm:$0xff] }
  0x7f   :  { %1243 = vmatpush2.bf16.msra.mxu0 %v4808_v17  ;;  %1277 = vmatprep.subr.bf16.mxu1 %v4810_v9  ;;  %v4858_v17 = vcombine.high %v467_v0, %v471_v1  ;;  %v4861_v9 = vcombine.high %v434_v18, %v438_v26  ;;  %6421 = vst [vmem:[#allocation125_spill] sm:$0xff] %v4870_v51 }
  0x80   :  { %1244 = vmatprep.subr.bf16.mxu0 %v4813_v10  ;;  %v4856_v10 = vcombine.low %v442_v48, %v446_v27  ;;  %v4874_v48 = vcombine.low %v434_v18, %v438_v26  ;;  %v4876_v27 = vcombine.high %v459_v50, %v463_v41  ;;  %v4886_v0 = vcombine.low %v459_v50, %v463_v41  ;;  %v443_v18 = vld [vmem:[%s6009_s2 + $0x258] sm:$0xff] }
  0x81   :  { %6419 = vst [vmem:[#allocation123_spill] sm:$0xff] %v4858_v17  ;;  %6420 = vst [vmem:[#allocation124_spill] sm:$0xff] %v4861_v9  ;;  %v447_v26 = vld [vmem:[%s6009_s2 + $0x278] sm:$0xff] }
  0x82   :  { %1278 = vmatpush2.bf16.msra.mxu1 %v4828_v59  ;;  %6418 = vst [vmem:[#allocation122_spill] sm:$0xff] %v4856_v10  ;;  %6422 = vst [vmem:[#allocation126_spill] sm:$0xff] %v4874_v48  ;;  %v4904_v41 = vcombine.high %v443_v18, %v447_v26 }
  0x83   :  { %1245 = vmatpush2.bf16.msra.mxu0 %v4832_v8  ;;  %1279 = vmatprep.subr.bf16.mxu1 %v4834_v56  ;;  %6423 = vst [vmem:[#allocation127_spill] sm:$0xff] %v4876_v27  ;;  %v455_v8 = vld [vmem:[%s6009_s2 + $0x2b8] sm:$0xff]  ;;  %6424 = vst [vmem:[#allocation128_spill] sm:$0xff] %v4886_v0 }
  0x84   :  { %1246 = vmatprep.subr.bf16.mxu0 %v4837_v38  ;;  %v451_v38 = vld [vmem:[%s6009_s2 + $0x298] sm:$0xff]  ;;  %6427 = vst [vmem:[#allocation131_spill] sm:$0xff] %v4904_v41 }
  0x85   :  { %v4890_v1 = vcombine.high %v451_v38, %v455_v8  ;;  %v4901_v50 = vcombine.low %v451_v38, %v455_v8  ;;  %v4915_v8 = vcombine.low %v443_v18, %v447_v26  ;;  %v6432_v18 = vld [vmem:[#allocation55_spill] sm:$0xff]  ;;  %v6433_v26 = vld [vmem:[#allocation54_spill] sm:$0xff] }
  0x86   :  { %1280 = vmatpush2.bf16.msra.mxu1 %v4852_v49 }
  0x87   :  { %1247 = vmatpush2.bf16.msra.mxu0 %v4856_v10  ;;  %1281 = vmatprep.subr.bf16.mxu1 %v4858_v17  ;;  %6425 = vst [vmem:[#allocation129_spill] sm:$0xff] %v4890_v1  ;;  %6426 = vst [vmem:[#allocation130_spill] sm:$0xff] %v4901_v50 }
  0x88   :  { %1248 = vmatprep.subr.bf16.mxu0 %v4861_v9  ;;  %6428 = vst [vmem:[#allocation132_spill] sm:$0xff] %v4915_v8 }
  0x8a   :  { %1282 = vmatpush2.bf16.msra.mxu1 %v4870_v51 }
  0x8b   :  { %1249 = vmatpush2.bf16.msra.mxu0 %v4874_v48  ;;  %1283 = vmatprep.subr.bf16.mxu1 %v4876_v27  ;;  %v435_v48 = vld [vmem:[%s6009_s2 + $0x218] sm:$0xff] }
  0x8c   :  { %1383 = vmatprep.subr.bf16.mxu0 %v4120_v22  ;;  %v439_v22 = vld [vmem:[%s6009_s2 + $0x238] sm:$0xff] }
  0x8d   :  { %v4918_v38 = vcombine.high %v435_v48, %v439_v22 }
  0x8e   :  { %1251 = vmatmul.mubr.bf16.vlgmr.msra.gmra.mxu0 %v6364_v36  ;;  %1284 = vmatpush2.bf16.msra.mxu1 %v4886_v0 }
  0x8f   :  { %1285 = vmatprep.subr.bf16.mxu1 %v4890_v1  ;;  %1384 = vmatpush1.bf16.msra.mxu0 %v4139_v29  ;;  %6429 = vst [vmem:[#allocation133_spill] sm:$0xff] %v4918_v38  ;;  %v4923_v29 = vcombine.low %v435_v48, %v439_v22  ;;  %v51_v22 = vlaneseq }
  0x90   :  { %1385 = vmatprep.subr.bf16.mxu0 %v4142_v31 }
  0x91   :  { %6430 = vst [vmem:[#allocation134_spill] sm:$0xff] %v4923_v29  ;;  %v4970_v48 = vshrl.u32 %v51_v22, 7  ;;  %v49_v22 = vld [vmem:[%s6010_s3] sm:$0xff] }
  0x92   :  { %1286 = vmatpush2.bf16.msra.mxu1 %v4901_v50 }
  0x93   :  { %1287 = vmatprep.subr.bf16.mxu1 %v4904_v41  ;;  %1386 = vmatpush1.bf16.msra.mxu0 %v4161_v37 }
  0x94   :  { %1387 = vmatprep.subr.bf16.mxu0 %v4165_v39 }
  0x96   :  { %1288 = vmatpush2.bf16.msra.mxu1 %v4915_v8 }
  0x97   :  { %1289 = vmatprep.subr.bf16.mxu1 %v4918_v38  ;;  %1388 = vmatpush1.bf16.msra.mxu0 %v4181_v45 }
  0x98   :  { %1389 = vmatprep.subr.bf16.mxu0 %v4184_v47 }
  0x9a   :  { %1290 = vmatpush2.bf16.msra.mxu1 %v4923_v29 }
  0x9b   :  { %1424 = vmatprep.subr.bf16.mxu1 %v4204_v54  ;;  %1390 = vmatpush1.bf16.msra.mxu0 %v4202_v53 }
  0x9c   :  { %1391 = vmatprep.subr.bf16.mxu0 %v4207_v55 }
  0x9d   :  { %1292 = vmatmul.mubr.bf16.vlgmr.msra.gmra.mxu1 %v6364_v36  ;;  %v6431_v36 = vld [vmem:[#allocation53_spill] sm:$0xff] }
  0x9e   :  { %1425 = vmatpush1.bf16.msra.mxu1 %v4221_v60 }
  0x9f   :  { %1426 = vmatprep.subr.bf16.mxu1 %v4227_v62  ;;  %1392 = vmatpush1.bf16.msra.mxu0 %v4225_v61 }
  0xa0   :  { %1393 = vmatprep.subr.bf16.mxu0 %v4230_v63 }
  0xa2   :  { %1427 = vmatpush1.bf16.msra.mxu1 %v4247_v4 }
  0xa3   :  { %1428 = vmatprep.subr.bf16.mxu1 %v4254_v6  ;;  %1394 = vmatpush1.bf16.msra.mxu0 %v4252_v5 }
  0xa4   :  { %1395 = vmatprep.subr.bf16.mxu0 %v4257_v7 }
  0xa6   :  { %1429 = vmatpush1.bf16.msra.mxu1 %v4272_v13 }
  0xa7   :  { %1430 = vmatprep.subr.bf16.mxu1 %v4278_v15  ;;  %1396 = vmatpush1.bf16.msra.mxu0 %v4276_v14 }
  0xa8   :  { %1397 = vmatprep.subr.bf16.mxu0 %v4281_v16  ;;  %v6446_v16 = vld [vmem:[#allocation71_spill] sm:$0xff] }
  0xaa   :  { %1431 = vmatpush1.bf16.msra.mxu1 %v4296_v21 }
  0xab   :  { %1432 = vmatprep.subr.bf16.mxu1 %v4302_v24  ;;  %1398 = vmatpush1.bf16.msra.mxu0 %v4300_v23  ;;  %v6444_v23 = vld [vmem:[#allocation67_spill] sm:$0xff] }
  0xac   :  { %1399 = vmatprep.subr.bf16.mxu0 %v4305_v25  ;;  %v61_v25 = vsub.s32 2, %v4970_v48 }
  0xae   :  { %1433 = vmatpush1.bf16.msra.mxu1 %v4320_v32 }
  0xaf   :  { %1434 = vmatprep.subr.bf16.mxu1 %v4326_v34  ;;  %1400 = vmatpush2.bf16.msra.mxu0 %v4324_v33 }
  0xb0   :  { %1401 = vmatprep.subr.bf16.mxu0 %v4329_v35 }
  0xb2   :  { %1435 = vmatpush1.bf16.msra.mxu1 %v4344_v42 }
  0xb3   :  { %1436 = vmatprep.subr.bf16.mxu1 %v4350_v44  ;;  %1402 = vmatpush2.bf16.msra.mxu0 %v4348_v43  ;;  %v6440_v43 = vld [vmem:[#allocation63_spill] sm:$0xff] }
  0xb4   :  { %1403 = vmatprep.subr.bf16.mxu0 %v4353_v46  ;;  %v6436_v46 = vld [vmem:[#allocation59_spill] sm:$0xff] }
  0xb6   :  { %1437 = vmatpush1.bf16.msra.mxu1 %v4368_v52 }
  0xb7   :  { %1438 = vmatprep.subr.bf16.mxu1 %v4377_v58  ;;  %1404 = vmatpush2.bf16.msra.mxu0 %v4375_v57  ;;  %v69_v57 = vsub.s32 4, %v4970_v48  ;;  %v6445_v58 = vld [vmem:[#allocation69_spill] sm:$0xff] }
  0xb8   :  { %1405 = vmatprep.subr.bf16.mxu0 %v4389_v2  ;;  %v6435_v2 = vld [vmem:[#allocation57_spill] sm:$0xff] }
  0xba   :  { %1439 = vmatpush1.bf16.msra.mxu1 %v4392_v3 }
  0xbb   :  { %1440 = vmatprep.subr.bf16.mxu1 %v4404_v12  ;;  %1406 = vmatpush2.bf16.msra.mxu0 %v4402_v11  ;;  %v6434_v11 = vld [vmem:[#allocation56_spill] sm:$0xff] }
  0xbc   :  { %1407 = vmatprep.subr.bf16.mxu0 %v4413_v19  ;;  %v53_v19 = vsub.s32 0, %v4970_v48 }
  0xbe   :  { %1441 = vmatpush2.bf16.msra.mxu1 %v4416_v20 }
  0xbf   :  { %1442 = vmatprep.subr.bf16.mxu1 %v4428_v30  ;;  %1408 = vmatpush2.bf16.msra.mxu0 %v4426_v28  ;;  %v6437_v28 = vld [vmem:[#allocation58_spill] sm:$0xff] }
  0xc0   :  { %1409 = vmatprep.subr.bf16.mxu0 %v4437_v40  ;;  %v57_v40 = vsub.s32 1, %v4970_v48  ;;  %v6441_v30 = vld [vmem:[#allocation62_spill] sm:$0xff] }
  0xc2   :  { %1443 = vmatpush2.bf16.msra.mxu1 %v6431_v36  ;;  %v6439_v36 = vld [vmem:[#allocation61_spill] sm:$0xff] }
  0xc3   :  { %1444 = vmatprep.subr.bf16.mxu1 %v6432_v18  ;;  %1410 = vmatpush2.bf16.msra.mxu0 %v6433_v26  ;;  %v6438_v18 = vld [vmem:[#allocation60_spill] sm:$0xff]  ;;  %v54_v26 = vrot.slane %v49_v22, %v53_v19 }
  0xc4   :  { %1411 = vmatprep.subr.bf16.mxu0 %v6434_v11  ;;  %v73_v11 = vsub.s32 5, %v4970_v48 }
  0xc6   :  { %1445 = vmatpush2.bf16.msra.mxu1 %v6435_v2  ;;  %v70_v2 = vrot.slane %v49_v22, %v69_v57  ;;  %v74_v20 = vrot.slane %v49_v22, %v73_v11 }
  0xc7   :  { %1446 = vmatprep.subr.bf16.mxu1 %v6436_v46  ;;  %1412 = vmatpush2.bf16.msra.mxu0 %v6437_v28  ;;  %v58_v46 = vrot.slane %v49_v22, %v57_v40  ;;  %v6442_v28 = vld [vmem:[#allocation64_spill] sm:$0xff] }
  0xc8   :  { %1413 = vmatprep.subr.bf16.mxu0 %v6438_v18  ;;  %v6443_v18 = vld [vmem:[#allocation65_spill] sm:$0xff] }
  0xca   :  { %1447 = vmatpush2.bf16.msra.mxu1 %v6439_v36  ;;  %v62_v36 = vrot.slane %v49_v22, %v61_v25 }
  0xcb   :  { %1448 = vmatprep.subr.bf16.mxu1 %v6440_v43  ;;  %1414 = vmatpush2.bf16.msra.mxu0 %v6441_v30  ;;  %v65_v30 = vsub.s32 3, %v4970_v48 }
  0xcc   :  { %1465 = vmatprep.subr.bf16.mxu0 %v6442_v28 }
  0xcd   :  { %v214_v35 = vpop.f32.mrf.mxu1  ;;  %v300_v12 = vpop.f32.mrf.mxu0 }
  0xce   :  { %v215_v33 = vadd.f32 %v214_v35, %v54_v26  ;;  %1449 = vmatpush2.bf16.msra.mxu1 %v6443_v18  ;;  %v301_v3 = vadd.f32 %v300_v12, %v70_v2 }
  0xcf   :  { %v216_v19 = vpop.f32.mrf.mxu1  ;;  %1450 = vmatprep.subr.bf16.mxu1 %v6444_v23  ;;  %v302_v43 = vpop.f32.mrf.mxu0  ;;  %v66_v23 = vrot.slane %v49_v22, %v65_v30 }
  0xd0   :  { %352 = vst [vmem:[#allocation3] sm:$0xff] %v215_v33  ;;  %v217_v57 = vadd.f32 %v216_v19, %v58_v46  ;;  %356 = vst [vmem:[#allocation3 + $0x20] sm:$0xff] %v301_v3  ;;  %v303_v40 = vadd.f32 %v302_v43, %v74_v20 }
  0xd1   :  { %v218_v28 = vpop.f32.mrf.mxu1  ;;  %v304_v35 = vpop.f32.mrf.mxu0 }
  0xd2   :  { %353 = vst [vmem:[#allocation3 + $0x38] sm:$0xff] %v217_v57  ;;  %v219_v11 = vadd.f32 %v218_v28, %v54_v26  ;;  %1451 = vmatpush2.bf16.msra.mxu1 %v6445_v58  ;;  %357 = vst [vmem:[#allocation3 + $0x8] sm:$0xff] %v303_v40  ;;  %v305_v18 = vadd.f32 %v304_v35, %v70_v2  ;;  %v77_v28 = vsub.s32 6, %v4970_v48  ;;  %v6447_v26 = vld [vmem:[#allocation73_spill] sm:$0xff]  ;;  %v6448_v57 = vld [vmem:[#allocation75_spill] sm:$0xff]  ;;  %v81_v40 = vsub.s32 7, %v4970_v48 }
  0xd3   :  { %v220_v12 = vpop.f32.mrf.mxu1  ;;  %1452 = vmatprep.subr.bf16.mxu1 %v6446_v16  ;;  %v306_v19 = vpop.f32.mrf.mxu0  ;;  %v6450_v35 = vld [vmem:[#allocation79_spill] sm:$0xff] }
  0xd4   :  { %360 = vst [vmem:[#allocation3 + $0x40] sm:$0xff] %v219_v11  ;;  %v221_v33 = vadd.f32 %v220_v12, %v58_v46  ;;  %364 = vst [vmem:[#allocation3 + $0x60] sm:$0xff] %v305_v18  ;;  %v307_v52 = vadd.f32 %v306_v19, %v74_v20  ;;  %v78_v18 = vrot.slane %v49_v22, %v77_v28  ;;  %v6449_v20 = vld [vmem:[#allocation77_spill] sm:$0xff] }
  0xd5   :  { %v257_v3 = vpop.f32.mrf.mxu1 }
  0xd6   :  { %361 = vst [vmem:[#allocation3 + $0x30] sm:$0xff] %v221_v33  ;;  %v258_v43 = vadd.f32 %v257_v3, %v62_v36  ;;  %1453 = vmatpush2.bf16.msra.mxu1 %v6447_v26  ;;  %365 = vst [vmem:[#allocation3 + $0x48] sm:$0xff] %v307_v52  ;;  %v82_v33 = vrot.slane %v49_v22, %v81_v40 }
  0xd7   :  { %v259_v25 = vpop.f32.mrf.mxu1  ;;  %1454 = vmatprep.subr.bf16.mxu1 %v6448_v57 }
  0xd8   :  { %354 = vst [vmem:[#allocation3 + $0x78] sm:$0xff] %v258_v43  ;;  %v260_v2 = vadd.f32 %v259_v25, %v66_v23 }
  0xd9   :  { %v261_v46 = vpop.f32.mrf.mxu1 }
  0xda   :  { %355 = vst [vmem:[#allocation3 + $0x58] sm:$0xff] %v260_v2  ;;  %v262_v30 = vadd.f32 %v261_v46, %v62_v36  ;;  %1455 = vmatpush2.bf16.msra.mxu1 %v6449_v20  ;;  %v1300_v46 = vld [vmem:[#allocation3] sm:$0x3] }
  0xdb   :  { %v263_v11 = vpop.f32.mrf.mxu1  ;;  %1506 = vmatprep.subr.bf16.mxu1 %v6450_v35 }
  0xdc   :  { %362 = vst [vmem:[#allocation3 + $0x68] sm:$0xff] %v262_v30  ;;  %v264_v12 = vadd.f32 %v263_v11, %v66_v23  ;;  %v1301_v30 = vld [vmem:[#allocation3 + $0x38] sm:$0x3] }
  0xdd   :  { %v343_v52 = vpop.f32.mrf.mxu1 }
  0xde   :  { %363 = vst [vmem:[#allocation3 + $0x28] sm:$0xff] %v264_v12  ;;  %v344_v19 = vadd.f32 %v343_v52, %v78_v18 }
  0xdf   :  { %v345_v3 = vpop.f32.mrf.mxu1 }
  0xe0   :  { %358 = vst [vmem:[#allocation3 + $0x70] sm:$0xff] %v344_v19  ;;  %v346_v43 = vadd.f32 %v345_v3, %v82_v33  ;;  %v1302_v19 = vld [vmem:[#allocation3 + $0x78] sm:$0x3] }
  0xe1   :  { %v347_v25 = vpop.f32.mrf.mxu1 }
  0xe2   :  { %359 = vst [vmem:[#allocation3 + $0x10] sm:$0xff] %v346_v43  ;;  %v348_v48 = vadd.f32 %v347_v25, %v78_v18  ;;  %v1303_v43 = vld [vmem:[#allocation3 + $0x58] sm:$0x3] }
  0xe3   :  { %v349_v2 = vpop.f32.mrf.mxu1 }
  0xe4   :  { %366 = vst [vmem:[#allocation3 + $0x18] sm:$0xff] %v348_v48  ;;  %v350_v36 = vadd.f32 %v349_v2, %v82_v33 }
  0xe6   :  { %367 = vst [vmem:[#allocation3 + $0x50] sm:$0xff] %v350_v36 }
 0x10e   :  { %v1170_v28 = vpop.f32.mrf.mxu0 }
 0x10f   :  { %v1304_v20 = vadd.f32 %v1300_v46, %v1170_v28 }
 0x110   :  { %v1172_v35 = vpop.f32.mrf.mxu0 }
 0x111   :  { %v3616_v23 = vmul.f32 -1.442695, %v1304_v20  ;;  %v1305_v22 = vadd.f32 %v1301_v30, %v1172_v35 }
 0x112   :  { %v1174_v40 = vpop.f32.mrf.mxu0 }
 0x113   :  { %3751 = vpow2.f32 %v3616_v23  ;;  %v3617_v11 = vmul.f32 -1.442695, %v1305_v22 }
 0x114   :  { %v1175_v12 = vpop.f32.mrf.mxu0 }
 0x115   :  { %3753 = vpow2.f32 %v3617_v11 }
 0x11d   :  { %v1211_v52 = vpop.f32.mrf.mxu1 }
 0x11e   :  { %v1306_v3 = vadd.f32 %v1302_v19, %v1211_v52 }
 0x11f   :  { %v1213_v18 = vpop.f32.mrf.mxu1 }
 0x120   :  { %v3752_v25 = vpop.eup %3751  ;;  %v1307_v33 = vadd.f32 %v1303_v43, %v1213_v18  ;;  %3755 = vtanh.f32 %v1306_v3  ;;  %v1308_v43 = vld [vmem:[#allocation3 + $0x60] sm:$0xc0] }
 0x121   :  { %v1331_v48 = vadd.f32 1.0, %v3752_v25  ;;  %v1215_v2 = vpop.f32.mrf.mxu1  ;;  %v1309_v25 = vld [vmem:[#allocation3 + $0x48] sm:$0xc0] }
 0x122   :  { %v3754_v36 = vpop.eup %3753  ;;  %v3618_v28 = vmul.f32 -1.442695, %v1307_v33  ;;  %v1316_v33 = vrot.slane %v1308_v43, 6 }
 0x123   :  { %3757 = vrcp.f32 %v1331_v48  ;;  %v1337_v20 = vadd.f32 1.0, %v3754_v36  ;;  %v1216_v35 = vpop.f32.mrf.mxu1  ;;  %v1317_v36 = vrot.slane %v1309_v25, 6 }
 0x124   :  { %3759 = vpow2.f32 %v3618_v28 }
 0x125   :  { %3761 = vrcp.f32 %v1337_v20 }
 0x12d   :  { %v3756_v46 = vpop.eup %3755 }
 0x130   :  { %v3758_v30 = vpop.eup %3757 }
 0x131   :  { %v3760_v23 = vpop.eup %3759  ;;  %v1367_v12 = vmul.f32 %v3758_v30, %v3756_v46 }
 0x132   :  { %v3762_v22 = vpop.eup %3761  ;;  %v1344_v40 = vadd.f32 1.0, %v3760_v23 }
 0x133   :  { %v1366_v11 = vmul.f32 0.0, %v3762_v22  ;;  %v1310_v22 = vld [vmem:[#allocation3 + $0x18] sm:$0xc0] }
 0x134   :  { %3763 = vrcp.f32 %v1344_v40  ;;  %v1311_v40 = vld [vmem:[#allocation3 + $0x50] sm:$0xc0] }
 0x135   :  { %v5002_v52 = vadd.f32 %v1367_v12, %v1366_v11  ;;  %v1318_v11 = vrot.slane %v1310_v22, 6 }
 0x137   :  { %6451 = vst [vmem:[#allocation135_spill] sm:$0xff] %v5002_v52  ;;  %3765 = vtanh.f32 %v5002_v52 }
 0x141   :  { %v3764_v19 = vpop.eup %3763 }
 0x144   :  { %v3766_v3 = vpop.eup %3765 }
 0x145   :  { %v1373_v18 = vmul.f32 %v3766_v3, %v3764_v19  ;;  %v1319_v19 = vrot.slane %v1311_v40, 6 }
 0x14e   :  { %v1252_v48 = vpop.f32.mrf.mxu0 }
 0x14f   :  { %v1324_v2 = vadd.f32 %v1316_v33, %v1252_v48 }
 0x150   :  { %v1254_v28 = vpop.f32.mrf.mxu0 }
 0x151   :  { %v3619_v20 = vmul.f32 -1.442695, %v1324_v2  ;;  %v1325_v35 = vadd.f32 %v1317_v36, %v1254_v28 }
 0x152   :  { %v1256_v23 = vpop.f32.mrf.mxu0 }
 0x153   :  { %3767 = vpow2.f32 %v3619_v20  ;;  %v3620_v46 = vmul.f32 -1.442695, %v1325_v35 }
 0x154   :  { %v1257_v30 = vpop.f32.mrf.mxu0 }
 0x155   :  { %3769 = vpow2.f32 %v3620_v46 }
 0x15d   :  { %v1293_v12 = vpop.f32.mrf.mxu1 }
 0x15e   :  { %v1326_v52 = vadd.f32 %v1318_v11, %v1293_v12 }
 0x15f   :  { %v1295_v3 = vpop.f32.mrf.mxu1 }
 0x160   :  { %v3768_v57 = vpop.eup %3767  ;;  %v1327_v43 = vadd.f32 %v1319_v19, %v1295_v3  ;;  %3771 = vtanh.f32 %v1326_v52  ;;  %v5008_v19 = vpack.c.bf16 %v1373_v18, %v1373_v18  ;;  %v6452_v3 = vld [vmem:[#allocation66_spill] sm:$0xff]  ;;  %v6457_v18 = vld [vmem:[#allocation85_spill] sm:$0xff] }
 0x161   :  { %v1350_v26 = vadd.f32 1.0, %v3768_v57  ;;  %v1297_v33 = vpop.f32.mrf.mxu1 }
 0x162   :  { %v3770_v25 = vpop.eup %3769  ;;  %v3621_v48 = vmul.f32 -1.442695, %v1327_v43  ;;  %v6453_v43 = vld [vmem:[#allocation81_spill] sm:$0xff]  ;;  %v6454_v33 = vld [vmem:[#allocation68_spill] sm:$0xff] }
 0x163   :  { %3773 = vrcp.f32 %v1350_v26  ;;  %v1356_v2 = vadd.f32 1.0, %v3770_v25  ;;  %v1298_v36 = vpop.f32.mrf.mxu1  ;;  %v6455_v25 = vld [vmem:[#allocation83_spill] sm:$0xff] }
 0x164   :  { %3775 = vpow2.f32 %v3621_v48  ;;  %v6456_v48 = vld [vmem:[#allocation70_spill] sm:$0xff]  ;;  %v6459_v36 = vld [vmem:[#allocation87_spill] sm:$0xff] }
 0x165   :  { %3777 = vrcp.f32 %v1356_v2  ;;  %v6458_v2 = vld [vmem:[#allocation72_spill] sm:$0xff] }
 0x16d   :  { %v3772_v28 = vpop.eup %3771 }
 0x170   :  { %v3774_v20 = vpop.eup %3773 }
 0x171   :  { %v3776_v35 = vpop.eup %3775  ;;  %v1370_v22 = vmul.f32 %v3774_v20, %v3772_v28  ;;  %v6460_v28 = vld [vmem:[#allocation74_spill] sm:$0xff]  ;;  %v6461_v20 = vld [vmem:[#allocation89_spill] sm:$0xff] }
 0x172   :  { %v3778_v23 = vpop.eup %3777  ;;  %v1363_v46 = vadd.f32 1.0, %v3776_v35  ;;  %v6462_v35 = vld [vmem:[#allocation76_spill] sm:$0xff] }
 0x173   :  { %v1369_v30 = vmul.f32 0.0, %v3778_v23  ;;  %v6463_v23 = vld [vmem:[#allocation91_spill] sm:$0xff] }
 0x174   :  { %3779 = vrcp.f32 %v1363_v46  ;;  %v6464_v46 = vld [vmem:[#allocation78_spill] sm:$0xff] }
 0x175   :  { %v5005_v40 = vadd.f32 %v1370_v22, %v1369_v30  ;;  %v6465_v30 = vld [vmem:[#allocation93_spill] sm:$0xff]  ;;  %v6466_v22 = vld [vmem:[#allocation80_spill] sm:$0xff] }
 0x177   :  { %3781 = vtanh.f32 %v5005_v40 }
 0x181   :  { %v3780_v57 = vpop.eup %3779 }
 0x184   :  { %v3782_v52 = vpop.eup %3781 }
 0x185   :  { %v1375_v11 = vmul.f32 %v3782_v52, %v3780_v57  ;;  %v6467_v57 = vld [vmem:[#allocation95_spill] sm:$0xff]  ;;  %v6468_v52 = vld [vmem:[#allocation82_spill] sm:$0xff] }
 0x187   :  { %v1378_v26 = vrot.slane %v1375_v11, 2  ;;  %v1382_v12 = vpack.c.bf16 %v1375_v11, %v1375_v11  ;;  %v6469_v11 = vld [vmem:[#allocation97_spill] sm:$0xff] }
 0x189   :  { %1380 = vst [vmem:[#allocation2] sm:$0xc0] %v1378_v26  ;;  %1415 = vmatprep.mubr.bf16.mxu0 %v1382_v12  ;;  %1456 = vmatprep.mubr.bf16.mxu1 %v1382_v12  ;;  %v6470_v26 = vld [vmem:[#allocation84_spill] sm:$0xff] }
 0x18a   :  { %1416 = vmatmul.mubr.bf16.vlgmr.msra.gmra.mxu0 %v5008_v19  ;;  %1457 = vmatmul.mubr.bf16.vlgmr.msra.gmra.mxu1 %v5008_v19 }
 0x18b   :  { %1466 = vmatpush1.bf16.msra.mxu0 %v6452_v3  ;;  %1507 = vmatpush1.bf16.msra.mxu1 %v6453_v43 }
 0x18c   :  { %1497 = vmatprep.mubr.bf16.mxu0 %v1382_v12  ;;  %1538 = vmatprep.mubr.bf16.mxu1 %v1382_v12  ;;  %v6471_v12 = vld [vmem:[#allocation99_spill] sm:$0xff] }
 0x18d   :  { %1467 = vmatprep.subr.bf16.mxu0 %v6454_v33  ;;  %1508 = vmatprep.subr.bf16.mxu1 %v6455_v25 }
 0x18f   :  { %1468 = vmatpush1.bf16.msra.mxu0 %v6456_v48  ;;  %1509 = vmatpush1.bf16.msra.mxu1 %v6457_v18 }
 0x190   :  { %1469 = vmatprep.subr.bf16.mxu0 %v6458_v2  ;;  %1510 = vmatprep.subr.bf16.mxu1 %v6459_v36 }
 0x193   :  { %1470 = vmatpush1.bf16.msra.mxu0 %v6460_v28  ;;  %1511 = vmatpush1.bf16.msra.mxu1 %v6461_v20  ;;  %v6472_v20 = vld [vmem:[#allocation86_spill] sm:$0xff] }
 0x194   :  { %1471 = vmatprep.subr.bf16.mxu0 %v6462_v35  ;;  %1512 = vmatprep.subr.bf16.mxu1 %v6463_v23  ;;  %v6473_v35 = vld [vmem:[#allocation101_spill] sm:$0xff]  ;;  %v6474_v23 = vld [vmem:[#allocation88_spill] sm:$0xff] }
 0x197   :  { %1472 = vmatpush1.bf16.msra.mxu0 %v6464_v46  ;;  %1513 = vmatpush1.bf16.msra.mxu1 %v6465_v30  ;;  %v6475_v46 = vld [vmem:[#allocation103_spill] sm:$0xff]  ;;  %v6476_v30 = vld [vmem:[#allocation90_spill] sm:$0xff] }
 0x198   :  { %1473 = vmatprep.subr.bf16.mxu0 %v6466_v22  ;;  %1514 = vmatprep.subr.bf16.mxu1 %v6467_v57  ;;  %v6477_v22 = vld [vmem:[#allocation105_spill] sm:$0xff]  ;;  %v6478_v57 = vld [vmem:[#allocation92_spill] sm:$0xff] }
 0x19b   :  { %1474 = vmatpush1.bf16.msra.mxu0 %v6468_v52  ;;  %1515 = vmatpush1.bf16.msra.mxu1 %v6469_v11  ;;  %v6479_v52 = vld [vmem:[#allocation107_spill] sm:$0xff]  ;;  %v6480_v11 = vld [vmem:[#allocation94_spill] sm:$0xff] }
 0x19c   :  { %1475 = vmatprep.subr.bf16.mxu0 %v6470_v26  ;;  %1516 = vmatprep.subr.bf16.mxu1 %v6471_v12  ;;  %v6481_v26 = vld [vmem:[#allocation109_spill] sm:$0xff]  ;;  %v6482_v12 = vld [vmem:[#allocation96_spill] sm:$0xff] }
 0x19f   :  { %1476 = vmatpush1.bf16.msra.mxu0 %v6472_v20  ;;  %1517 = vmatpush1.bf16.msra.mxu1 %v6473_v35  ;;  %v6483_v20 = vld [vmem:[#allocation111_spill] sm:$0xff]  ;;  %v6484_v35 = vld [vmem:[#allocation98_spill] sm:$0xff] }
 0x1a0   :  { %1477 = vmatprep.subr.bf16.mxu0 %v6474_v23  ;;  %1518 = vmatprep.subr.bf16.mxu1 %v6475_v46  ;;  %v6485_v23 = vld [vmem:[#allocation113_spill] sm:$0xff]  ;;  %v6486_v46 = vld [vmem:[#allocation100_spill] sm:$0xff] }
 0x1a3   :  { %1478 = vmatpush1.bf16.msra.mxu0 %v6476_v30  ;;  %1519 = vmatpush1.bf16.msra.mxu1 %v6477_v22  ;;  %v6487_v30 = vld [vmem:[#allocation115_spill] sm:$0xff]  ;;  %v6488_v22 = vld [vmem:[#allocation102_spill] sm:$0xff] }
 0x1a4   :  { %1479 = vmatprep.subr.bf16.mxu0 %v6478_v57  ;;  %1520 = vmatprep.subr.bf16.mxu1 %v6479_v52  ;;  %v6489_v52 = vld [vmem:[#allocation104_spill] sm:$0xff] }
 0x1a7   :  { %1480 = vmatpush1.bf16.msra.mxu0 %v6480_v11  ;;  %1521 = vmatpush1.bf16.msra.mxu1 %v6481_v26  ;;  %v6490_v26 = vld [vmem:[#allocation106_spill] sm:$0xff] }
 0x1a8   :  { %1481 = vmatprep.subr.bf16.mxu0 %v6482_v12  ;;  %1522 = vmatprep.subr.bf16.mxu1 %v6483_v20  ;;  %v6491_v20 = vld [vmem:[#allocation108_spill] sm:$0xff] }
 0x1ab   :  { %1482 = vmatpush2.bf16.msra.mxu0 %v6484_v35  ;;  %1523 = vmatpush2.bf16.msra.mxu1 %v6485_v23  ;;  %v6492_v23 = vld [vmem:[#allocation110_spill] sm:$0xff] }
 0x1ac   :  { %1483 = vmatprep.subr.bf16.mxu0 %v6486_v46  ;;  %1524 = vmatprep.subr.bf16.mxu1 %v6487_v30  ;;  %v6493_v30 = vld [vmem:[#allocation112_spill] sm:$0xff] }
 0x1af   :  { %1484 = vmatpush2.bf16.msra.mxu0 %v6488_v22  ;;  %1525 = vmatpush2.bf16.msra.mxu1 %v4828_v59  ;;  %v6494_v59 = vld [vmem:[#allocation114_spill] sm:$0xff] }
 0x1b0   :  { %1485 = vmatprep.subr.bf16.mxu0 %v6489_v52  ;;  %1526 = vmatprep.subr.bf16.mxu1 %v4834_v56  ;;  %v6495_v56 = vld [vmem:[#allocation116_spill] sm:$0xff] }
 0x1b3   :  { %1486 = vmatpush2.bf16.msra.mxu0 %v6490_v26  ;;  %1527 = vmatpush2.bf16.msra.mxu1 %v4852_v49  ;;  %v6496_v49 = vld [vmem:[#allocation118_spill] sm:$0xff] }
 0x1b4   :  { %1487 = vmatprep.subr.bf16.mxu0 %v6491_v20  ;;  %1528 = vmatprep.subr.bf16.mxu1 %v4858_v17  ;;  %v6497_v17 = vld [vmem:[#allocation120_spill] sm:$0xff] }
 0x1b7   :  { %1488 = vmatpush2.bf16.msra.mxu0 %v6492_v23  ;;  %1529 = vmatpush2.bf16.msra.mxu1 %v4870_v51 }
 0x1b8   :  { %1489 = vmatprep.subr.bf16.mxu0 %v6493_v30  ;;  %1530 = vmatprep.subr.bf16.mxu1 %v4876_v27 }
 0x1bb   :  { %1490 = vmatpush2.bf16.msra.mxu0 %v6494_v59  ;;  %1531 = vmatpush2.bf16.msra.mxu1 %v4886_v0  ;;  %v6498_v0 = vld [vmem:[#allocation126_spill] sm:$0xff] }
 0x1bc   :  { %1491 = vmatprep.subr.bf16.mxu0 %v6495_v56  ;;  %1532 = vmatprep.subr.bf16.mxu1 %v4890_v1  ;;  %v6499_v1 = vld [vmem:[#allocation7_spill] sm:$0xff] }
 0x1bf   :  { %1492 = vmatpush2.bf16.msra.mxu0 %v6496_v49  ;;  %1533 = vmatpush2.bf16.msra.mxu1 %v4901_v50 }
 0x1c0   :  { %1493 = vmatprep.subr.bf16.mxu0 %v6497_v17  ;;  %1534 = vmatprep.subr.bf16.mxu1 %v4904_v41  ;;  %v6500_v41 = vld [vmem:[#allocation8_spill] sm:$0xff] }
 0x1c3   :  { %1494 = vmatpush2.bf16.msra.mxu0 %v4856_v10  ;;  %1535 = vmatpush2.bf16.msra.mxu1 %v4915_v8 }
 0x1c4   :  { %1495 = vmatprep.subr.bf16.mxu0 %v4861_v9  ;;  %1536 = vmatprep.subr.bf16.mxu1 %v4918_v38 }
 0x1c7   :  { %1496 = vmatpush2.bf16.msra.mxu0 %v6498_v0  ;;  %1537 = vmatpush2.bf16.msra.mxu1 %v4923_v29 }
 0x1c8   :  { %1645 = vmatprep.subr.bf16.mxu0 %v6499_v1  ;;  %1686 = vmatprep.subr.bf16.mxu1 %v4204_v54 }
 0x1ca   :  { %1498 = vmatmul.mubr.bf16.vlgmr.msra.gmra.mxu0 %v5008_v19  ;;  %1539 = vmatmul.mubr.bf16.vlgmr.msra.gmra.mxu1 %v5008_v19  ;;  %v6501_v19 = vld [vmem:[#allocation41_spill] sm:$0xff] }
 0x1cb   :  { %1646 = vmatpush1.bf16.msra.mxu0 %v6500_v41  ;;  %1687 = vmatpush1.bf16.msra.mxu1 %v4221_v60 }
 0x1cc   :  { %1647 = vmatprep.subr.bf16.mxu0 %v4142_v31  ;;  %1688 = vmatprep.subr.bf16.mxu1 %v4227_v62 }
 0x1cf   :  { %1648 = vmatpush1.bf16.msra.mxu0 %v4161_v37  ;;  %1689 = vmatpush1.bf16.msra.mxu1 %v4247_v4 }
 0x1d0   :  { %1649 = vmatprep.subr.bf16.mxu0 %v4165_v39  ;;  %1690 = vmatprep.subr.bf16.mxu1 %v4254_v6 }
 0x1d3   :  { %1650 = vmatpush1.bf16.msra.mxu0 %v4181_v45  ;;  %1691 = vmatpush1.bf16.msra.mxu1 %v4272_v13  ;;  %v1549_v45 = vld [vmem:[#allocation3 + $0x78] sm:$0xc] }
 0x1d4   :  { %1651 = vmatprep.subr.bf16.mxu0 %v4184_v47  ;;  %1692 = vmatprep.subr.bf16.mxu1 %v4278_v15 }
 0x1d7   :  { %1652 = vmatpush1.bf16.msra.mxu0 %v4202_v53  ;;  %1693 = vmatpush1.bf16.msra.mxu1 %v4296_v21 }
 0x1d8   :  { %1653 = vmatprep.subr.bf16.mxu0 %v4207_v55  ;;  %1694 = vmatprep.subr.bf16.mxu1 %v4302_v24  ;;  %v6502_v24 = vld [vmem:[#allocation28_spill] sm:$0xff] }
 0x1db   :  { %1654 = vmatpush1.bf16.msra.mxu0 %v4225_v61  ;;  %1695 = vmatpush1.bf16.msra.mxu1 %v4320_v32  ;;  %v6503_v61 = vld [vmem:[#allocation43_spill] sm:$0xff]  ;;  %v6504_v32 = vld [vmem:[#allocation30_spill] sm:$0xff] }
 0x1dc   :  { %1655 = vmatprep.subr.bf16.mxu0 %v4230_v63  ;;  %1696 = vmatprep.subr.bf16.mxu1 %v4326_v34  ;;  %v6505_v63 = vld [vmem:[#allocation45_spill] sm:$0xff]  ;;  %v6506_v34 = vld [vmem:[#allocation32_spill] sm:$0xff] }
 0x1df   :  { %1656 = vmatpush1.bf16.msra.mxu0 %v4252_v5  ;;  %1697 = vmatpush1.bf16.msra.mxu1 %v4344_v42  ;;  %v6507_v5 = vld [vmem:[#allocation47_spill] sm:$0xff]  ;;  %v6508_v42 = vld [vmem:[#allocation34_spill] sm:$0xff] }
 0x1e0   :  { %1657 = vmatprep.subr.bf16.mxu0 %v4257_v7  ;;  %1698 = vmatprep.subr.bf16.mxu1 %v4350_v44  ;;  %v6509_v7 = vld [vmem:[#allocation49_spill] sm:$0xff]  ;;  %v6510_v44 = vld [vmem:[#allocation36_spill] sm:$0xff] }
 0x1e3   :  { %1658 = vmatpush1.bf16.msra.mxu0 %v4276_v14  ;;  %1699 = vmatpush1.bf16.msra.mxu1 %v6501_v19  ;;  %v6511_v14 = vld [vmem:[#allocation51_spill] sm:$0xff]  ;;  %v6512_v19 = vld [vmem:[#allocation38_spill] sm:$0xff] }
 0x1e4   :  { %1659 = vmatprep.subr.bf16.mxu0 %v6502_v24  ;;  %1700 = vmatprep.subr.bf16.mxu1 %v6503_v61  ;;  %v6513_v24 = vld [vmem:[#allocation53_spill] sm:$0xff]  ;;  %v6514_v61 = vld [vmem:[#allocation40_spill] sm:$0xff] }
 0x1e7   :  { %1660 = vmatpush1.bf16.msra.mxu0 %v6504_v32  ;;  %1701 = vmatpush1.bf16.msra.mxu1 %v6505_v63  ;;  %v6515_v32 = vld [vmem:[#allocation55_spill] sm:$0xff]  ;;  %v6516_v63 = vld [vmem:[#allocation42_spill] sm:$0xff] }
 0x1e8   :  { %1661 = vmatprep.subr.bf16.mxu0 %v6506_v34  ;;  %1702 = vmatprep.subr.bf16.mxu1 %v6507_v5  ;;  %v6517_v34 = vld [vmem:[#allocation57_spill] sm:$0xff]  ;;  %v6518_v5 = vld [vmem:[#allocation44_spill] sm:$0xff] }
 0x1eb   :  { %1662 = vmatpush2.bf16.msra.mxu0 %v6508_v42  ;;  %1703 = vmatpush2.bf16.msra.mxu1 %v6509_v7  ;;  %v6519_v42 = vld [vmem:[#allocation59_spill] sm:$0xff]  ;;  %v6520_v7 = vld [vmem:[#allocation46_spill] sm:$0xff] }
 0x1ec   :  { %1663 = vmatprep.subr.bf16.mxu0 %v6510_v44  ;;  %1704 = vmatprep.subr.bf16.mxu1 %v6511_v14  ;;  %v6521_v44 = vld [vmem:[#allocation61_spill] sm:$0xff]  ;;  %v6522_v14 = vld [vmem:[#allocation48_spill] sm:$0xff] }
 0x1ef   :  { %1664 = vmatpush2.bf16.msra.mxu0 %v6512_v19  ;;  %1705 = vmatpush2.bf16.msra.mxu1 %v6513_v24  ;;  %v6523_v19 = vld [vmem:[#allocation63_spill] sm:$0xff]  ;;  %v6524_v24 = vld [vmem:[#allocation50_spill] sm:$0xff] }
 0x1f0   :  { %1665 = vmatprep.subr.bf16.mxu0 %v6514_v61  ;;  %1706 = vmatprep.subr.bf16.mxu1 %v6515_v32  ;;  %v6525_v61 = vld [vmem:[#allocation65_spill] sm:$0xff]  ;;  %v6526_v32 = vld [vmem:[#allocation52_spill] sm:$0xff] }
 0x1f3   :  { %1666 = vmatpush2.bf16.msra.mxu0 %v6516_v63  ;;  %1707 = vmatpush2.bf16.msra.mxu1 %v6517_v34  ;;  %v6527_v63 = vld [vmem:[#allocation67_spill] sm:$0xff]  ;;  %v6528_v34 = vld [vmem:[#allocation54_spill] sm:$0xff] }
 0x1f4   :  { %1667 = vmatprep.subr.bf16.mxu0 %v6518_v5  ;;  %1708 = vmatprep.subr.bf16.mxu1 %v6519_v42  ;;  %v6529_v42 = vld [vmem:[#allocation56_spill] sm:$0xff] }
 0x1f7   :  { %1668 = vmatpush2.bf16.msra.mxu0 %v6520_v7  ;;  %1709 = vmatpush2.bf16.msra.mxu1 %v6521_v44  ;;  %v6530_v44 = vld [vmem:[#allocation58_spill] sm:$0xff] }
 0x1f8   :  { %1669 = vmatprep.subr.bf16.mxu0 %v6522_v14  ;;  %1710 = vmatprep.subr.bf16.mxu1 %v6523_v19  ;;  %v6531_v14 = vld [vmem:[#allocation73_spill] sm:$0xff]  ;;  %v6532_v19 = vld [vmem:[#allocation60_spill] sm:$0xff] }
 0x1fb   :  { %1670 = vmatpush2.bf16.msra.mxu0 %v6524_v24  ;;  %1711 = vmatpush2.bf16.msra.mxu1 %v6525_v61  ;;  %v6533_v24 = vld [vmem:[#allocation75_spill] sm:$0xff]  ;;  %v6534_v61 = vld [vmem:[#allocation62_spill] sm:$0xff] }
 0x1fc   :  { %1671 = vmatprep.subr.bf16.mxu0 %v6526_v32  ;;  %1712 = vmatprep.subr.bf16.mxu1 %v6527_v63  ;;  %v6535_v32 = vld [vmem:[#allocation77_spill] sm:$0xff]  ;;  %v6536_v63 = vld [vmem:[#allocation64_spill] sm:$0xff] }
 0x1ff   :  { %1672 = vmatpush2.bf16.msra.mxu0 %v6528_v34  ;;  %1713 = vmatpush2.bf16.msra.mxu1 %v6445_v58  ;;  %v6537_v34 = vld [vmem:[#allocation79_spill] sm:$0xff] }
 0x200   :  { %1673 = vmatprep.subr.bf16.mxu0 %v6529_v42  ;;  %1714 = vmatprep.subr.bf16.mxu1 %v6446_v16  ;;  %v1547_v58 = vld [vmem:[#allocation3] sm:$0xc]  ;;  %v1548_v42 = vld [vmem:[#allocation3 + $0x38] sm:$0xc] }
 0x201   :  { %v1555_v7 = vrot.slane %v1547_v58, 2  ;;  %v1556_v55 = vrot.slane %v1548_v42, 2  ;;  %v1557_v58 = vrot.slane %v1549_v45, 2 }
 0x203   :  { %1674 = vmatpush2.bf16.msra.mxu0 %v6530_v44  ;;  %1715 = vmatpush2.bf16.msra.mxu1 %v6531_v14 }
 0x204   :  { %1675 = vmatprep.subr.bf16.mxu0 %v6532_v19  ;;  %1716 = vmatprep.subr.bf16.mxu1 %v6533_v24 }
 0x207   :  { %1676 = vmatpush2.bf16.msra.mxu0 %v6534_v61  ;;  %1717 = vmatpush2.bf16.msra.mxu1 %v6535_v32 }
 0x208   :  { %1727 = vmatprep.subr.bf16.mxu0 %v6536_v63  ;;  %1768 = vmatprep.subr.bf16.mxu1 %v6537_v34  ;;  %v1550_v63 = vld [vmem:[#allocation3 + $0x58] sm:$0xc] }
 0x209   :  { %v1558_v34 = vrot.slane %v1550_v63, 2  ;;  %v6538_v63 = vld [vmem:[#allocation135_spill] sm:$0xff] }
 0x24a   :  { %v1417_v16 = vpop.f32.mrf.mxu0  ;;  %v1458_v5 = vpop.f32.mrf.mxu1 }
 0x24b   :  { %v1563_v44 = vadd.f32 %v1555_v7, %v1417_v16  ;;  %v1565_v7 = vadd.f32 %v1557_v58, %v1458_v5 }
 0x24c   :  { %v1419_v14 = vpop.f32.mrf.mxu0  ;;  %v1460_v21 = vpop.f32.mrf.mxu1 }
 0x24d   :  { %v3622_v19 = vmul.f32 -1.442695, %v1563_v44  ;;  %v1564_v53 = vadd.f32 %v1556_v55, %v1419_v14  ;;  %v1566_v13 = vadd.f32 %v1558_v34, %v1460_v21 }
 0x24e   :  { %v1421_v24 = vpop.f32.mrf.mxu0  ;;  %v1462_v15 = vpop.f32.mrf.mxu1 }
 0x24f   :  { %3783 = vpow2.f32 %v3622_v19  ;;  %v3623_v61 = vmul.f32 -1.442695, %v1564_v53  ;;  %v3624_v6 = vmul.f32 -1.442695, %v1566_v13  ;;  %v1568_v13 = vld [vmem:[#allocation3 + $0x48] sm:$0x30] }
 0x250   :  { %v1422_v32 = vpop.f32.mrf.mxu0  ;;  %v1463_v47 = vpop.f32.mrf.mxu1 }
 0x251   :  { %3785 = vpow2.f32 %v3623_v61 }
 0x252   :  { %3787 = vpow2.f32 %v3624_v6  ;;  %v1567_v6 = vld [vmem:[#allocation3 + $0x60] sm:$0x30] }
 0x253   :  { %v1575_v34 = vrot.slane %v1567_v6, 4 }
 0x25c   :  { %v3784_v39 = vpop.eup %3783 }
 0x25d   :  { %v1590_v16 = vadd.f32 1.0, %v3784_v39 }
 0x25e   :  { %v3786_v42 = vpop.eup %3785 }
 0x25f   :  { %3789 = vrcp.f32 %v1590_v16  ;;  %v1596_v55 = vadd.f32 1.0, %v3786_v42  ;;  %v3788_v14 = vpop.eup %3787 }
 0x260   :  { %3791 = vtanh.f32 %v1565_v7  ;;  %v1603_v61 = vadd.f32 1.0, %v3788_v14  ;;  %v1576_v7 = vrot.slane %v1568_v13, 4 }
 0x261   :  { %3793 = vrcp.f32 %v1596_v55 }
 0x262   :  { %3795 = vrcp.f32 %v1603_v61 }
 0x26c   :  { %v3790_v53 = vpop.eup %3789 }
 0x26d   :  { %v3792_v15 = vpop.eup %3791 }
 0x26e   :  { %v3794_v47 = vpop.eup %3793  ;;  %v1626_v24 = vmul.f32 %v3792_v15, %v3790_v53 }
 0x26f   :  { %v1625_v21 = vmul.f32 %v3794_v47, %v6538_v63  ;;  %v3796_v39 = vpop.eup %3795  ;;  %v1570_v63 = vld [vmem:[#allocation3 + $0x50] sm:$0x30] }
 0x271   :  { %v5143_v32 = vadd.f32 %v1626_v24, %v1625_v21  ;;  %v1578_v21 = vrot.slane %v1570_v63, 4  ;;  %v6542_v63 = vld [vmem:[#allocation91_spill] sm:$0xff] }
 0x273   :  { %6539 = vst [vmem:[#allocation66_spill] sm:$0xff] %v5143_v32  ;;  %3797 = vtanh.f32 %v5143_v32 }
 0x280   :  { %v3798_v45 = vpop.eup %3797 }
 0x281   :  { %v1632_v5 = vmul.f32 %v3798_v45, %v3796_v39  ;;  %v1569_v45 = vld [vmem:[#allocation3 + $0x18] sm:$0x30] }
 0x282   :  { %v1577_v6 = vrot.slane %v1569_v45, 4  ;;  %v6545_v45 = vld [vmem:[#allocation80_spill] sm:$0xff] }
 0x28a   :  { %v1499_v44 = vpop.f32.mrf.mxu0  ;;  %v1540_v19 = vpop.f32.mrf.mxu1 }
 0x28b   :  { %v1583_v58 = vadd.f32 %v1575_v34, %v1499_v44  ;;  %v1585_v34 = vadd.f32 %v1577_v6, %v1540_v19  ;;  %v6546_v6 = vld [vmem:[#allocation95_spill] sm:$0xff] }
 0x28c   :  { %v1501_v16 = vpop.f32.mrf.mxu0  ;;  %v1542_v42 = vpop.f32.mrf.mxu1 }
 0x28d   :  { %v3625_v55 = vmul.f32 -1.442695, %v1583_v58  ;;  %v1584_v14 = vadd.f32 %v1576_v7, %v1501_v16  ;;  %v1586_v39 = vadd.f32 %v1578_v21, %v1542_v42  ;;  %v6543_v21 = vld [vmem:[#allocation78_spill] sm:$0xff] }
 0x28e   :  { %v1503_v53 = vpop.f32.mrf.mxu0  ;;  %v1544_v15 = vpop.f32.mrf.mxu1 }
 0x28f   :  { %3799 = vpow2.f32 %v3625_v55  ;;  %v3626_v47 = vmul.f32 -1.442695, %v1584_v14  ;;  %v3627_v32 = vmul.f32 -1.442695, %v1586_v39  ;;  %v6544_v39 = vld [vmem:[#allocation93_spill] sm:$0xff] }
 0x290   :  { %v1504_v61 = vpop.f32.mrf.mxu0  ;;  %v1545_v24 = vpop.f32.mrf.mxu1 }
 0x291   :  { %3801 = vpow2.f32 %v3626_v47  ;;  %v5150_v24 = vpack.c.bf16 %v1632_v5, %v1632_v5  ;;  %v6541_v5 = vld [vmem:[#allocation76_spill] sm:$0xff] }
 0x292   :  { %3803 = vpow2.f32 %v3627_v32 }
 0x29c   :  { %v3800_v4 = vpop.eup %3799 }
 0x29d   :  { %v1609_v13 = vadd.f32 1.0, %v3800_v4 }
 0x29e   :  { %v3802_v44 = vpop.eup %3801 }
 0x29f   :  { %3805 = vrcp.f32 %v1609_v13  ;;  %v1615_v58 = vadd.f32 1.0, %v3802_v44  ;;  %v3804_v7 = vpop.eup %3803  ;;  %v6548_v13 = vld [vmem:[#allocation97_spill] sm:$0xff]  ;;  %v6549_v44 = vld [vmem:[#allocation84_spill] sm:$0xff] }
 0x2a0   :  { %3807 = vtanh.f32 %v1585_v34  ;;  %v1622_v53 = vadd.f32 1.0, %v3804_v7  ;;  %v6547_v34 = vld [vmem:[#allocation82_spill] sm:$0xff] }
 0x2a1   :  { %3809 = vrcp.f32 %v1615_v58  ;;  %v6550_v58 = vld [vmem:[#allocation99_spill] sm:$0xff]  ;;  %v6551_v7 = vld [vmem:[#allocation86_spill] sm:$0xff] }
 0x2a2   :  { %3811 = vrcp.f32 %v1622_v53  ;;  %v6555_v53 = vld [vmem:[#allocation90_spill] sm:$0xff] }
 0x2ac   :  { %v3806_v16 = vpop.eup %3805 }
 0x2ad   :  { %v3808_v55 = vpop.eup %3807 }
 0x2ae   :  { %v3810_v14 = vpop.eup %3809  ;;  %v1629_v15 = vmul.f32 %v3808_v55, %v3806_v16  ;;  %v6552_v16 = vld [vmem:[#allocation101_spill] sm:$0xff]  ;;  %v6553_v55 = vld [vmem:[#allocation88_spill] sm:$0xff] }
 0x2af   :  { %v1628_v42 = vmul.f32 %v3810_v14, %v5005_v40  ;;  %v3812_v4 = vpop.eup %3811  ;;  %v6540_v40 = vld [vmem:[#allocation89_spill] sm:$0xff]  ;;  %v6554_v14 = vld [vmem:[#allocation103_spill] sm:$0xff] }
 0x2b1   :  { %v5147_v47 = vadd.f32 %v1629_v15, %v1628_v42  ;;  %v6556_v15 = vld [vmem:[#allocation105_spill] sm:$0xff]  ;;  %v6557_v42 = vld [vmem:[#allocation107_spill] sm:$0xff] }
 0x2b3   :  { %3813 = vtanh.f32 %v5147_v47 }
 0x2c0   :  { %v3814_v19 = vpop.eup %3813 }
 0x2c1   :  { %v1634_v32 = vmul.f32 %v3814_v19, %v3812_v4  ;;  %v6558_v4 = vld [vmem:[#allocation109_spill] sm:$0xff]  ;;  %v6559_v19 = vld [vmem:[#allocation111_spill] sm:$0xff] }
 0x2c3   :  { %v1644_v61 = vpack.c.bf16 %v1634_v32, %v1634_v32  ;;  %v6560_v32 = vld [vmem:[#allocation113_spill] sm:$0xff] }
 0x2c5   :  { %1677 = vmatprep.mubr.bf16.mxu0 %v1644_v61  ;;  %1718 = vmatprep.mubr.bf16.mxu1 %v1644_v61 }
 0x2c6   :  { %1678 = vmatmul.mubr.bf16.vlgmr.msra.gmra.mxu0 %v5150_v24  ;;  %1719 = vmatmul.mubr.bf16.vlgmr.msra.gmra.mxu1 %v5150_v24 }
 0x2c7   :  { %1728 = vmatpush1.bf16.msra.mxu0 %v6452_v3  ;;  %1769 = vmatpush1.bf16.msra.mxu1 %v6453_v43 }
 0x2c8   :  { %1759 = vmatprep.mubr.bf16.mxu0 %v1644_v61  ;;  %1800 = vmatprep.mubr.bf16.mxu1 %v1644_v61  ;;  %v6561_v61 = vld [vmem:[#allocation115_spill] sm:$0xff] }
 0x2c9   :  { %1729 = vmatprep.subr.bf16.mxu0 %v6454_v33  ;;  %1770 = vmatprep.subr.bf16.mxu1 %v6455_v25 }
 0x2cb   :  { %1730 = vmatpush1.bf16.msra.mxu0 %v6456_v48  ;;  %1771 = vmatpush1.bf16.msra.mxu1 %v6457_v18 }
 0x2cc   :  { %1731 = vmatprep.subr.bf16.mxu0 %v6458_v2  ;;  %1772 = vmatprep.subr.bf16.mxu1 %v6459_v36 }
 0x2cf   :  { %1732 = vmatpush1.bf16.msra.mxu0 %v6460_v28  ;;  %1773 = vmatpush1.bf16.msra.mxu1 %v6540_v40 }
 0x2d0   :  { %1733 = vmatprep.subr.bf16.mxu0 %v6541_v5  ;;  %1774 = vmatprep.subr.bf16.mxu1 %v6542_v63 }
 0x2d3   :  { %1734 = vmatpush1.bf16.msra.mxu0 %v6543_v21  ;;  %1775 = vmatpush1.bf16.msra.mxu1 %v6544_v39 }
 0x2d4   :  { %1735 = vmatprep.subr.bf16.mxu0 %v6545_v45  ;;  %1776 = vmatprep.subr.bf16.mxu1 %v6546_v6 }
 0x2d7   :  { %1736 = vmatpush1.bf16.msra.mxu0 %v6547_v34  ;;  %1777 = vmatpush1.bf16.msra.mxu1 %v6548_v13 }
 0x2d8   :  { %1737 = vmatprep.subr.bf16.mxu0 %v6549_v44  ;;  %1778 = vmatprep.subr.bf16.mxu1 %v6550_v58 }
 0x2db   :  { %1738 = vmatpush1.bf16.msra.mxu0 %v6551_v7  ;;  %1779 = vmatpush1.bf16.msra.mxu1 %v6552_v16 }
 0x2dc   :  { %1739 = vmatprep.subr.bf16.mxu0 %v6553_v55  ;;  %1780 = vmatprep.subr.bf16.mxu1 %v6554_v14 }
 0x2df   :  { %1740 = vmatpush1.bf16.msra.mxu0 %v6555_v53  ;;  %1781 = vmatpush1.bf16.msra.mxu1 %v6556_v15 }
 0x2e0   :  { %1741 = vmatprep.subr.bf16.mxu0 %v6478_v57  ;;  %1782 = vmatprep.subr.bf16.mxu1 %v6557_v42  ;;  %v6562_v57 = vld [vmem:[#allocation117_spill] sm:$0xff] }
 0x2e3   :  { %1742 = vmatpush1.bf16.msra.mxu0 %v6480_v11  ;;  %1783 = vmatpush1.bf16.msra.mxu1 %v6558_v4  ;;  %v6563_v11 = vld [vmem:[#allocation119_spill] sm:$0xff] }
 0x2e4   :  { %1743 = vmatprep.subr.bf16.mxu0 %v6482_v12  ;;  %1784 = vmatprep.subr.bf16.mxu1 %v6559_v19  ;;  %v6564_v12 = vld [vmem:[#allocation121_spill] sm:$0xff] }
 0x2e7   :  { %1744 = vmatpush2.bf16.msra.mxu0 %v6484_v35  ;;  %1785 = vmatpush2.bf16.msra.mxu1 %v6560_v32  ;;  %v6565_v35 = vld [vmem:[#allocation123_spill] sm:$0xff] }
 0x2e8   :  { %1745 = vmatprep.subr.bf16.mxu0 %v6486_v46  ;;  %1786 = vmatprep.subr.bf16.mxu1 %v6561_v61 }
 0x2eb   :  { %1746 = vmatpush2.bf16.msra.mxu0 %v6488_v22  ;;  %1787 = vmatpush2.bf16.msra.mxu1 %v6562_v57 }
 0x2ec   :  { %1747 = vmatprep.subr.bf16.mxu0 %v6489_v52  ;;  %1788 = vmatprep.subr.bf16.mxu1 %v6563_v11  ;;  %v6566_v52 = vld [vmem:[#allocation128_spill] sm:$0xff] }
 0x2ef   :  { %1748 = vmatpush2.bf16.msra.mxu0 %v6490_v26  ;;  %1789 = vmatpush2.bf16.msra.mxu1 %v6564_v12  ;;  %v6567_v26 = vld [vmem:[#allocation129_spill] sm:$0xff] }
 0x2f0   :  { %1749 = vmatprep.subr.bf16.mxu0 %v6491_v20  ;;  %1790 = vmatprep.subr.bf16.mxu1 %v6565_v35 }
 0x2f3   :  { %1750 = vmatpush2.bf16.msra.mxu0 %v6492_v23  ;;  %1791 = vmatpush2.bf16.msra.mxu1 %v4870_v51  ;;  %v6568_v23 = vld [vmem:[#allocation131_spill] sm:$0xff] }
 0x2f4   :  { %1751 = vmatprep.subr.bf16.mxu0 %v6493_v30  ;;  %1792 = vmatprep.subr.bf16.mxu1 %v4876_v27 }
 0x2f7   :  { %1752 = vmatpush2.bf16.msra.mxu0 %v6494_v59  ;;  %1793 = vmatpush2.bf16.msra.mxu1 %v6566_v52 }
 0x2f8   :  { %1753 = vmatprep.subr.bf16.mxu0 %v6495_v56  ;;  %1794 = vmatprep.subr.bf16.mxu1 %v6567_v26  ;;  %v1811_v56 = vld [vmem:[#allocation3 + $0x78] sm:$0x30] }
 0x2fb   :  { %1754 = vmatpush2.bf16.msra.mxu0 %v6496_v49  ;;  %1795 = vmatpush2.bf16.msra.mxu1 %v4901_v50 }
 0x2fc   :  { %1755 = vmatprep.subr.bf16.mxu0 %v6497_v17  ;;  %1796 = vmatprep.subr.bf16.mxu1 %v6568_v23 }
 0x2ff   :  { %1756 = vmatpush2.bf16.msra.mxu0 %v4856_v10  ;;  %1797 = vmatpush2.bf16.msra.mxu1 %v4915_v8 }
 0x300   :  { %1757 = vmatprep.subr.bf16.mxu0 %v4861_v9  ;;  %1798 = vmatprep.subr.bf16.mxu1 %v4918_v38  ;;  %v6573_v38 = vld [vmem:[#allocation25_spill] sm:$0xff] }
 0x303   :  { %1758 = vmatpush2.bf16.msra.mxu0 %v6498_v0  ;;  %1799 = vmatpush2.bf16.msra.mxu1 %v4923_v29  ;;  %v6569_v0 = vld [vmem:[#allocation21_spill] sm:$0xff]  ;;  %v6570_v29 = vld [vmem:[#allocation11_spill] sm:$0xff] }
 0x304   :  { %1907 = vmatprep.subr.bf16.mxu0 %v6499_v1  ;;  %1948 = vmatprep.subr.bf16.mxu1 %v4204_v54  ;;  %v6571_v1 = vld [vmem:[#allocation23_spill] sm:$0xff]  ;;  %v6572_v54 = vld [vmem:[#allocation12_spill] sm:$0xff] }
 0x306   :  { %1760 = vmatmul.mubr.bf16.vlgmr.msra.gmra.mxu0 %v5150_v24  ;;  %1801 = vmatmul.mubr.bf16.vlgmr.msra.gmra.mxu1 %v5150_v24  ;;  %v6574_v24 = vld [vmem:[#allocation13_spill] sm:$0xff] }
 0x307   :  { %1908 = vmatpush1.bf16.msra.mxu0 %v6500_v41  ;;  %1949 = vmatpush1.bf16.msra.mxu1 %v4221_v60  ;;  %v6575_v41 = vld [vmem:[#allocation27_spill] sm:$0xff]  ;;  %v6576_v60 = vld [vmem:[#allocation14_spill] sm:$0xff] }
 0x308   :  { %1909 = vmatprep.subr.bf16.mxu0 %v4142_v31  ;;  %1950 = vmatprep.subr.bf16.mxu1 %v4227_v62  ;;  %v6577_v31 = vld [vmem:[#allocation29_spill] sm:$0xff]  ;;  %v6578_v62 = vld [vmem:[#allocation16_spill] sm:$0xff] }
 0x30b   :  { %1910 = vmatpush1.bf16.msra.mxu0 %v4161_v37  ;;  %1951 = vmatpush1.bf16.msra.mxu1 %v6569_v0  ;;  %v6579_v37 = vld [vmem:[#allocation31_spill] sm:$0xff]  ;;  %v6580_v0 = vld [vmem:[#allocation18_spill] sm:$0xff] }
 0x30c   :  { %1911 = vmatprep.subr.bf16.mxu0 %v6570_v29  ;;  %1952 = vmatprep.subr.bf16.mxu1 %v6571_v1  ;;  %v6581_v29 = vld [vmem:[#allocation33_spill] sm:$0xff]  ;;  %v6582_v1 = vld [vmem:[#allocation20_spill] sm:$0xff] }
 0x30f   :  { %1912 = vmatpush1.bf16.msra.mxu0 %v6572_v54  ;;  %1953 = vmatpush1.bf16.msra.mxu1 %v6573_v38  ;;  %v6583_v54 = vld [vmem:[#allocation35_spill] sm:$0xff]  ;;  %v6584_v38 = vld [vmem:[#allocation22_spill] sm:$0xff] }
 0x310   :  { %1913 = vmatprep.subr.bf16.mxu0 %v6574_v24  ;;  %1954 = vmatprep.subr.bf16.mxu1 %v6575_v41  ;;  %v6585_v24 = vld [vmem:[#allocation37_spill] sm:$0xff]  ;;  %v6586_v41 = vld [vmem:[#allocation24_spill] sm:$0xff] }
 0x313   :  { %1914 = vmatpush1.bf16.msra.mxu0 %v6576_v60  ;;  %1955 = vmatpush1.bf16.msra.mxu1 %v6577_v31  ;;  %v6587_v60 = vld [vmem:[#allocation39_spill] sm:$0xff]  ;;  %v6588_v31 = vld [vmem:[#allocation26_spill] sm:$0xff] }
 0x314   :  { %1915 = vmatprep.subr.bf16.mxu0 %v6578_v62  ;;  %1956 = vmatprep.subr.bf16.mxu1 %v6579_v37  ;;  %v6589_v62 = vld [vmem:[#allocation41_spill] sm:$0xff]  ;;  %v6590_v37 = vld [vmem:[#allocation28_spill] sm:$0xff] }
 0x317   :  { %1916 = vmatpush1.bf16.msra.mxu0 %v6580_v0  ;;  %1957 = vmatpush1.bf16.msra.mxu1 %v6581_v29  ;;  %v6591_v0 = vld [vmem:[#allocation43_spill] sm:$0xff]  ;;  %v6592_v29 = vld [vmem:[#allocation30_spill] sm:$0xff] }
 0x318   :  { %1917 = vmatprep.subr.bf16.mxu0 %v6582_v1  ;;  %1958 = vmatprep.subr.bf16.mxu1 %v6583_v54  ;;  %v6593_v1 = vld [vmem:[#allocation45_spill] sm:$0xff]  ;;  %v6594_v54 = vld [vmem:[#allocation32_spill] sm:$0xff] }
 0x31b   :  { %1918 = vmatpush1.bf16.msra.mxu0 %v6584_v38  ;;  %1959 = vmatpush1.bf16.msra.mxu1 %v6585_v24  ;;  %v6595_v38 = vld [vmem:[#allocation47_spill] sm:$0xff]  ;;  %v6596_v24 = vld [vmem:[#allocation34_spill] sm:$0xff] }
 0x31c   :  { %1919 = vmatprep.subr.bf16.mxu0 %v6586_v41  ;;  %1960 = vmatprep.subr.bf16.mxu1 %v6587_v60  ;;  %v6597_v41 = vld [vmem:[#allocation49_spill] sm:$0xff]  ;;  %v6598_v60 = vld [vmem:[#allocation36_spill] sm:$0xff] }
 0x31f   :  { %1920 = vmatpush1.bf16.msra.mxu0 %v6588_v31  ;;  %1961 = vmatpush1.bf16.msra.mxu1 %v6589_v62  ;;  %v6599_v31 = vld [vmem:[#allocation51_spill] sm:$0xff]  ;;  %v6600_v62 = vld [vmem:[#allocation38_spill] sm:$0xff] }
 0x320   :  { %1921 = vmatprep.subr.bf16.mxu0 %v6590_v37  ;;  %1962 = vmatprep.subr.bf16.mxu1 %v6591_v0  ;;  %v6601_v37 = vld [vmem:[#allocation53_spill] sm:$0xff]  ;;  %v6602_v0 = vld [vmem:[#allocation40_spill] sm:$0xff] }
 0x323   :  { %1922 = vmatpush1.bf16.msra.mxu0 %v6592_v29  ;;  %1963 = vmatpush1.bf16.msra.mxu1 %v6593_v1  ;;  %v6603_v29 = vld [vmem:[#allocation55_spill] sm:$0xff]  ;;  %v6604_v1 = vld [vmem:[#allocation42_spill] sm:$0xff] }
 0x324   :  { %1923 = vmatprep.subr.bf16.mxu0 %v6594_v54  ;;  %1964 = vmatprep.subr.bf16.mxu1 %v6595_v38  ;;  %v6605_v54 = vld [vmem:[#allocation57_spill] sm:$0xff]  ;;  %v6606_v38 = vld [vmem:[#allocation44_spill] sm:$0xff] }
 0x327   :  { %1924 = vmatpush2.bf16.msra.mxu0 %v6596_v24  ;;  %1965 = vmatpush2.bf16.msra.mxu1 %v6597_v41  ;;  %v6607_v24 = vld [vmem:[#allocation59_spill] sm:$0xff]  ;;  %v6608_v41 = vld [vmem:[#allocation46_spill] sm:$0xff] }
 0x328   :  { %1925 = vmatprep.subr.bf16.mxu0 %v6598_v60  ;;  %1966 = vmatprep.subr.bf16.mxu1 %v6599_v31  ;;  %v6609_v60 = vld [vmem:[#allocation61_spill] sm:$0xff]  ;;  %v6610_v31 = vld [vmem:[#allocation48_spill] sm:$0xff] }
 0x32b   :  { %1926 = vmatpush2.bf16.msra.mxu0 %v6600_v62  ;;  %1967 = vmatpush2.bf16.msra.mxu1 %v6601_v37  ;;  %v6611_v62 = vld [vmem:[#allocation63_spill] sm:$0xff]  ;;  %v6612_v37 = vld [vmem:[#allocation50_spill] sm:$0xff] }
 0x32c   :  { %1927 = vmatprep.subr.bf16.mxu0 %v6602_v0  ;;  %1968 = vmatprep.subr.bf16.mxu1 %v6603_v29  ;;  %v6613_v0 = vld [vmem:[#allocation65_spill] sm:$0xff]  ;;  %v6614_v29 = vld [vmem:[#allocation52_spill] sm:$0xff] }
 0x32f   :  { %1928 = vmatpush2.bf16.msra.mxu0 %v6604_v1  ;;  %1969 = vmatpush2.bf16.msra.mxu1 %v6605_v54  ;;  %v6615_v1 = vld [vmem:[#allocation67_spill] sm:$0xff]  ;;  %v6616_v54 = vld [vmem:[#allocation54_spill] sm:$0xff] }
 0x330   :  { %1929 = vmatprep.subr.bf16.mxu0 %v6606_v38  ;;  %1970 = vmatprep.subr.bf16.mxu1 %v6607_v24  ;;  %v6617_v38 = vld [vmem:[#allocation69_spill] sm:$0xff]  ;;  %v6618_v24 = vld [vmem:[#allocation56_spill] sm:$0xff] }
 0x333   :  { %1930 = vmatpush2.bf16.msra.mxu0 %v6608_v41  ;;  %1971 = vmatpush2.bf16.msra.mxu1 %v6609_v60  ;;  %v6619_v41 = vld [vmem:[#allocation71_spill] sm:$0xff]  ;;  %v6620_v60 = vld [vmem:[#allocation58_spill] sm:$0xff] }
 0x334   :  { %1931 = vmatprep.subr.bf16.mxu0 %v6610_v31  ;;  %1972 = vmatprep.subr.bf16.mxu1 %v6611_v62  ;;  %v6621_v31 = vld [vmem:[#allocation73_spill] sm:$0xff]  ;;  %v6622_v62 = vld [vmem:[#allocation60_spill] sm:$0xff] }
 0x337   :  { %1932 = vmatpush2.bf16.msra.mxu0 %v6612_v37  ;;  %1973 = vmatpush2.bf16.msra.mxu1 %v6613_v0  ;;  %v6623_v37 = vld [vmem:[#allocation75_spill] sm:$0xff]  ;;  %v6624_v0 = vld [vmem:[#allocation62_spill] sm:$0xff] }
 0x338   :  { %1933 = vmatprep.subr.bf16.mxu0 %v6614_v29  ;;  %1974 = vmatprep.subr.bf16.mxu1 %v6615_v1  ;;  %v6625_v29 = vld [vmem:[#allocation77_spill] sm:$0xff]  ;;  %v6626_v1 = vld [vmem:[#allocation64_spill] sm:$0xff] }
 0x33b   :  { %1934 = vmatpush2.bf16.msra.mxu0 %v6616_v54  ;;  %1975 = vmatpush2.bf16.msra.mxu1 %v6617_v38  ;;  %v6627_v54 = vld [vmem:[#allocation79_spill] sm:$0xff] }
 0x33c   :  { %1935 = vmatprep.subr.bf16.mxu0 %v6618_v24  ;;  %1976 = vmatprep.subr.bf16.mxu1 %v6619_v41  ;;  %v1809_v38 = vld [vmem:[#allocation3] sm:$0x30]  ;;  %v1810_v24 = vld [vmem:[#allocation3 + $0x38] sm:$0x30] }
 0x33d   :  { %v1817_v9 = vrot.slane %v1809_v38, 4  ;;  %v1818_v10 = vrot.slane %v1810_v24, 4  ;;  %v1819_v38 = vrot.slane %v1811_v56, 4 }
 0x33f   :  { %1936 = vmatpush2.bf16.msra.mxu0 %v6620_v60  ;;  %1977 = vmatpush2.bf16.msra.mxu1 %v6621_v31 }
 0x340   :  { %1937 = vmatprep.subr.bf16.mxu0 %v6622_v62  ;;  %1978 = vmatprep.subr.bf16.mxu1 %v6623_v37 }
 0x343   :  { %1938 = vmatpush2.bf16.msra.mxu0 %v6624_v0  ;;  %1979 = vmatpush2.bf16.msra.mxu1 %v6625_v29 }
 0x344   :  { %1989 = vmatprep.subr.bf16.mxu0 %v6626_v1  ;;  %2030 = vmatprep.subr.bf16.mxu1 %v6627_v54  ;;  %v1812_v1 = vld [vmem:[#allocation3 + $0x58] sm:$0x30] }
 0x345   :  { %v1820_v54 = vrot.slane %v1812_v1, 4 }
 0x386   :  { %v1679_v41 = vpop.f32.mrf.mxu0  ;;  %v1720_v8 = vpop.f32.mrf.mxu1 }
 0x387   :  { %v1825_v60 = vadd.f32 %v1817_v9, %v1679_v41  ;;  %v1827_v9 = vadd.f32 %v1819_v38, %v1720_v8  ;;  %v1830_v8 = vld [vmem:[#allocation3 + $0x48] sm:$0xc] }
 0x388   :  { %v1681_v31 = vpop.f32.mrf.mxu0  ;;  %v1722_v23 = vpop.f32.mrf.mxu1 }
 0x389   :  { %v3628_v62 = vmul.f32 -1.442695, %v1825_v60  ;;  %v1826_v17 = vadd.f32 %v1818_v10, %v1681_v31  ;;  %v1828_v26 = vadd.f32 %v1820_v54, %v1722_v23 }
 0x38a   :  { %v1683_v37 = vpop.f32.mrf.mxu0  ;;  %v1724_v50 = vpop.f32.mrf.mxu1 }
 0x38b   :  { %3815 = vpow2.f32 %v3628_v62  ;;  %v3629_v0 = vmul.f32 -1.442695, %v1826_v17  ;;  %v3630_v52 = vmul.f32 -1.442695, %v1828_v26  ;;  %v1829_v50 = vld [vmem:[#allocation3 + $0x60] sm:$0xc] }
 0x38c   :  { %v1684_v29 = vpop.f32.mrf.mxu0  ;;  %v1725_v49 = vpop.f32.mrf.mxu1  ;;  %v1837_v23 = vrot.slane %v1829_v50, 2 }
 0x38d   :  { %3817 = vpow2.f32 %v3629_v0  ;;  %v6628_v49 = vld [vmem:[#allocation66_spill] sm:$0xff] }
 0x38e   :  { %3819 = vpow2.f32 %v3630_v52 }
 0x398   :  { %v3816_v59 = vpop.eup %3815 }
 0x399   :  { %v1852_v41 = vadd.f32 1.0, %v3816_v59 }
 0x39a   :  { %v3818_v24 = vpop.eup %3817 }
 0x39b   :  { %3821 = vrcp.f32 %v1852_v41  ;;  %v1858_v31 = vadd.f32 1.0, %v3818_v24  ;;  %v3820_v37 = vpop.eup %3819 }
 0x39c   :  { %3823 = vtanh.f32 %v1827_v9  ;;  %v1865_v10 = vadd.f32 1.0, %v3820_v37  ;;  %v1838_v9 = vrot.slane %v1830_v8, 2 }
 0x39d   :  { %3825 = vrcp.f32 %v1858_v31 }
 0x39e   :  { %3827 = vrcp.f32 %v1865_v10 }
 0x3a8   :  { %v3822_v60 = vpop.eup %3821 }
 0x3a9   :  { %v3824_v29 = vpop.eup %3823 }
 0x3aa   :  { %v3826_v62 = vpop.eup %3825  ;;  %v1888_v17 = vmul.f32 %v3824_v29, %v3822_v60 }
 0x3ab   :  { %v1887_v54 = vmul.f32 %v3826_v62, %v6628_v49  ;;  %v3828_v56 = vpop.eup %3827  ;;  %v1832_v49 = vld [vmem:[#allocation3 + $0x50] sm:$0xc] }
 0x3ad   :  { %v5285_v0 = vadd.f32 %v1888_v17, %v1887_v54  ;;  %v1840_v54 = vrot.slane %v1832_v49, 2  ;;  %v6632_v49 = vld [vmem:[#allocation96_spill] sm:$0xff] }
 0x3af   :  { %6629 = vst [vmem:[#allocation81_spill] sm:$0xff] %v5285_v0  ;;  %3829 = vtanh.f32 %v5285_v0 }
 0x3bc   :  { %v3830_v59 = vpop.eup %3829 }
 0x3bd   :  { %v1894_v1 = vmul.f32 %v3830_v59, %v3828_v56  ;;  %v1831_v59 = vld [vmem:[#allocation3 + $0x18] sm:$0xc] }
 0x3be   :  { %v1839_v50 = vrot.slane %v1831_v59, 2  ;;  %v6635_v59 = vld [vmem:[#allocation106_spill] sm:$0xff] }
 0x3c6   :  { %v1761_v52 = vpop.f32.mrf.mxu0  ;;  %v1802_v26 = vpop.f32.mrf.mxu1 }
 0x3c7   :  { %v1845_v38 = vadd.f32 %v1837_v23, %v1761_v52  ;;  %v1847_v23 = vadd.f32 %v1839_v50, %v1802_v26  ;;  %v6636_v50 = vld [vmem:[#allocation110_spill] sm:$0xff] }
 0x3c8   :  { %v1763_v41 = vpop.f32.mrf.mxu0  ;;  %v1804_v24 = vpop.f32.mrf.mxu1 }
 0x3c9   :  { %v3631_v31 = vmul.f32 -1.442695, %v1845_v38  ;;  %v1846_v37 = vadd.f32 %v1838_v9, %v1763_v41  ;;  %v1848_v56 = vadd.f32 %v1840_v54, %v1804_v24  ;;  %v6633_v54 = vld [vmem:[#allocation98_spill] sm:$0xff] }
 0x3ca   :  { %v1765_v60 = vpop.f32.mrf.mxu0  ;;  %v1806_v29 = vpop.f32.mrf.mxu1 }
 0x3cb   :  { %3831 = vpow2.f32 %v3631_v31  ;;  %v3632_v62 = vmul.f32 -1.442695, %v1846_v37  ;;  %v3633_v0 = vmul.f32 -1.442695, %v1848_v56  ;;  %v6634_v56 = vld [vmem:[#allocation104_spill] sm:$0xff] }
 0x3cc   :  { %v1766_v10 = vpop.f32.mrf.mxu0  ;;  %v1807_v17 = vpop.f32.mrf.mxu1 }
 0x3cd   :  { %3833 = vpow2.f32 %v3632_v62  ;;  %v5292_v17 = vpack.c.bf16 %v1894_v1, %v1894_v1  ;;  %v6631_v1 = vld [vmem:[#allocation94_spill] sm:$0xff] }
 0x3ce   :  { %3835 = vpow2.f32 %v3633_v0 }
 0x3d8   :  { %v3832_v27 = vpop.eup %3831 }
 0x3d9   :  { %v1871_v8 = vadd.f32 1.0, %v3832_v27 }
 0x3da   :  { %v3834_v52 = vpop.eup %3833 }
 0x3db   :  { %3837 = vrcp.f32 %v1871_v8  ;;  %v1877_v38 = vadd.f32 1.0, %v3834_v52  ;;  %v3836_v9 = vpop.eup %3835  ;;  %v6638_v8 = vld [vmem:[#allocation114_spill] sm:$0xff]  ;;  %v6639_v52 = vld [vmem:[#allocation128_spill] sm:$0xff] }
 0x3dc   :  { %3839 = vtanh.f32 %v1847_v23  ;;  %v1884_v60 = vadd.f32 1.0, %v3836_v9  ;;  %v6637_v23 = vld [vmem:[#allocation127_spill] sm:$0xff]  ;;  %v6641_v9 = vld [vmem:[#allocation129_spill] sm:$0xff] }
 0x3dd   :  { %3841 = vrcp.f32 %v1877_v38  ;;  %v6640_v38 = vld [vmem:[#allocation116_spill] sm:$0xff] }
 0x3de   :  { %3843 = vrcp.f32 %v1884_v60  ;;  %v6645_v60 = vld [vmem:[#allocation131_spill] sm:$0xff] }
 0x3e8   :  { %v3838_v41 = vpop.eup %3837 }
 0x3e9   :  { %v3840_v31 = vpop.eup %3839 }
 0x3ea   :  { %v3842_v37 = vpop.eup %3841  ;;  %v1891_v29 = vmul.f32 %v3840_v31, %v3838_v41  ;;  %v6642_v41 = vld [vmem:[#allocation118_spill] sm:$0xff] }
 0x3eb   :  { %v1890_v24 = vmul.f32 %v3842_v37, %v5147_v47  ;;  %v3844_v27 = vpop.eup %3843  ;;  %v6630_v47 = vld [vmem:[#allocation92_spill] sm:$0xff]  ;;  %v6643_v31 = vld [vmem:[#allocation130_spill] sm:$0xff] }
 0x3ec   :  { %v6644_v37 = vld [vmem:[#allocation120_spill] sm:$0xff] }
 0x3ed   :  { %v5289_v62 = vadd.f32 %v1891_v29, %v1890_v24  ;;  %v6646_v29 = vld [vmem:[#allocation122_spill] sm:$0xff]  ;;  %v6647_v24 = vld [vmem:[#allocation132_spill] sm:$0xff] }
 0x3ef   :  { %3845 = vtanh.f32 %v5289_v62 }
 0x3fc   :  { %v3846_v26 = vpop.eup %3845 }
 0x3fd   :  { %v1896_v0 = vmul.f32 %v3846_v26, %v3844_v27  ;;  %v6648_v27 = vld [vmem:[#allocation124_spill] sm:$0xff]  ;;  %v6649_v26 = vld [vmem:[#allocation133_spill] sm:$0xff] }
 0x3ff   :  { %v1906_v10 = vpack.c.bf16 %v1896_v0, %v1896_v0  ;;  %v6650_v0 = vld [vmem:[#allocation126_spill] sm:$0xff] }
 0x401   :  { %1939 = vmatprep.mubr.bf16.mxu0 %v1906_v10  ;;  %1980 = vmatprep.mubr.bf16.mxu1 %v1906_v10 }
 0x402   :  { %1940 = vmatmul.mubr.bf16.vlgmr.msra.gmra.mxu0 %v5292_v17  ;;  %1981 = vmatmul.mubr.bf16.vlgmr.msra.gmra.mxu1 %v5292_v17 }
 0x403   :  { %1990 = vmatpush1.bf16.msra.mxu0 %v6452_v3  ;;  %2031 = vmatpush1.bf16.msra.mxu1 %v6453_v43 }
 0x404   :  { %2021 = vmatprep.mubr.bf16.mxu0 %v1906_v10  ;;  %2062 = vmatprep.mubr.bf16.mxu1 %v1906_v10  ;;  %v6651_v10 = vld [vmem:[#allocation134_spill] sm:$0xff] }
 0x405   :  { %1991 = vmatprep.subr.bf16.mxu0 %v6454_v33  ;;  %2032 = vmatprep.subr.bf16.mxu1 %v6455_v25 }
 0x407   :  { %1992 = vmatpush1.bf16.msra.mxu0 %v6456_v48  ;;  %2033 = vmatpush1.bf16.msra.mxu1 %v6457_v18 }
 0x408   :  { %1993 = vmatprep.subr.bf16.mxu0 %v6458_v2  ;;  %2034 = vmatprep.subr.bf16.mxu1 %v6459_v36 }
 0x40b   :  { %1994 = vmatpush1.bf16.msra.mxu0 %v6460_v28  ;;  %2035 = vmatpush1.bf16.msra.mxu1 %v6540_v40 }
 0x40c   :  { %1995 = vmatprep.subr.bf16.mxu0 %v6541_v5  ;;  %2036 = vmatprep.subr.bf16.mxu1 %v6542_v63 }
 0x40f   :  { %1996 = vmatpush1.bf16.msra.mxu0 %v6543_v21  ;;  %2037 = vmatpush1.bf16.msra.mxu1 %v6544_v39 }
 0x410   :  { %1997 = vmatprep.subr.bf16.mxu0 %v6545_v45  ;;  %2038 = vmatprep.subr.bf16.mxu1 %v6546_v6 }
 0x413   :  { %1998 = vmatpush1.bf16.msra.mxu0 %v6547_v34  ;;  %2039 = vmatpush1.bf16.msra.mxu1 %v6548_v13 }
 0x414   :  { %1999 = vmatprep.subr.bf16.mxu0 %v6549_v44  ;;  %2040 = vmatprep.subr.bf16.mxu1 %v6550_v58 }
 0x417   :  { %2000 = vmatpush1.bf16.msra.mxu0 %v6551_v7  ;;  %2041 = vmatpush1.bf16.msra.mxu1 %v6552_v16 }
 0x418   :  { %2001 = vmatprep.subr.bf16.mxu0 %v6553_v55  ;;  %2042 = vmatprep.subr.bf16.mxu1 %v6554_v14 }
 0x41b   :  { %2002 = vmatpush1.bf16.msra.mxu0 %v6555_v53  ;;  %2043 = vmatpush1.bf16.msra.mxu1 %v6556_v15 }
 0x41c   :  { %2003 = vmatprep.subr.bf16.mxu0 %v6630_v47  ;;  %2044 = vmatprep.subr.bf16.mxu1 %v6557_v42 }
 0x41f   :  { %2004 = vmatpush1.bf16.msra.mxu0 %v6631_v1  ;;  %2045 = vmatpush1.bf16.msra.mxu1 %v6558_v4 }
 0x420   :  { %2005 = vmatprep.subr.bf16.mxu0 %v6632_v49  ;;  %2046 = vmatprep.subr.bf16.mxu1 %v6559_v19 }
 0x423   :  { %2006 = vmatpush2.bf16.msra.mxu0 %v6633_v54  ;;  %2047 = vmatpush2.bf16.msra.mxu1 %v6560_v32 }
 0x424   :  { %2007 = vmatprep.subr.bf16.mxu0 %v6486_v46  ;;  %2048 = vmatprep.subr.bf16.mxu1 %v6561_v61 }
 0x427   :  { %2008 = vmatpush2.bf16.msra.mxu0 %v6488_v22  ;;  %2049 = vmatpush2.bf16.msra.mxu1 %v6562_v57 }
 0x428   :  { %2009 = vmatprep.subr.bf16.mxu0 %v6634_v56  ;;  %2050 = vmatprep.subr.bf16.mxu1 %v6563_v11 }
 0x42b   :  { %2010 = vmatpush2.bf16.msra.mxu0 %v6635_v59  ;;  %2051 = vmatpush2.bf16.msra.mxu1 %v6564_v12 }
 0x42c   :  { %2011 = vmatprep.subr.bf16.mxu0 %v6491_v20  ;;  %2052 = vmatprep.subr.bf16.mxu1 %v6565_v35  ;;  %v2073_v35 = vld [vmem:[#allocation3 + $0x78] sm:$0xc0] }
 0x42f   :  { %2012 = vmatpush2.bf16.msra.mxu0 %v6636_v50  ;;  %2053 = vmatpush2.bf16.msra.mxu1 %v4870_v51 }
 0x430   :  { %2013 = vmatprep.subr.bf16.mxu0 %v6493_v30  ;;  %2054 = vmatprep.subr.bf16.mxu1 %v6637_v23 }
 0x433   :  { %2014 = vmatpush2.bf16.msra.mxu0 %v6638_v8  ;;  %2055 = vmatpush2.bf16.msra.mxu1 %v6639_v52 }
 0x434   :  { %2015 = vmatprep.subr.bf16.mxu0 %v6640_v38  ;;  %2056 = vmatprep.subr.bf16.mxu1 %v6641_v9  ;;  %v6652_v9 = vld [vmem:[#allocation7_spill] sm:$0xff] }
 0x437   :  { %2016 = vmatpush2.bf16.msra.mxu0 %v6642_v41  ;;  %2057 = vmatpush2.bf16.msra.mxu1 %v6643_v31  ;;  %v6653_v41 = vld [vmem:[#allocation15_spill] sm:$0xff] }
 0x438   :  { %2017 = vmatprep.subr.bf16.mxu0 %v6644_v37  ;;  %2058 = vmatprep.subr.bf16.mxu1 %v6645_v60  ;;  %v6654_v60 = vld [vmem:[#allocation8_spill] sm:$0xff]  ;;  %v6663_v37 = vld [vmem:[#allocation25_spill] sm:$0xff] }
 0x43b   :  { %2018 = vmatpush2.bf16.msra.mxu0 %v6646_v29  ;;  %2059 = vmatpush2.bf16.msra.mxu1 %v6647_v24  ;;  %v6655_v29 = vld [vmem:[#allocation17_spill] sm:$0xff] }
 0x43c   :  { %2019 = vmatprep.subr.bf16.mxu0 %v6648_v27  ;;  %2060 = vmatprep.subr.bf16.mxu1 %v6649_v26  ;;  %v6656_v24 = vld [vmem:[#allocation9_spill] sm:$0xff]  ;;  %v6657_v27 = vld [vmem:[#allocation19_spill] sm:$0xff]  ;;  %v6658_v26 = vld [vmem:[#allocation10_spill] sm:$0xff] }
 0x43f   :  { %2020 = vmatpush2.bf16.msra.mxu0 %v6650_v0  ;;  %2061 = vmatpush2.bf16.msra.mxu1 %v6651_v10  ;;  %v6659_v0 = vld [vmem:[#allocation21_spill] sm:$0xff]  ;;  %v6660_v10 = vld [vmem:[#allocation11_spill] sm:$0xff] }
 0x440   :  { %2154 = vmatprep.subr.bf16.mxu0 %v6652_v9  ;;  %2195 = vmatprep.subr.bf16.mxu1 %v6653_v41  ;;  %v6661_v9 = vld [vmem:[#allocation23_spill] sm:$0xff]  ;;  %v6662_v41 = vld [vmem:[#allocation12_spill] sm:$0xff] }
 0x442   :  { %2022 = vmatmul.mubr.bf16.vlgmr.msra.gmra.mxu0 %v5292_v17  ;;  %2063 = vmatmul.mubr.bf16.vlgmr.msra.gmra.mxu1 %v5292_v17  ;;  %v6664_v17 = vld [vmem:[#allocation13_spill] sm:$0xff] }
 0x443   :  { %2155 = vmatpush1.bf16.msra.mxu0 %v6654_v60  ;;  %2196 = vmatpush1.bf16.msra.mxu1 %v6655_v29  ;;  %v6665_v60 = vld [vmem:[#allocation27_spill] sm:$0xff]  ;;  %v6666_v29 = vld [vmem:[#allocation14_spill] sm:$0xff] }
 0x444   :  { %2156 = vmatprep.subr.bf16.mxu0 %v6656_v24  ;;  %2197 = vmatprep.subr.bf16.mxu1 %v6657_v27  ;;  %v6667_v24 = vld [vmem:[#allocation29_spill] sm:$0xff]  ;;  %v6668_v27 = vld [vmem:[#allocation16_spill] sm:$0xff] }
 0x447   :  { %2157 = vmatpush1.bf16.msra.mxu0 %v6658_v26  ;;  %2198 = vmatpush1.bf16.msra.mxu1 %v6659_v0  ;;  %v6669_v26 = vld [vmem:[#allocation31_spill] sm:$0xff]  ;;  %v6670_v0 = vld [vmem:[#allocation18_spill] sm:$0xff] }
 0x448   :  { %2158 = vmatprep.subr.bf16.mxu0 %v6660_v10  ;;  %2199 = vmatprep.subr.bf16.mxu1 %v6661_v9  ;;  %v6671_v10 = vld [vmem:[#allocation33_spill] sm:$0xff]  ;;  %v6672_v9 = vld [vmem:[#allocation20_spill] sm:$0xff] }
 0x44b   :  { %2159 = vmatpush1.bf16.msra.mxu0 %v6662_v41  ;;  %2200 = vmatpush1.bf16.msra.mxu1 %v6663_v37  ;;  %v6673_v41 = vld [vmem:[#allocation35_spill] sm:$0xff]  ;;  %v6674_v37 = vld [vmem:[#allocation22_spill] sm:$0xff] }
 0x44c   :  { %2160 = vmatprep.subr.bf16.mxu0 %v6664_v17  ;;  %2201 = vmatprep.subr.bf16.mxu1 %v6665_v60  ;;  %v6675_v17 = vld [vmem:[#allocation37_spill] sm:$0xff]  ;;  %v6676_v60 = vld [vmem:[#allocation24_spill] sm:$0xff] }
 0x44f   :  { %2161 = vmatpush1.bf16.msra.mxu0 %v6666_v29  ;;  %2202 = vmatpush1.bf16.msra.mxu1 %v6667_v24  ;;  %v6677_v29 = vld [vmem:[#allocation39_spill] sm:$0xff]  ;;  %v6678_v24 = vld [vmem:[#allocation26_spill] sm:$0xff] }
 0x450   :  { %2162 = vmatprep.subr.bf16.mxu0 %v6668_v27  ;;  %2203 = vmatprep.subr.bf16.mxu1 %v6669_v26  ;;  %v6679_v27 = vld [vmem:[#allocation41_spill] sm:$0xff]  ;;  %v6680_v26 = vld [vmem:[#allocation28_spill] sm:$0xff] }
 0x453   :  { %2163 = vmatpush1.bf16.msra.mxu0 %v6670_v0  ;;  %2204 = vmatpush1.bf16.msra.mxu1 %v6671_v10  ;;  %v6681_v0 = vld [vmem:[#allocation43_spill] sm:$0xff]  ;;  %v6682_v10 = vld [vmem:[#allocation30_spill] sm:$0xff] }
 0x454   :  { %2164 = vmatprep.subr.bf16.mxu0 %v6672_v9  ;;  %2205 = vmatprep.subr.bf16.mxu1 %v6673_v41  ;;  %v6683_v9 = vld [vmem:[#allocation45_spill] sm:$0xff]  ;;  %v6684_v41 = vld [vmem:[#allocation32_spill] sm:$0xff] }
 0x457   :  { %2165 = vmatpush1.bf16.msra.mxu0 %v6674_v37  ;;  %2206 = vmatpush1.bf16.msra.mxu1 %v6675_v17  ;;  %v6685_v37 = vld [vmem:[#allocation47_spill] sm:$0xff]  ;;  %v6686_v17 = vld [vmem:[#allocation34_spill] sm:$0xff] }
 0x458   :  { %2166 = vmatprep.subr.bf16.mxu0 %v6676_v60  ;;  %2207 = vmatprep.subr.bf16.mxu1 %v6677_v29  ;;  %v6687_v60 = vld [vmem:[#allocation49_spill] sm:$0xff]  ;;  %v6688_v29 = vld [vmem:[#allocation36_spill] sm:$0xff] }
 0x45b   :  { %2167 = vmatpush1.bf16.msra.mxu0 %v6678_v24  ;;  %2208 = vmatpush1.bf16.msra.mxu1 %v6679_v27  ;;  %v6689_v24 = vld [vmem:[#allocation51_spill] sm:$0xff]  ;;  %v6690_v27 = vld [vmem:[#allocation38_spill] sm:$0xff] }
 0x45c   :  { %2168 = vmatprep.subr.bf16.mxu0 %v6680_v26  ;;  %2209 = vmatprep.subr.bf16.mxu1 %v6681_v0  ;;  %v6691_v26 = vld [vmem:[#allocation53_spill] sm:$0xff]  ;;  %v6692_v0 = vld [vmem:[#allocation40_spill] sm:$0xff] }
 0x45f   :  { %2169 = vmatpush1.bf16.msra.mxu0 %v6682_v10  ;;  %2210 = vmatpush1.bf16.msra.mxu1 %v6683_v9  ;;  %v6693_v10 = vld [vmem:[#allocation55_spill] sm:$0xff]  ;;  %v6694_v9 = vld [vmem:[#allocation42_spill] sm:$0xff] }
 0x460   :  { %2170 = vmatprep.subr.bf16.mxu0 %v6684_v41  ;;  %2211 = vmatprep.subr.bf16.mxu1 %v6685_v37  ;;  %v6695_v41 = vld [vmem:[#allocation57_spill] sm:$0xff]  ;;  %v6696_v37 = vld [vmem:[#allocation44_spill] sm:$0xff] }
 0x463   :  { %2171 = vmatpush2.bf16.msra.mxu0 %v6686_v17  ;;  %2212 = vmatpush2.bf16.msra.mxu1 %v6687_v60  ;;  %v6697_v17 = vld [vmem:[#allocation59_spill] sm:$0xff]  ;;  %v6698_v60 = vld [vmem:[#allocation46_spill] sm:$0xff] }
 0x464   :  { %2172 = vmatprep.subr.bf16.mxu0 %v6688_v29  ;;  %2213 = vmatprep.subr.bf16.mxu1 %v6689_v24  ;;  %v6699_v29 = vld [vmem:[#allocation61_spill] sm:$0xff]  ;;  %v6700_v24 = vld [vmem:[#allocation48_spill] sm:$0xff] }
 0x467   :  { %2173 = vmatpush2.bf16.msra.mxu0 %v6690_v27  ;;  %2214 = vmatpush2.bf16.msra.mxu1 %v6691_v26  ;;  %v6701_v27 = vld [vmem:[#allocation63_spill] sm:$0xff]  ;;  %v6702_v26 = vld [vmem:[#allocation50_spill] sm:$0xff] }
 0x468   :  { %2174 = vmatprep.subr.bf16.mxu0 %v6692_v0  ;;  %2215 = vmatprep.subr.bf16.mxu1 %v6693_v10  ;;  %v6703_v0 = vld [vmem:[#allocation65_spill] sm:$0xff]  ;;  %v6704_v10 = vld [vmem:[#allocation52_spill] sm:$0xff] }
 0x46b   :  { %2175 = vmatpush2.bf16.msra.mxu0 %v6694_v9  ;;  %2216 = vmatpush2.bf16.msra.mxu1 %v6695_v41  ;;  %v6705_v9 = vld [vmem:[#allocation67_spill] sm:$0xff]  ;;  %v6706_v41 = vld [vmem:[#allocation54_spill] sm:$0xff] }
 0x46c   :  { %2176 = vmatprep.subr.bf16.mxu0 %v6696_v37  ;;  %2217 = vmatprep.subr.bf16.mxu1 %v6697_v17  ;;  %v6707_v37 = vld [vmem:[#allocation69_spill] sm:$0xff]  ;;  %v6708_v17 = vld [vmem:[#allocation56_spill] sm:$0xff] }
 0x46f   :  { %2177 = vmatpush2.bf16.msra.mxu0 %v6698_v60  ;;  %2218 = vmatpush2.bf16.msra.mxu1 %v6699_v29  ;;  %v6709_v60 = vld [vmem:[#allocation71_spill] sm:$0xff]  ;;  %v6710_v29 = vld [vmem:[#allocation58_spill] sm:$0xff] }
 0x470   :  { %2178 = vmatprep.subr.bf16.mxu0 %v6700_v24  ;;  %2219 = vmatprep.subr.bf16.mxu1 %v6701_v27  ;;  %v6711_v24 = vld [vmem:[#allocation73_spill] sm:$0xff]  ;;  %v6712_v27 = vld [vmem:[#allocation60_spill] sm:$0xff] }
 0x473   :  { %2179 = vmatpush2.bf16.msra.mxu0 %v6702_v26  ;;  %2220 = vmatpush2.bf16.msra.mxu1 %v6703_v0  ;;  %v6713_v26 = vld [vmem:[#allocation75_spill] sm:$0xff]  ;;  %v6714_v0 = vld [vmem:[#allocation62_spill] sm:$0xff] }
 0x474   :  { %2180 = vmatprep.subr.bf16.mxu0 %v6704_v10  ;;  %2221 = vmatprep.subr.bf16.mxu1 %v6705_v9  ;;  %v6715_v10 = vld [vmem:[#allocation77_spill] sm:$0xff]  ;;  %v6716_v9 = vld [vmem:[#allocation64_spill] sm:$0xff] }
 0x477   :  { %2181 = vmatpush2.bf16.msra.mxu0 %v6706_v41  ;;  %2222 = vmatpush2.bf16.msra.mxu1 %v6707_v37  ;;  %v6717_v41 = vld [vmem:[#allocation79_spill] sm:$0xff] }
 0x478   :  { %2182 = vmatprep.subr.bf16.mxu0 %v6708_v17  ;;  %2223 = vmatprep.subr.bf16.mxu1 %v6709_v60  ;;  %v2071_v37 = vld [vmem:[#allocation3] sm:$0xc0]  ;;  %v2072_v17 = vld [vmem:[#allocation3 + $0x38] sm:$0xc0] }
 0x479   :  { %v2079_v31 = vrot.slane %v2071_v37, 6  ;;  %v2080_v52 = vrot.slane %v2072_v17, 6  ;;  %v2081_v37 = vrot.slane %v2073_v35, 6 }
 0x47b   :  { %2183 = vmatpush2.bf16.msra.mxu0 %v6710_v29  ;;  %2224 = vmatpush2.bf16.msra.mxu1 %v6711_v24 }
 0x47c   :  { %2184 = vmatprep.subr.bf16.mxu0 %v6712_v27  ;;  %2225 = vmatprep.subr.bf16.mxu1 %v6713_v26 }
 0x47f   :  { %2185 = vmatpush2.bf16.msra.mxu0 %v6714_v0  ;;  %2226 = vmatpush2.bf16.msra.mxu1 %v6715_v10 }
 0x480   :  { %2236 = vmatprep.subr.bf16.mxu0 %v6716_v9  ;;  %2277 = vmatprep.subr.bf16.mxu1 %v6717_v41  ;;  %v2074_v9 = vld [vmem:[#allocation3 + $0x58] sm:$0xc0] }
 0x481   :  { %v2082_v41 = vrot.slane %v2074_v9, 6  ;;  %v6718_v9 = vld [vmem:[#allocation81_spill] sm:$0xff] }
 0x4c2   :  { %v1941_v60 = vpop.f32.mrf.mxu0  ;;  %v1982_v38 = vpop.f32.mrf.mxu1 }
 0x4c3   :  { %v2087_v29 = vadd.f32 %v2079_v31, %v1941_v60  ;;  %v2089_v31 = vadd.f32 %v2081_v37, %v1982_v38  ;;  %v2091_v38 = vld [vmem:[#allocation3 + $0x60] sm:$0x3]  ;;  %v2092_v37 = vld [vmem:[#allocation3 + $0x48] sm:$0x3] }
 0x4c4   :  { %v1943_v24 = vpop.f32.mrf.mxu0  ;;  %v1984_v8 = vpop.f32.mrf.mxu1 }
 0x4c5   :  { %v3634_v27 = vmul.f32 -1.442695, %v2087_v29  ;;  %v2088_v23 = vadd.f32 %v2080_v52, %v1943_v24  ;;  %v2090_v50 = vadd.f32 %v2082_v41, %v1984_v8 }
 0x4c6   :  { %v1945_v26 = vpop.f32.mrf.mxu0  ;;  %v1986_v30 = vpop.f32.mrf.mxu1 }
 0x4c7   :  { %3847 = vpow2.f32 %v3634_v27  ;;  %v3635_v0 = vmul.f32 -1.442695, %v2088_v23  ;;  %v3636_v20 = vmul.f32 -1.442695, %v2090_v50 }
 0x4c8   :  { %v1946_v10 = vpop.f32.mrf.mxu0  ;;  %v1987_v51 = vpop.f32.mrf.mxu1 }
 0x4c9   :  { %3849 = vpow2.f32 %v3635_v0 }
 0x4ca   :  { %3851 = vpow2.f32 %v3636_v20 }
 0x4d4   :  { %v3848_v12 = vpop.eup %3847 }
 0x4d5   :  { %v2102_v60 = vadd.f32 1.0, %v3848_v12 }
 0x4d6   :  { %v3850_v17 = vpop.eup %3849 }
 0x4d7   :  { %3853 = vrcp.f32 %v2102_v60  ;;  %v2108_v52 = vadd.f32 1.0, %v3850_v17  ;;  %v3852_v30 = vpop.eup %3851 }
 0x4d8   :  { %3855 = vtanh.f32 %v2089_v31  ;;  %v2115_v24 = vadd.f32 1.0, %v3852_v30 }
 0x4d9   :  { %3857 = vrcp.f32 %v2108_v52 }
 0x4da   :  { %3859 = vrcp.f32 %v2115_v24  ;;  %v2094_v24 = vld [vmem:[#allocation3 + $0x50] sm:$0x3] }
 0x4e4   :  { %v3854_v23 = vpop.eup %3853 }
 0x4e5   :  { %v3856_v29 = vpop.eup %3855 }
 0x4e6   :  { %v3858_v51 = vpop.eup %3857  ;;  %v2138_v27 = vmul.f32 %v3856_v29, %v3854_v23 }
 0x4e7   :  { %v2137_v8 = vmul.f32 %v3858_v51, %v6718_v9  ;;  %v3860_v35 = vpop.eup %3859 }
 0x4e9   :  { %v5427_v41 = vadd.f32 %v2138_v27, %v2137_v8  ;;  %v2093_v8 = vld [vmem:[#allocation3 + $0x18] sm:$0x3] }
 0x4eb   :  { %6719 = vst [vmem:[#allocation68_spill] sm:$0xff] %v5427_v41  ;;  %3861 = vtanh.f32 %v5427_v41 }
 0x4f8   :  { %v3862_v12 = vpop.eup %3861 }
 0x4f9   :  { %v2144_v20 = vmul.f32 %v3862_v12, %v3860_v35 }
 0x502   :  { %v2023_v50 = vpop.f32.mrf.mxu0  ;;  %v2064_v26 = vpop.f32.mrf.mxu1 }
 0x503   :  { %v2095_v0 = vadd.f32 %v2091_v38, %v2023_v50  ;;  %v2097_v12 = vadd.f32 %v2093_v8, %v2064_v26  ;;  %v6725_v8 = vld [vmem:[#allocation112_spill] sm:$0xff] }
 0x504   :  { %v2025_v10 = vpop.f32.mrf.mxu0  ;;  %v2066_v31 = vpop.f32.mrf.mxu1 }
 0x505   :  { %v3637_v60 = vmul.f32 -1.442695, %v2095_v0  ;;  %v2096_v17 = vadd.f32 %v2092_v37, %v2025_v10  ;;  %v2098_v27 = vadd.f32 %v2094_v24, %v2066_v31  ;;  %v6722_v24 = vld [vmem:[#allocation123_spill] sm:$0xff] }
 0x506   :  { %v2027_v52 = vpop.f32.mrf.mxu0  ;;  %v2068_v30 = vpop.f32.mrf.mxu1 }
 0x507   :  { %3863 = vpow2.f32 %v3637_v60  ;;  %v3638_v23 = vmul.f32 -1.442695, %v2096_v17  ;;  %v3639_v9 = vmul.f32 -1.442695, %v2098_v27  ;;  %v6723_v27 = vld [vmem:[#allocation110_spill] sm:$0xff] }
 0x508   :  { %v2028_v29 = vpop.f32.mrf.mxu0  ;;  %v2069_v51 = vpop.f32.mrf.mxu1 }
 0x509   :  { %3865 = vpow2.f32 %v3638_v23  ;;  %v5434_v51 = vpack.c.bf16 %v2144_v20, %v2144_v20  ;;  %v6721_v20 = vld [vmem:[#allocation108_spill] sm:$0xff] }
 0x50a   :  { %3867 = vpow2.f32 %v3639_v9  ;;  %v6724_v9 = vld [vmem:[#allocation125_spill] sm:$0xff] }
 0x514   :  { %v3864_v35 = vpop.eup %3863 }
 0x515   :  { %v2121_v41 = vadd.f32 1.0, %v3864_v35  ;;  %v6726_v35 = vld [vmem:[#allocation127_spill] sm:$0xff] }
 0x516   :  { %v3866_v50 = vpop.eup %3865 }
 0x517   :  { %3869 = vrcp.f32 %v2121_v41  ;;  %v2127_v38 = vadd.f32 1.0, %v3866_v50  ;;  %v3868_v0 = vpop.eup %3867  ;;  %v6728_v50 = vld [vmem:[#allocation128_spill] sm:$0xff] }
 0x518   :  { %3871 = vtanh.f32 %v2097_v12  ;;  %v2134_v17 = vadd.f32 1.0, %v3868_v0  ;;  %v6727_v12 = vld [vmem:[#allocation114_spill] sm:$0xff]  ;;  %v6730_v0 = vld [vmem:[#allocation129_spill] sm:$0xff] }
 0x519   :  { %3873 = vrcp.f32 %v2127_v38  ;;  %v6729_v38 = vld [vmem:[#allocation116_spill] sm:$0xff] }
 0x51a   :  { %3875 = vrcp.f32 %v2134_v17  ;;  %v6734_v17 = vld [vmem:[#allocation131_spill] sm:$0xff] }
 0x524   :  { %v3870_v10 = vpop.eup %3869 }
 0x525   :  { %v3872_v37 = vpop.eup %3871 }
 0x526   :  { %v3874_v60 = vpop.eup %3873  ;;  %v2141_v52 = vmul.f32 %v3872_v37, %v3870_v10  ;;  %v6731_v10 = vld [vmem:[#allocation118_spill] sm:$0xff] }
 0x527   :  { %v2140_v30 = vmul.f32 %v3874_v60, %v5289_v62  ;;  %v3876_v26 = vpop.eup %3875  ;;  %v6720_v62 = vld [vmem:[#allocation121_spill] sm:$0xff]  ;;  %v6732_v37 = vld [vmem:[#allocation130_spill] sm:$0xff]  ;;  %v6733_v60 = vld [vmem:[#allocation120_spill] sm:$0xff] }
 0x529   :  { %v5431_v31 = vadd.f32 %v2141_v52, %v2140_v30  ;;  %v6735_v52 = vld [vmem:[#allocation122_spill] sm:$0xff]  ;;  %v6736_v30 = vld [vmem:[#allocation132_spill] sm:$0xff] }
 0x52b   :  { %3877 = vtanh.f32 %v5431_v31 }
 0x538   :  { %v3878_v23 = vpop.eup %3877 }
 0x539   :  { %v2146_v29 = vmul.f32 %v3878_v23, %v3876_v26  ;;  %v6737_v26 = vld [vmem:[#allocation124_spill] sm:$0xff]  ;;  %v6738_v23 = vld [vmem:[#allocation133_spill] sm:$0xff] }
 0x53b   :  { %v2153_v41 = vpack.c.bf16 %v2146_v29, %v2146_v29  ;;  %v6739_v29 = vld [vmem:[#allocation126_spill] sm:$0xff] }
 0x53d   :  { %2186 = vmatprep.mubr.bf16.mxu0 %v2153_v41  ;;  %2227 = vmatprep.mubr.bf16.mxu1 %v2153_v41 }
 0x53e   :  { %2187 = vmatmul.mubr.bf16.vlgmr.msra.gmra.mxu0 %v5434_v51  ;;  %2228 = vmatmul.mubr.bf16.vlgmr.msra.gmra.mxu1 %v5434_v51 }
 0x53f   :  { %2237 = vmatpush1.bf16.msra.mxu0 %v6452_v3  ;;  %2278 = vmatpush1.bf16.msra.mxu1 %v6453_v43 }
 0x540   :  { %2268 = vmatprep.mubr.bf16.mxu0 %v2153_v41  ;;  %2309 = vmatprep.mubr.bf16.mxu1 %v2153_v41  ;;  %v6740_v41 = vld [vmem:[#allocation134_spill] sm:$0xff] }
 0x541   :  { %2238 = vmatprep.subr.bf16.mxu0 %v6454_v33  ;;  %2279 = vmatprep.subr.bf16.mxu1 %v6455_v25 }
 0x543   :  { %2239 = vmatpush1.bf16.msra.mxu0 %v6456_v48  ;;  %2280 = vmatpush1.bf16.msra.mxu1 %v6457_v18 }
 0x544   :  { %2240 = vmatprep.subr.bf16.mxu0 %v6458_v2  ;;  %2281 = vmatprep.subr.bf16.mxu1 %v6459_v36 }
 0x547   :  { %2241 = vmatpush1.bf16.msra.mxu0 %v6460_v28  ;;  %2282 = vmatpush1.bf16.msra.mxu1 %v6540_v40 }
 0x548   :  { %2242 = vmatprep.subr.bf16.mxu0 %v6541_v5  ;;  %2283 = vmatprep.subr.bf16.mxu1 %v6542_v63 }
 0x54b   :  { %2243 = vmatpush1.bf16.msra.mxu0 %v6543_v21  ;;  %2284 = vmatpush1.bf16.msra.mxu1 %v6544_v39 }
 0x54c   :  { %2244 = vmatprep.subr.bf16.mxu0 %v6545_v45  ;;  %2285 = vmatprep.subr.bf16.mxu1 %v6546_v6 }
 0x54f   :  { %2245 = vmatpush1.bf16.msra.mxu0 %v6547_v34  ;;  %2286 = vmatpush1.bf16.msra.mxu1 %v6548_v13 }
 0x550   :  { %2246 = vmatprep.subr.bf16.mxu0 %v6549_v44  ;;  %2287 = vmatprep.subr.bf16.mxu1 %v6550_v58 }
 0x553   :  { %2247 = vmatpush1.bf16.msra.mxu0 %v6551_v7  ;;  %2288 = vmatpush1.bf16.msra.mxu1 %v6552_v16 }
 0x554   :  { %2248 = vmatprep.subr.bf16.mxu0 %v6553_v55  ;;  %2289 = vmatprep.subr.bf16.mxu1 %v6554_v14 }
 0x557   :  { %2249 = vmatpush1.bf16.msra.mxu0 %v6555_v53  ;;  %2290 = vmatpush1.bf16.msra.mxu1 %v6556_v15 }
 0x558   :  { %2250 = vmatprep.subr.bf16.mxu0 %v6630_v47  ;;  %2291 = vmatprep.subr.bf16.mxu1 %v6557_v42 }
 0x55b   :  { %2251 = vmatpush1.bf16.msra.mxu0 %v6631_v1  ;;  %2292 = vmatpush1.bf16.msra.mxu1 %v6558_v4 }
 0x55c   :  { %2252 = vmatprep.subr.bf16.mxu0 %v6632_v49  ;;  %2293 = vmatprep.subr.bf16.mxu1 %v6559_v19 }
 0x55f   :  { %2253 = vmatpush2.bf16.msra.mxu0 %v6633_v54  ;;  %2294 = vmatpush2.bf16.msra.mxu1 %v6560_v32 }
 0x560   :  { %2254 = vmatprep.subr.bf16.mxu0 %v6486_v46  ;;  %2295 = vmatprep.subr.bf16.mxu1 %v6561_v61 }
 0x563   :  { %2255 = vmatpush2.bf16.msra.mxu0 %v6488_v22  ;;  %2296 = vmatpush2.bf16.msra.mxu1 %v6562_v57 }
 0x564   :  { %2256 = vmatprep.subr.bf16.mxu0 %v6634_v56  ;;  %2297 = vmatprep.subr.bf16.mxu1 %v6563_v11 }
 0x567   :  { %2257 = vmatpush2.bf16.msra.mxu0 %v6635_v59  ;;  %2298 = vmatpush2.bf16.msra.mxu1 %v6720_v62 }
 0x568   :  { %2258 = vmatprep.subr.bf16.mxu0 %v6721_v20  ;;  %2299 = vmatprep.subr.bf16.mxu1 %v6722_v24 }
 0x56b   :  { %2259 = vmatpush2.bf16.msra.mxu0 %v6723_v27  ;;  %2300 = vmatpush2.bf16.msra.mxu1 %v6724_v9 }
 0x56c   :  { %2260 = vmatprep.subr.bf16.mxu0 %v6725_v8  ;;  %2301 = vmatprep.subr.bf16.mxu1 %v6726_v35 }
 0x56f   :  { %2261 = vmatpush2.bf16.msra.mxu0 %v6727_v12  ;;  %2302 = vmatpush2.bf16.msra.mxu1 %v6728_v50 }
 0x570   :  { %2262 = vmatprep.subr.bf16.mxu0 %v6729_v38  ;;  %2303 = vmatprep.subr.bf16.mxu1 %v6730_v0  ;;  %v6741_v0 = vld [vmem:[#allocation7_spill] sm:$0xff] }
 0x573   :  { %2263 = vmatpush2.bf16.msra.mxu0 %v6731_v10  ;;  %2304 = vmatpush2.bf16.msra.mxu1 %v6732_v37  ;;  %v6742_v10 = vld [vmem:[#allocation15_spill] sm:$0xff] }
 0x574   :  { %2264 = vmatprep.subr.bf16.mxu0 %v6733_v60  ;;  %2305 = vmatprep.subr.bf16.mxu1 %v6734_v17  ;;  %v6743_v17 = vld [vmem:[#allocation8_spill] sm:$0xff]  ;;  %v6752_v60 = vld [vmem:[#allocation25_spill] sm:$0xff] }
 0x577   :  { %2265 = vmatpush2.bf16.msra.mxu0 %v6735_v52  ;;  %2306 = vmatpush2.bf16.msra.mxu1 %v6736_v30  ;;  %v6744_v52 = vld [vmem:[#allocation17_spill] sm:$0xff] }
 0x578   :  { %2266 = vmatprep.subr.bf16.mxu0 %v6737_v26  ;;  %2307 = vmatprep.subr.bf16.mxu1 %v6738_v23  ;;  %v6745_v30 = vld [vmem:[#allocation9_spill] sm:$0xff]  ;;  %v6746_v26 = vld [vmem:[#allocation19_spill] sm:$0xff]  ;;  %v6747_v23 = vld [vmem:[#allocation10_spill] sm:$0xff] }
 0x57b   :  { %2267 = vmatpush2.bf16.msra.mxu0 %v6739_v29  ;;  %2308 = vmatpush2.bf16.msra.mxu1 %v6740_v41  ;;  %v6748_v29 = vld [vmem:[#allocation21_spill] sm:$0xff]  ;;  %v6749_v41 = vld [vmem:[#allocation11_spill] sm:$0xff] }
 0x57c   :  { %2401 = vmatprep.subr.bf16.mxu0 %v6741_v0  ;;  %2442 = vmatprep.subr.bf16.mxu1 %v6742_v10  ;;  %v6750_v0 = vld [vmem:[#allocation23_spill] sm:$0xff]  ;;  %v6751_v10 = vld [vmem:[#allocation12_spill] sm:$0xff] }
 0x57e   :  { %2269 = vmatmul.mubr.bf16.vlgmr.msra.gmra.mxu0 %v5434_v51  ;;  %2310 = vmatmul.mubr.bf16.vlgmr.msra.gmra.mxu1 %v5434_v51  ;;  %v6753_v51 = vld [vmem:[#allocation13_spill] sm:$0xff] }
 0x57f   :  { %2402 = vmatpush1.bf16.msra.mxu0 %v6743_v17  ;;  %2443 = vmatpush1.bf16.msra.mxu1 %v6744_v52  ;;  %v6754_v17 = vld [vmem:[#allocation27_spill] sm:$0xff]  ;;  %v6755_v52 = vld [vmem:[#allocation14_spill] sm:$0xff] }
 0x580   :  { %2403 = vmatprep.subr.bf16.mxu0 %v6745_v30  ;;  %2444 = vmatprep.subr.bf16.mxu1 %v6746_v26  ;;  %v6756_v30 = vld [vmem:[#allocation29_spill] sm:$0xff]  ;;  %v6757_v26 = vld [vmem:[#allocation16_spill] sm:$0xff] }
 0x583   :  { %2404 = vmatpush1.bf16.msra.mxu0 %v6747_v23  ;;  %2445 = vmatpush1.bf16.msra.mxu1 %v6748_v29  ;;  %v6758_v23 = vld [vmem:[#allocation31_spill] sm:$0xff]  ;;  %v6759_v29 = vld [vmem:[#allocation18_spill] sm:$0xff] }
 0x584   :  { %2405 = vmatprep.subr.bf16.mxu0 %v6749_v41  ;;  %2446 = vmatprep.subr.bf16.mxu1 %v6750_v0  ;;  %v6760_v41 = vld [vmem:[#allocation33_spill] sm:$0xff]  ;;  %v6761_v0 = vld [vmem:[#allocation20_spill] sm:$0xff] }
 0x587   :  { %2406 = vmatpush1.bf16.msra.mxu0 %v6751_v10  ;;  %2447 = vmatpush1.bf16.msra.mxu1 %v6752_v60  ;;  %v6762_v10 = vld [vmem:[#allocation35_spill] sm:$0xff]  ;;  %v6763_v60 = vld [vmem:[#allocation22_spill] sm:$0xff] }
 0x588   :  { %2407 = vmatprep.subr.bf16.mxu0 %v6753_v51  ;;  %2448 = vmatprep.subr.bf16.mxu1 %v6754_v17  ;;  %v6764_v51 = vld [vmem:[#allocation37_spill] sm:$0xff]  ;;  %v6765_v17 = vld [vmem:[#allocation24_spill] sm:$0xff] }
 0x58b   :  { %2408 = vmatpush1.bf16.msra.mxu0 %v6755_v52  ;;  %2449 = vmatpush1.bf16.msra.mxu1 %v6756_v30  ;;  %v6766_v52 = vld [vmem:[#allocation39_spill] sm:$0xff]  ;;  %v6767_v30 = vld [vmem:[#allocation26_spill] sm:$0xff] }
 0x58c   :  { %2409 = vmatprep.subr.bf16.mxu0 %v6757_v26  ;;  %2450 = vmatprep.subr.bf16.mxu1 %v6758_v23  ;;  %v6768_v26 = vld [vmem:[#allocation41_spill] sm:$0xff]  ;;  %v6769_v23 = vld [vmem:[#allocation28_spill] sm:$0xff] }
 0x58f   :  { %2410 = vmatpush1.bf16.msra.mxu0 %v6759_v29  ;;  %2451 = vmatpush1.bf16.msra.mxu1 %v6760_v41  ;;  %v6770_v29 = vld [vmem:[#allocation43_spill] sm:$0xff]  ;;  %v6771_v41 = vld [vmem:[#allocation30_spill] sm:$0xff] }
 0x590   :  { %2411 = vmatprep.subr.bf16.mxu0 %v6761_v0  ;;  %2452 = vmatprep.subr.bf16.mxu1 %v6762_v10  ;;  %v6772_v0 = vld [vmem:[#allocation45_spill] sm:$0xff]  ;;  %v6773_v10 = vld [vmem:[#allocation32_spill] sm:$0xff] }
 0x593   :  { %2412 = vmatpush1.bf16.msra.mxu0 %v6763_v60  ;;  %2453 = vmatpush1.bf16.msra.mxu1 %v6764_v51  ;;  %v6774_v60 = vld [vmem:[#allocation47_spill] sm:$0xff]  ;;  %v6775_v51 = vld [vmem:[#allocation34_spill] sm:$0xff] }
 0x594   :  { %2413 = vmatprep.subr.bf16.mxu0 %v6765_v17  ;;  %2454 = vmatprep.subr.bf16.mxu1 %v6766_v52  ;;  %v6776_v17 = vld [vmem:[#allocation49_spill] sm:$0xff]  ;;  %v6777_v52 = vld [vmem:[#allocation36_spill] sm:$0xff] }
 0x597   :  { %2414 = vmatpush1.bf16.msra.mxu0 %v6767_v30  ;;  %2455 = vmatpush1.bf16.msra.mxu1 %v6768_v26  ;;  %v6778_v30 = vld [vmem:[#allocation51_spill] sm:$0xff]  ;;  %v6779_v26 = vld [vmem:[#allocation38_spill] sm:$0xff] }
 0x598   :  { %2415 = vmatprep.subr.bf16.mxu0 %v6769_v23  ;;  %2456 = vmatprep.subr.bf16.mxu1 %v6770_v29  ;;  %v6780_v23 = vld [vmem:[#allocation53_spill] sm:$0xff]  ;;  %v6781_v29 = vld [vmem:[#allocation40_spill] sm:$0xff] }
 0x59b   :  { %2416 = vmatpush1.bf16.msra.mxu0 %v6771_v41  ;;  %2457 = vmatpush1.bf16.msra.mxu1 %v6772_v0  ;;  %v6782_v41 = vld [vmem:[#allocation55_spill] sm:$0xff]  ;;  %v6783_v0 = vld [vmem:[#allocation42_spill] sm:$0xff] }
 0x59c   :  { %2417 = vmatprep.subr.bf16.mxu0 %v6773_v10  ;;  %2458 = vmatprep.subr.bf16.mxu1 %v6774_v60  ;;  %v6784_v10 = vld [vmem:[#allocation57_spill] sm:$0xff]  ;;  %v6785_v60 = vld [vmem:[#allocation44_spill] sm:$0xff] }
 0x59f   :  { %2418 = vmatpush2.bf16.msra.mxu0 %v6775_v51  ;;  %2459 = vmatpush2.bf16.msra.mxu1 %v6776_v17  ;;  %v6786_v51 = vld [vmem:[#allocation59_spill] sm:$0xff]  ;;  %v6787_v17 = vld [vmem:[#allocation46_spill] sm:$0xff] }
 0x5a0   :  { %2419 = vmatprep.subr.bf16.mxu0 %v6777_v52  ;;  %2460 = vmatprep.subr.bf16.mxu1 %v6778_v30  ;;  %v6788_v52 = vld [vmem:[#allocation61_spill] sm:$0xff]  ;;  %v6789_v30 = vld [vmem:[#allocation48_spill] sm:$0xff] }
 0x5a3   :  { %2420 = vmatpush2.bf16.msra.mxu0 %v6779_v26  ;;  %2461 = vmatpush2.bf16.msra.mxu1 %v6780_v23  ;;  %v6790_v26 = vld [vmem:[#allocation63_spill] sm:$0xff]  ;;  %v6791_v23 = vld [vmem:[#allocation50_spill] sm:$0xff] }
 0x5a4   :  { %2421 = vmatprep.subr.bf16.mxu0 %v6781_v29  ;;  %2462 = vmatprep.subr.bf16.mxu1 %v6782_v41  ;;  %v6792_v29 = vld [vmem:[#allocation65_spill] sm:$0xff]  ;;  %v6793_v41 = vld [vmem:[#allocation52_spill] sm:$0xff] }
 0x5a7   :  { %2422 = vmatpush2.bf16.msra.mxu0 %v6783_v0  ;;  %2463 = vmatpush2.bf16.msra.mxu1 %v6784_v10  ;;  %v6794_v0 = vld [vmem:[#allocation67_spill] sm:$0xff]  ;;  %v6795_v10 = vld [vmem:[#allocation54_spill] sm:$0xff] }
 0x5a8   :  { %2423 = vmatprep.subr.bf16.mxu0 %v6785_v60  ;;  %2464 = vmatprep.subr.bf16.mxu1 %v6786_v51  ;;  %v6796_v60 = vld [vmem:[#allocation69_spill] sm:$0xff]  ;;  %v6797_v51 = vld [vmem:[#allocation56_spill] sm:$0xff] }
 0x5ab   :  { %2424 = vmatpush2.bf16.msra.mxu0 %v6787_v17  ;;  %2465 = vmatpush2.bf16.msra.mxu1 %v6788_v52  ;;  %v6798_v17 = vld [vmem:[#allocation71_spill] sm:$0xff]  ;;  %v6799_v52 = vld [vmem:[#allocation58_spill] sm:$0xff] }
 0x5ac   :  { %2425 = vmatprep.subr.bf16.mxu0 %v6789_v30  ;;  %2466 = vmatprep.subr.bf16.mxu1 %v6790_v26  ;;  %v6800_v30 = vld [vmem:[#allocation73_spill] sm:$0xff]  ;;  %v6801_v26 = vld [vmem:[#allocation60_spill] sm:$0xff] }
 0x5af   :  { %2426 = vmatpush2.bf16.msra.mxu0 %v6791_v23  ;;  %2467 = vmatpush2.bf16.msra.mxu1 %v6792_v29  ;;  %v6802_v23 = vld [vmem:[#allocation75_spill] sm:$0xff]  ;;  %v6803_v29 = vld [vmem:[#allocation62_spill] sm:$0xff] }
 0x5b0   :  { %2427 = vmatprep.subr.bf16.mxu0 %v6793_v41  ;;  %2468 = vmatprep.subr.bf16.mxu1 %v6794_v0  ;;  %v6804_v41 = vld [vmem:[#allocation77_spill] sm:$0xff]  ;;  %v6805_v0 = vld [vmem:[#allocation64_spill] sm:$0xff] }
 0x5b3   :  { %2428 = vmatpush2.bf16.msra.mxu0 %v6795_v10  ;;  %2469 = vmatpush2.bf16.msra.mxu1 %v6796_v60  ;;  %v6806_v10 = vld [vmem:[#allocation79_spill] sm:$0xff] }
 0x5b4   :  { %2429 = vmatprep.subr.bf16.mxu0 %v6797_v51  ;;  %2470 = vmatprep.subr.bf16.mxu1 %v6798_v17  ;;  %v2318_v51 = vld [vmem:[#allocation3 + $0x40] sm:$0x3] }
 0x5b7   :  { %2430 = vmatpush2.bf16.msra.mxu0 %v6799_v52  ;;  %2471 = vmatpush2.bf16.msra.mxu1 %v6800_v30  ;;  %v2319_v52 = vld [vmem:[#allocation3 + $0x30] sm:$0x3] }
 0x5b8   :  { %2431 = vmatprep.subr.bf16.mxu0 %v6801_v26  ;;  %2472 = vmatprep.subr.bf16.mxu1 %v6802_v23 }
 0x5bb   :  { %2432 = vmatpush2.bf16.msra.mxu0 %v6803_v29  ;;  %2473 = vmatpush2.bf16.msra.mxu1 %v6804_v41  ;;  %v2321_v41 = vld [vmem:[#allocation3 + $0x28] sm:$0x3] }
 0x5bc   :  { %2483 = vmatprep.subr.bf16.mxu0 %v6805_v0  ;;  %2524 = vmatprep.subr.bf16.mxu1 %v6806_v10  ;;  %v2320_v10 = vld [vmem:[#allocation3 + $0x68] sm:$0x3] }
 0x5fe   :  { %v2188_v60 = vpop.f32.mrf.mxu0  ;;  %v2229_v37 = vpop.f32.mrf.mxu1 }
 0x5ff   :  { %v2322_v17 = vadd.f32 %v2318_v51, %v2188_v60  ;;  %v2324_v24 = vadd.f32 %v2320_v10, %v2229_v37  ;;  %v2327_v10 = vld [vmem:[#allocation3 + $0x8] sm:$0xc0] }
 0x600   :  { %v2190_v38 = vpop.f32.mrf.mxu0  ;;  %v2231_v50 = vpop.f32.mrf.mxu1 }
 0x601   :  { %v3640_v30 = vmul.f32 -1.442695, %v2322_v17  ;;  %v2323_v12 = vadd.f32 %v2319_v52, %v2190_v38  ;;  %v2325_v0 = vadd.f32 %v2321_v41, %v2231_v50  ;;  %v2335_v41 = vrot.slane %v2327_v10, 6 }
 0x602   :  { %v2192_v26 = vpop.f32.mrf.mxu0  ;;  %v2233_v35 = vpop.f32.mrf.mxu1 }
 0x603   :  { %3879 = vpow2.f32 %v3640_v30  ;;  %v3641_v23 = vmul.f32 -1.442695, %v2323_v12  ;;  %v3642_v9 = vmul.f32 -1.442695, %v2325_v0  ;;  %v6807_v30 = vld [vmem:[#allocation68_spill] sm:$0xff] }
 0x604   :  { %v2193_v29 = vpop.f32.mrf.mxu0  ;;  %v2234_v8 = vpop.f32.mrf.mxu1 }
 0x605   :  { %3881 = vpow2.f32 %v3641_v23 }
 0x606   :  { %3883 = vpow2.f32 %v3642_v9 }
 0x610   :  { %v3880_v27 = vpop.eup %3879 }
 0x611   :  { %v2349_v20 = vadd.f32 1.0, %v3880_v27 }
 0x612   :  { %v3882_v60 = vpop.eup %3881 }
 0x613   :  { %3885 = vrcp.f32 %v2349_v20  ;;  %v2355_v51 = vadd.f32 1.0, %v3882_v60  ;;  %v3884_v38 = vpop.eup %3883  ;;  %v2326_v20 = vld [vmem:[#allocation3 + $0x20] sm:$0xc0] }
 0x614   :  { %3887 = vtanh.f32 %v2324_v24  ;;  %v2362_v52 = vadd.f32 1.0, %v3884_v38  ;;  %v2334_v24 = vrot.slane %v2326_v20, 6 }
 0x615   :  { %3889 = vrcp.f32 %v2355_v51 }
 0x616   :  { %3891 = vrcp.f32 %v2362_v52 }
 0x620   :  { %v3886_v35 = vpop.eup %3885 }
 0x621   :  { %v3888_v17 = vpop.eup %3887 }
 0x622   :  { %v3890_v12 = vpop.eup %3889  ;;  %v2385_v8 = vmul.f32 %v3888_v17, %v3886_v35 }
 0x623   :  { %v2384_v26 = vmul.f32 %v3890_v12, %v6807_v30  ;;  %v3892_v27 = vpop.eup %3891 }
 0x625   :  { %v5569_v50 = vadd.f32 %v2385_v8, %v2384_v26  ;;  %v2329_v26 = vld [vmem:[#allocation3 + $0x10] sm:$0xc0] }
 0x627   :  { %6808 = vst [vmem:[#allocation83_spill] sm:$0xff] %v5569_v50  ;;  %3893 = vtanh.f32 %v5569_v50  ;;  %v2328_v50 = vld [vmem:[#allocation3 + $0x70] sm:$0xc0] }
 0x628   :  { %v2336_v20 = vrot.slane %v2328_v50, 6 }
 0x634   :  { %v3894_v0 = vpop.eup %3893 }
 0x635   :  { %v2391_v9 = vmul.f32 %v3894_v0, %v3892_v27  ;;  %v2337_v27 = vrot.slane %v2329_v26, 6  ;;  %v6812_v26 = vld [vmem:[#allocation123_spill] sm:$0xff] }
 0x63e   :  { %v2270_v37 = vpop.f32.mrf.mxu0  ;;  %v2311_v23 = vpop.f32.mrf.mxu1 }
 0x63f   :  { %v2342_v29 = vadd.f32 %v2334_v24, %v2270_v37  ;;  %v2344_v24 = vadd.f32 %v2336_v20, %v2311_v23  ;;  %v6815_v20 = vld [vmem:[#allocation112_spill] sm:$0xff] }
 0x640   :  { %v2272_v60 = vpop.f32.mrf.mxu0  ;;  %v2313_v51 = vpop.f32.mrf.mxu1 }
 0x641   :  { %v3643_v38 = vmul.f32 -1.442695, %v2342_v29  ;;  %v2343_v35 = vadd.f32 %v2335_v41, %v2272_v60  ;;  %v2345_v0 = vadd.f32 %v2337_v27, %v2313_v51  ;;  %v6813_v27 = vld [vmem:[#allocation110_spill] sm:$0xff] }
 0x642   :  { %v2274_v17 = vpop.f32.mrf.mxu0  ;;  %v2315_v12 = vpop.f32.mrf.mxu1 }
 0x643   :  { %3895 = vpow2.f32 %v3643_v38  ;;  %v3644_v52 = vmul.f32 -1.442695, %v2343_v35  ;;  %v3645_v62 = vmul.f32 -1.442695, %v2345_v0  ;;  %v6814_v0 = vld [vmem:[#allocation125_spill] sm:$0xff] }
 0x644   :  { %v2275_v8 = vpop.f32.mrf.mxu0  ;;  %v2316_v30 = vpop.f32.mrf.mxu1 }
 0x645   :  { %3897 = vpow2.f32 %v3644_v52  ;;  %v5576_v8 = vpack.c.bf16 %v2391_v9, %v2391_v9  ;;  %v6810_v9 = vld [vmem:[#allocation121_spill] sm:$0xff]  ;;  %v6811_v30 = vld [vmem:[#allocation108_spill] sm:$0xff] }
 0x646   :  { %3899 = vpow2.f32 %v3645_v62 }
 0x650   :  { %v3896_v59 = vpop.eup %3895 }
 0x651   :  { %v2368_v10 = vadd.f32 1.0, %v3896_v59 }
 0x652   :  { %v3898_v37 = vpop.eup %3897 }
 0x653   :  { %3901 = vrcp.f32 %v2368_v10  ;;  %v2374_v29 = vadd.f32 1.0, %v3898_v37  ;;  %v3900_v41 = vpop.eup %3899  ;;  %v6817_v10 = vld [vmem:[#allocation114_spill] sm:$0xff]  ;;  %v6818_v37 = vld [vmem:[#allocation128_spill] sm:$0xff] }
 0x654   :  { %3903 = vtanh.f32 %v2344_v24  ;;  %v2381_v17 = vadd.f32 1.0, %v3900_v41  ;;  %v6816_v24 = vld [vmem:[#allocation127_spill] sm:$0xff]  ;;  %v6820_v41 = vld [vmem:[#allocation129_spill] sm:$0xff] }
 0x655   :  { %3905 = vrcp.f32 %v2374_v29  ;;  %v6819_v29 = vld [vmem:[#allocation116_spill] sm:$0xff] }
 0x656   :  { %3907 = vrcp.f32 %v2381_v17  ;;  %v6824_v17 = vld [vmem:[#allocation131_spill] sm:$0xff] }
 0x660   :  { %v3902_v60 = vpop.eup %3901 }
 0x661   :  { %v3904_v38 = vpop.eup %3903 }
 0x662   :  { %v3906_v35 = vpop.eup %3905  ;;  %v2388_v12 = vmul.f32 %v3904_v38, %v3902_v60  ;;  %v6821_v60 = vld [vmem:[#allocation118_spill] sm:$0xff] }
 0x663   :  { %v2387_v51 = vmul.f32 %v3906_v35, %v5431_v31  ;;  %v3908_v59 = vpop.eup %3907  ;;  %v6809_v31 = vld [vmem:[#allocation106_spill] sm:$0xff]  ;;  %v6823_v35 = vld [vmem:[#allocation120_spill] sm:$0xff] }
 0x664   :  { %v6822_v38 = vld [vmem:[#allocation130_spill] sm:$0xff] }
 0x665   :  { %v5573_v52 = vadd.f32 %v2388_v12, %v2387_v51  ;;  %v6825_v12 = vld [vmem:[#allocation122_spill] sm:$0xff]  ;;  %v6826_v51 = vld [vmem:[#allocation132_spill] sm:$0xff] }
 0x667   :  { %3909 = vtanh.f32 %v5573_v52 }
 0x674   :  { %v3910_v50 = vpop.eup %3909 }
 0x675   :  { %v2393_v62 = vmul.f32 %v3910_v50, %v3908_v59  ;;  %v6827_v59 = vld [vmem:[#allocation124_spill] sm:$0xff]  ;;  %v6828_v50 = vld [vmem:[#allocation133_spill] sm:$0xff] }
 0x677   :  { %v2400_v23 = vpack.c.bf16 %v2393_v62, %v2393_v62  ;;  %v6829_v62 = vld [vmem:[#allocation126_spill] sm:$0xff] }
 0x679   :  { %2433 = vmatprep.mubr.bf16.mxu0 %v2400_v23  ;;  %2474 = vmatprep.mubr.bf16.mxu1 %v2400_v23 }
 0x67a   :  { %2434 = vmatmul.mubr.bf16.vlgmr.msra.gmra.mxu0 %v5576_v8  ;;  %2475 = vmatmul.mubr.bf16.vlgmr.msra.gmra.mxu1 %v5576_v8 }
 0x67b   :  { %2484 = vmatpush1.bf16.msra.mxu0 %v6452_v3  ;;  %2525 = vmatpush1.bf16.msra.mxu1 %v6453_v43 }
 0x67c   :  { %2515 = vmatprep.mubr.bf16.mxu0 %v2400_v23  ;;  %2556 = vmatprep.mubr.bf16.mxu1 %v2400_v23  ;;  %v6830_v23 = vld [vmem:[#allocation134_spill] sm:$0xff] }
 0x67d   :  { %2485 = vmatprep.subr.bf16.mxu0 %v6454_v33  ;;  %2526 = vmatprep.subr.bf16.mxu1 %v6455_v25 }
 0x67f   :  { %2486 = vmatpush1.bf16.msra.mxu0 %v6456_v48  ;;  %2527 = vmatpush1.bf16.msra.mxu1 %v6457_v18 }
 0x680   :  { %2487 = vmatprep.subr.bf16.mxu0 %v6458_v2  ;;  %2528 = vmatprep.subr.bf16.mxu1 %v6459_v36 }
 0x683   :  { %2488 = vmatpush1.bf16.msra.mxu0 %v6460_v28  ;;  %2529 = vmatpush1.bf16.msra.mxu1 %v6540_v40 }
 0x684   :  { %2489 = vmatprep.subr.bf16.mxu0 %v6541_v5  ;;  %2530 = vmatprep.subr.bf16.mxu1 %v6542_v63 }
 0x687   :  { %2490 = vmatpush1.bf16.msra.mxu0 %v6543_v21  ;;  %2531 = vmatpush1.bf16.msra.mxu1 %v6544_v39 }
 0x688   :  { %2491 = vmatprep.subr.bf16.mxu0 %v6545_v45  ;;  %2532 = vmatprep.subr.bf16.mxu1 %v6546_v6 }
 0x68b   :  { %2492 = vmatpush1.bf16.msra.mxu0 %v6547_v34  ;;  %2533 = vmatpush1.bf16.msra.mxu1 %v6548_v13 }
 0x68c   :  { %2493 = vmatprep.subr.bf16.mxu0 %v6549_v44  ;;  %2534 = vmatprep.subr.bf16.mxu1 %v6550_v58 }
 0x68f   :  { %2494 = vmatpush1.bf16.msra.mxu0 %v6551_v7  ;;  %2535 = vmatpush1.bf16.msra.mxu1 %v6552_v16 }
 0x690   :  { %2495 = vmatprep.subr.bf16.mxu0 %v6553_v55  ;;  %2536 = vmatprep.subr.bf16.mxu1 %v6554_v14 }
 0x693   :  { %2496 = vmatpush1.bf16.msra.mxu0 %v6555_v53  ;;  %2537 = vmatpush1.bf16.msra.mxu1 %v6556_v15 }
 0x694   :  { %2497 = vmatprep.subr.bf16.mxu0 %v6630_v47  ;;  %2538 = vmatprep.subr.bf16.mxu1 %v6557_v42 }
 0x697   :  { %2498 = vmatpush1.bf16.msra.mxu0 %v6631_v1  ;;  %2539 = vmatpush1.bf16.msra.mxu1 %v6558_v4 }
 0x698   :  { %2499 = vmatprep.subr.bf16.mxu0 %v6632_v49  ;;  %2540 = vmatprep.subr.bf16.mxu1 %v6559_v19 }
 0x69b   :  { %2500 = vmatpush2.bf16.msra.mxu0 %v6633_v54  ;;  %2541 = vmatpush2.bf16.msra.mxu1 %v6560_v32 }
 0x69c   :  { %2501 = vmatprep.subr.bf16.mxu0 %v6486_v46  ;;  %2542 = vmatprep.subr.bf16.mxu1 %v6561_v61 }
 0x69f   :  { %2502 = vmatpush2.bf16.msra.mxu0 %v6488_v22  ;;  %2543 = vmatpush2.bf16.msra.mxu1 %v6562_v57 }
 0x6a0   :  { %2503 = vmatprep.subr.bf16.mxu0 %v6634_v56  ;;  %2544 = vmatprep.subr.bf16.mxu1 %v6563_v11 }
 0x6a3   :  { %2504 = vmatpush2.bf16.msra.mxu0 %v6809_v31  ;;  %2545 = vmatpush2.bf16.msra.mxu1 %v6810_v9 }
 0x6a4   :  { %2505 = vmatprep.subr.bf16.mxu0 %v6811_v30  ;;  %2546 = vmatprep.subr.bf16.mxu1 %v6812_v26  ;;  %v2567_v26 = vld [vmem:[#allocation3 + $0x68] sm:$0xc] }
 0x6a7   :  { %2506 = vmatpush2.bf16.msra.mxu0 %v6813_v27  ;;  %2547 = vmatpush2.bf16.msra.mxu1 %v6814_v0 }
 0x6a8   :  { %2507 = vmatprep.subr.bf16.mxu0 %v6815_v20  ;;  %2548 = vmatprep.subr.bf16.mxu1 %v6816_v24 }
 0x6ab   :  { %2508 = vmatpush2.bf16.msra.mxu0 %v6817_v10  ;;  %2549 = vmatpush2.bf16.msra.mxu1 %v6818_v37 }
 0x6ac   :  { %2509 = vmatprep.subr.bf16.mxu0 %v6819_v29  ;;  %2550 = vmatprep.subr.bf16.mxu1 %v6820_v41  ;;  %v6831_v41 = vld [vmem:[#allocation7_spill] sm:$0xff] }
 0x6af   :  { %2510 = vmatpush2.bf16.msra.mxu0 %v6821_v60  ;;  %2551 = vmatpush2.bf16.msra.mxu1 %v6822_v38  ;;  %v6832_v60 = vld [vmem:[#allocation15_spill] sm:$0xff] }
 0x6b0   :  { %2511 = vmatprep.subr.bf16.mxu0 %v6823_v35  ;;  %2552 = vmatprep.subr.bf16.mxu1 %v6824_v17  ;;  %v6833_v17 = vld [vmem:[#allocation8_spill] sm:$0xff]  ;;  %v6842_v35 = vld [vmem:[#allocation25_spill] sm:$0xff] }
 0x6b3   :  { %2512 = vmatpush2.bf16.msra.mxu0 %v6825_v12  ;;  %2553 = vmatpush2.bf16.msra.mxu1 %v6826_v51  ;;  %v6834_v12 = vld [vmem:[#allocation17_spill] sm:$0xff] }
 0x6b4   :  { %2513 = vmatprep.subr.bf16.mxu0 %v6827_v59  ;;  %2554 = vmatprep.subr.bf16.mxu1 %v6828_v50  ;;  %v6835_v51 = vld [vmem:[#allocation9_spill] sm:$0xff]  ;;  %v6836_v59 = vld [vmem:[#allocation19_spill] sm:$0xff]  ;;  %v6837_v50 = vld [vmem:[#allocation10_spill] sm:$0xff] }
 0x6b7   :  { %2514 = vmatpush2.bf16.msra.mxu0 %v6829_v62  ;;  %2555 = vmatpush2.bf16.msra.mxu1 %v6830_v23  ;;  %v6838_v62 = vld [vmem:[#allocation21_spill] sm:$0xff]  ;;  %v6839_v23 = vld [vmem:[#allocation11_spill] sm:$0xff] }
 0x6b8   :  { %2663 = vmatprep.subr.bf16.mxu0 %v6831_v41  ;;  %2704 = vmatprep.subr.bf16.mxu1 %v6832_v60  ;;  %v6840_v41 = vld [vmem:[#allocation23_spill] sm:$0xff]  ;;  %v6841_v60 = vld [vmem:[#allocation12_spill] sm:$0xff] }
 0x6ba   :  { %2516 = vmatmul.mubr.bf16.vlgmr.msra.gmra.mxu0 %v5576_v8  ;;  %2557 = vmatmul.mubr.bf16.vlgmr.msra.gmra.mxu1 %v5576_v8  ;;  %v6843_v8 = vld [vmem:[#allocation13_spill] sm:$0xff] }
 0x6bb   :  { %2664 = vmatpush1.bf16.msra.mxu0 %v6833_v17  ;;  %2705 = vmatpush1.bf16.msra.mxu1 %v6834_v12  ;;  %v6844_v17 = vld [vmem:[#allocation27_spill] sm:$0xff]  ;;  %v6845_v12 = vld [vmem:[#allocation14_spill] sm:$0xff] }
 0x6bc   :  { %2665 = vmatprep.subr.bf16.mxu0 %v6835_v51  ;;  %2706 = vmatprep.subr.bf16.mxu1 %v6836_v59  ;;  %v6846_v51 = vld [vmem:[#allocation29_spill] sm:$0xff]  ;;  %v6847_v59 = vld [vmem:[#allocation16_spill] sm:$0xff] }
 0x6bf   :  { %2666 = vmatpush1.bf16.msra.mxu0 %v6837_v50  ;;  %2707 = vmatpush1.bf16.msra.mxu1 %v6838_v62  ;;  %v6848_v50 = vld [vmem:[#allocation31_spill] sm:$0xff]  ;;  %v6849_v62 = vld [vmem:[#allocation18_spill] sm:$0xff] }
 0x6c0   :  { %2667 = vmatprep.subr.bf16.mxu0 %v6839_v23  ;;  %2708 = vmatprep.subr.bf16.mxu1 %v6840_v41  ;;  %v6850_v23 = vld [vmem:[#allocation33_spill] sm:$0xff]  ;;  %v6851_v41 = vld [vmem:[#allocation20_spill] sm:$0xff] }
 0x6c3   :  { %2668 = vmatpush1.bf16.msra.mxu0 %v6841_v60  ;;  %2709 = vmatpush1.bf16.msra.mxu1 %v6842_v35  ;;  %v6852_v60 = vld [vmem:[#allocation35_spill] sm:$0xff]  ;;  %v6853_v35 = vld [vmem:[#allocation22_spill] sm:$0xff] }
 0x6c4   :  { %2669 = vmatprep.subr.bf16.mxu0 %v6843_v8  ;;  %2710 = vmatprep.subr.bf16.mxu1 %v6844_v17  ;;  %v6854_v8 = vld [vmem:[#allocation37_spill] sm:$0xff]  ;;  %v6855_v17 = vld [vmem:[#allocation24_spill] sm:$0xff] }
 0x6c7   :  { %2670 = vmatpush1.bf16.msra.mxu0 %v6845_v12  ;;  %2711 = vmatpush1.bf16.msra.mxu1 %v6846_v51  ;;  %v6856_v12 = vld [vmem:[#allocation39_spill] sm:$0xff]  ;;  %v6857_v51 = vld [vmem:[#allocation26_spill] sm:$0xff] }
 0x6c8   :  { %2671 = vmatprep.subr.bf16.mxu0 %v6847_v59  ;;  %2712 = vmatprep.subr.bf16.mxu1 %v6848_v50  ;;  %v6858_v59 = vld [vmem:[#allocation41_spill] sm:$0xff]  ;;  %v6859_v50 = vld [vmem:[#allocation28_spill] sm:$0xff] }
 0x6cb   :  { %2672 = vmatpush1.bf16.msra.mxu0 %v6849_v62  ;;  %2713 = vmatpush1.bf16.msra.mxu1 %v6850_v23  ;;  %v6860_v62 = vld [vmem:[#allocation43_spill] sm:$0xff]  ;;  %v6861_v23 = vld [vmem:[#allocation30_spill] sm:$0xff] }
 0x6cc   :  { %2673 = vmatprep.subr.bf16.mxu0 %v6851_v41  ;;  %2714 = vmatprep.subr.bf16.mxu1 %v6852_v60  ;;  %v6862_v41 = vld [vmem:[#allocation45_spill] sm:$0xff]  ;;  %v6863_v60 = vld [vmem:[#allocation32_spill] sm:$0xff] }
 0x6cf   :  { %2674 = vmatpush1.bf16.msra.mxu0 %v6853_v35  ;;  %2715 = vmatpush1.bf16.msra.mxu1 %v6854_v8  ;;  %v6864_v35 = vld [vmem:[#allocation47_spill] sm:$0xff]  ;;  %v6865_v8 = vld [vmem:[#allocation34_spill] sm:$0xff] }
 0x6d0   :  { %2675 = vmatprep.subr.bf16.mxu0 %v6855_v17  ;;  %2716 = vmatprep.subr.bf16.mxu1 %v6856_v12  ;;  %v6866_v17 = vld [vmem:[#allocation49_spill] sm:$0xff]  ;;  %v6867_v12 = vld [vmem:[#allocation36_spill] sm:$0xff] }
 0x6d3   :  { %2676 = vmatpush1.bf16.msra.mxu0 %v6857_v51  ;;  %2717 = vmatpush1.bf16.msra.mxu1 %v6858_v59  ;;  %v6868_v51 = vld [vmem:[#allocation51_spill] sm:$0xff]  ;;  %v6869_v59 = vld [vmem:[#allocation38_spill] sm:$0xff] }
 0x6d4   :  { %2677 = vmatprep.subr.bf16.mxu0 %v6859_v50  ;;  %2718 = vmatprep.subr.bf16.mxu1 %v6860_v62  ;;  %v6870_v50 = vld [vmem:[#allocation53_spill] sm:$0xff]  ;;  %v6871_v62 = vld [vmem:[#allocation40_spill] sm:$0xff] }
 0x6d7   :  { %2678 = vmatpush1.bf16.msra.mxu0 %v6861_v23  ;;  %2719 = vmatpush1.bf16.msra.mxu1 %v6862_v41  ;;  %v6872_v23 = vld [vmem:[#allocation55_spill] sm:$0xff]  ;;  %v6873_v41 = vld [vmem:[#allocation42_spill] sm:$0xff] }
 0x6d8   :  { %2679 = vmatprep.subr.bf16.mxu0 %v6863_v60  ;;  %2720 = vmatprep.subr.bf16.mxu1 %v6864_v35  ;;  %v6874_v60 = vld [vmem:[#allocation57_spill] sm:$0xff]  ;;  %v6875_v35 = vld [vmem:[#allocation44_spill] sm:$0xff] }
 0x6db   :  { %2680 = vmatpush2.bf16.msra.mxu0 %v6865_v8  ;;  %2721 = vmatpush2.bf16.msra.mxu1 %v6866_v17  ;;  %v6876_v8 = vld [vmem:[#allocation59_spill] sm:$0xff]  ;;  %v6877_v17 = vld [vmem:[#allocation46_spill] sm:$0xff] }
 0x6dc   :  { %2681 = vmatprep.subr.bf16.mxu0 %v6867_v12  ;;  %2722 = vmatprep.subr.bf16.mxu1 %v6868_v51  ;;  %v6878_v12 = vld [vmem:[#allocation61_spill] sm:$0xff]  ;;  %v6879_v51 = vld [vmem:[#allocation48_spill] sm:$0xff] }
 0x6df   :  { %2682 = vmatpush2.bf16.msra.mxu0 %v6869_v59  ;;  %2723 = vmatpush2.bf16.msra.mxu1 %v6870_v50  ;;  %v6880_v59 = vld [vmem:[#allocation63_spill] sm:$0xff]  ;;  %v6881_v50 = vld [vmem:[#allocation50_spill] sm:$0xff] }
 0x6e0   :  { %2683 = vmatprep.subr.bf16.mxu0 %v6871_v62  ;;  %2724 = vmatprep.subr.bf16.mxu1 %v6872_v23  ;;  %v6882_v62 = vld [vmem:[#allocation65_spill] sm:$0xff]  ;;  %v6883_v23 = vld [vmem:[#allocation52_spill] sm:$0xff] }
 0x6e3   :  { %2684 = vmatpush2.bf16.msra.mxu0 %v6873_v41  ;;  %2725 = vmatpush2.bf16.msra.mxu1 %v6874_v60  ;;  %v6884_v41 = vld [vmem:[#allocation67_spill] sm:$0xff]  ;;  %v6885_v60 = vld [vmem:[#allocation54_spill] sm:$0xff] }
 0x6e4   :  { %2685 = vmatprep.subr.bf16.mxu0 %v6875_v35  ;;  %2726 = vmatprep.subr.bf16.mxu1 %v6876_v8  ;;  %v6886_v35 = vld [vmem:[#allocation69_spill] sm:$0xff]  ;;  %v6887_v8 = vld [vmem:[#allocation56_spill] sm:$0xff] }
 0x6e7   :  { %2686 = vmatpush2.bf16.msra.mxu0 %v6877_v17  ;;  %2727 = vmatpush2.bf16.msra.mxu1 %v6878_v12  ;;  %v6888_v17 = vld [vmem:[#allocation71_spill] sm:$0xff]  ;;  %v6889_v12 = vld [vmem:[#allocation58_spill] sm:$0xff] }
 0x6e8   :  { %2687 = vmatprep.subr.bf16.mxu0 %v6879_v51  ;;  %2728 = vmatprep.subr.bf16.mxu1 %v6880_v59  ;;  %v6890_v51 = vld [vmem:[#allocation73_spill] sm:$0xff]  ;;  %v6891_v59 = vld [vmem:[#allocation60_spill] sm:$0xff] }
 0x6eb   :  { %2688 = vmatpush2.bf16.msra.mxu0 %v6881_v50  ;;  %2729 = vmatpush2.bf16.msra.mxu1 %v6882_v62  ;;  %v6892_v50 = vld [vmem:[#allocation75_spill] sm:$0xff]  ;;  %v6893_v62 = vld [vmem:[#allocation62_spill] sm:$0xff] }
 0x6ec   :  { %2689 = vmatprep.subr.bf16.mxu0 %v6883_v23  ;;  %2730 = vmatprep.subr.bf16.mxu1 %v6884_v41  ;;  %v6894_v23 = vld [vmem:[#allocation77_spill] sm:$0xff]  ;;  %v6895_v41 = vld [vmem:[#allocation64_spill] sm:$0xff] }
 0x6ef   :  { %2690 = vmatpush2.bf16.msra.mxu0 %v6885_v60  ;;  %2731 = vmatpush2.bf16.msra.mxu1 %v6886_v35  ;;  %v6896_v60 = vld [vmem:[#allocation79_spill] sm:$0xff] }
 0x6f0   :  { %2691 = vmatprep.subr.bf16.mxu0 %v6887_v8  ;;  %2732 = vmatprep.subr.bf16.mxu1 %v6888_v17  ;;  %v2565_v35 = vld [vmem:[#allocation3 + $0x40] sm:$0xc]  ;;  %v2566_v8 = vld [vmem:[#allocation3 + $0x30] sm:$0xc] }
 0x6f1   :  { %v2573_v38 = vrot.slane %v2565_v35, 2  ;;  %v2574_v37 = vrot.slane %v2566_v8, 2  ;;  %v2575_v35 = vrot.slane %v2567_v26, 2 }
 0x6f3   :  { %2692 = vmatpush2.bf16.msra.mxu0 %v6889_v12  ;;  %2733 = vmatpush2.bf16.msra.mxu1 %v6890_v51 }
 0x6f4   :  { %2693 = vmatprep.subr.bf16.mxu0 %v6891_v59  ;;  %2734 = vmatprep.subr.bf16.mxu1 %v6892_v50 }
 0x6f7   :  { %2694 = vmatpush2.bf16.msra.mxu0 %v6893_v62  ;;  %2735 = vmatpush2.bf16.msra.mxu1 %v6894_v23 }
 0x6f8   :  { %2745 = vmatprep.subr.bf16.mxu0 %v6895_v41  ;;  %2786 = vmatprep.subr.bf16.mxu1 %v6896_v60  ;;  %v2568_v41 = vld [vmem:[#allocation3 + $0x28] sm:$0xc] }
 0x6f9   :  { %v2576_v60 = vrot.slane %v2568_v41, 2  ;;  %v6897_v41 = vld [vmem:[#allocation83_spill] sm:$0xff] }
 0x73a   :  { %v2435_v17 = vpop.f32.mrf.mxu0  ;;  %v2476_v29 = vpop.f32.mrf.mxu1 }
 0x73b   :  { %v2581_v12 = vadd.f32 %v2573_v38, %v2435_v17  ;;  %v2583_v38 = vadd.f32 %v2575_v35, %v2476_v29  ;;  %v2586_v29 = vld [vmem:[#allocation3 + $0x8] sm:$0x30] }
 0x73c   :  { %v2437_v51 = vpop.f32.mrf.mxu0  ;;  %v2478_v10 = vpop.f32.mrf.mxu1 }
 0x73d   :  { %v3646_v59 = vmul.f32 -1.442695, %v2581_v12  ;;  %v2582_v24 = vadd.f32 %v2574_v37, %v2437_v51  ;;  %v2584_v27 = vadd.f32 %v2576_v60, %v2478_v10 }
 0x73e   :  { %v2439_v50 = vpop.f32.mrf.mxu0  ;;  %v2480_v20 = vpop.f32.mrf.mxu1 }
 0x73f   :  { %3911 = vpow2.f32 %v3646_v59  ;;  %v3647_v62 = vmul.f32 -1.442695, %v2582_v24  ;;  %v3648_v30 = vmul.f32 -1.442695, %v2584_v27  ;;  %v2585_v27 = vld [vmem:[#allocation3 + $0x20] sm:$0x30] }
 0x740   :  { %v2440_v23 = vpop.f32.mrf.mxu0  ;;  %v2481_v0 = vpop.f32.mrf.mxu1  ;;  %v2593_v50 = vrot.slane %v2585_v27, 4 }
 0x741   :  { %3913 = vpow2.f32 %v3647_v62 }
 0x742   :  { %3915 = vpow2.f32 %v3648_v30 }
 0x74c   :  { %v3912_v9 = vpop.eup %3911 }
 0x74d   :  { %v2608_v17 = vadd.f32 1.0, %v3912_v9 }
 0x74e   :  { %v3914_v8 = vpop.eup %3913 }
 0x74f   :  { %3917 = vrcp.f32 %v2608_v17  ;;  %v2614_v37 = vadd.f32 1.0, %v3914_v8  ;;  %v3916_v20 = vpop.eup %3915 }
 0x750   :  { %3919 = vtanh.f32 %v2583_v38  ;;  %v2621_v51 = vadd.f32 1.0, %v3916_v20  ;;  %v2594_v38 = vrot.slane %v2586_v29, 4 }
 0x751   :  { %3921 = vrcp.f32 %v2614_v37 }
 0x752   :  { %3923 = vrcp.f32 %v2621_v51 }
 0x75c   :  { %v3918_v24 = vpop.eup %3917 }
 0x75d   :  { %v3920_v12 = vpop.eup %3919 }
 0x75e   :  { %v3922_v0 = vpop.eup %3921  ;;  %v2644_v59 = vmul.f32 %v3920_v12, %v3918_v24 }
 0x75f   :  { %v2643_v10 = vmul.f32 %v3922_v0, %v6897_v41  ;;  %v3924_v9 = vpop.eup %3923  ;;  %v2588_v41 = vld [vmem:[#allocation3 + $0x10] sm:$0x30] }
 0x761   :  { %v5711_v60 = vadd.f32 %v2644_v59, %v2643_v10  ;;  %v2596_v10 = vrot.slane %v2588_v41, 4  ;;  %v6901_v41 = vld [vmem:[#allocation108_spill] sm:$0xff] }
 0x763   :  { %6898 = vst [vmem:[#allocation70_spill] sm:$0xff] %v5711_v60  ;;  %3925 = vtanh.f32 %v5711_v60 }
 0x770   :  { %v3926_v26 = vpop.eup %3925 }
 0x771   :  { %v2650_v30 = vmul.f32 %v3926_v26, %v3924_v9  ;;  %v2587_v26 = vld [vmem:[#allocation3 + $0x70] sm:$0x30] }
 0x772   :  { %v2595_v27 = vrot.slane %v2587_v26, 4  ;;  %v6904_v26 = vld [vmem:[#allocation125_spill] sm:$0xff] }
 0x77a   :  { %v2517_v62 = vpop.f32.mrf.mxu0  ;;  %v2558_v23 = vpop.f32.mrf.mxu1 }
 0x77b   :  { %v2601_v35 = vadd.f32 %v2593_v50, %v2517_v62  ;;  %v2603_v50 = vadd.f32 %v2595_v27, %v2558_v23  ;;  %v6905_v27 = vld [vmem:[#allocation112_spill] sm:$0xff] }
 0x77c   :  { %v2519_v17 = vpop.f32.mrf.mxu0  ;;  %v2560_v8 = vpop.f32.mrf.mxu1 }
 0x77d   :  { %v3649_v37 = vmul.f32 -1.442695, %v2601_v35  ;;  %v2602_v20 = vadd.f32 %v2594_v38, %v2519_v17  ;;  %v2604_v9 = vadd.f32 %v2596_v10, %v2560_v8  ;;  %v6902_v10 = vld [vmem:[#allocation123_spill] sm:$0xff] }
 0x77e   :  { %v2521_v24 = vpop.f32.mrf.mxu0  ;;  %v2562_v12 = vpop.f32.mrf.mxu1 }
 0x77f   :  { %3927 = vpow2.f32 %v3649_v37  ;;  %v3650_v0 = vmul.f32 -1.442695, %v2602_v20  ;;  %v3651_v60 = vmul.f32 -1.442695, %v2604_v9  ;;  %v6903_v9 = vld [vmem:[#allocation110_spill] sm:$0xff] }
 0x780   :  { %v2522_v51 = vpop.f32.mrf.mxu0  ;;  %v2563_v59 = vpop.f32.mrf.mxu1 }
 0x781   :  { %3929 = vpow2.f32 %v3650_v0  ;;  %v5718_v59 = vpack.c.bf16 %v2650_v30, %v2650_v30  ;;  %v6900_v30 = vld [vmem:[#allocation121_spill] sm:$0xff] }
 0x782   :  { %3931 = vpow2.f32 %v3651_v60 }
 0x78c   :  { %v3928_v31 = vpop.eup %3927 }
 0x78d   :  { %v2627_v29 = vadd.f32 1.0, %v3928_v31 }
 0x78e   :  { %v3930_v62 = vpop.eup %3929 }
 0x78f   :  { %3933 = vrcp.f32 %v2627_v29  ;;  %v2633_v35 = vadd.f32 1.0, %v3930_v62  ;;  %v3932_v38 = vpop.eup %3931  ;;  %v6907_v29 = vld [vmem:[#allocation114_spill] sm:$0xff]  ;;  %v6908_v62 = vld [vmem:[#allocation128_spill] sm:$0xff] }
 0x790   :  { %3935 = vtanh.f32 %v2603_v50  ;;  %v2640_v24 = vadd.f32 1.0, %v3932_v38  ;;  %v6906_v50 = vld [vmem:[#allocation127_spill] sm:$0xff]  ;;  %v6910_v38 = vld [vmem:[#allocation129_spill] sm:$0xff] }
 0x791   :  { %3937 = vrcp.f32 %v2633_v35  ;;  %v6909_v35 = vld [vmem:[#allocation116_spill] sm:$0xff] }
 0x792   :  { %3939 = vrcp.f32 %v2640_v24  ;;  %v6914_v24 = vld [vmem:[#allocation131_spill] sm:$0xff] }
 0x79c   :  { %v3934_v17 = vpop.eup %3933 }
 0x79d   :  { %v3936_v37 = vpop.eup %3935 }
 0x79e   :  { %v3938_v20 = vpop.eup %3937  ;;  %v2647_v12 = vmul.f32 %v3936_v37, %v3934_v17  ;;  %v6911_v17 = vld [vmem:[#allocation118_spill] sm:$0xff] }
 0x79f   :  { %v2646_v8 = vmul.f32 %v3938_v20, %v5573_v52  ;;  %v3940_v31 = vpop.eup %3939  ;;  %v6899_v52 = vld [vmem:[#allocation106_spill] sm:$0xff]  ;;  %v6913_v20 = vld [vmem:[#allocation120_spill] sm:$0xff] }
 0x7a0   :  { %v6912_v37 = vld [vmem:[#allocation130_spill] sm:$0xff] }
 0x7a1   :  { %v5715_v0 = vadd.f32 %v2647_v12, %v2646_v8  ;;  %v6915_v12 = vld [vmem:[#allocation122_spill] sm:$0xff]  ;;  %v6916_v8 = vld [vmem:[#allocation132_spill] sm:$0xff] }
 0x7a3   :  { %3941 = vtanh.f32 %v5715_v0 }
 0x7b0   :  { %v3942_v23 = vpop.eup %3941 }
 0x7b1   :  { %v2652_v60 = vmul.f32 %v3942_v23, %v3940_v31  ;;  %v6917_v31 = vld [vmem:[#allocation124_spill] sm:$0xff]  ;;  %v6918_v23 = vld [vmem:[#allocation133_spill] sm:$0xff] }
 0x7b3   :  { %v2662_v51 = vpack.c.bf16 %v2652_v60, %v2652_v60  ;;  %v6919_v60 = vld [vmem:[#allocation126_spill] sm:$0xff] }
 0x7b5   :  { %2695 = vmatprep.mubr.bf16.mxu0 %v2662_v51  ;;  %2736 = vmatprep.mubr.bf16.mxu1 %v2662_v51 }
 0x7b6   :  { %2696 = vmatmul.mubr.bf16.vlgmr.msra.gmra.mxu0 %v5718_v59  ;;  %2737 = vmatmul.mubr.bf16.vlgmr.msra.gmra.mxu1 %v5718_v59 }
 0x7b7   :  { %2746 = vmatpush1.bf16.msra.mxu0 %v6452_v3  ;;  %2787 = vmatpush1.bf16.msra.mxu1 %v6453_v43 }
 0x7b8   :  { %2777 = vmatprep.mubr.bf16.mxu0 %v2662_v51  ;;  %2818 = vmatprep.mubr.bf16.mxu1 %v2662_v51  ;;  %v6920_v51 = vld [vmem:[#allocation134_spill] sm:$0xff] }
 0x7b9   :  { %2747 = vmatprep.subr.bf16.mxu0 %v6454_v33  ;;  %2788 = vmatprep.subr.bf16.mxu1 %v6455_v25 }
 0x7bb   :  { %2748 = vmatpush1.bf16.msra.mxu0 %v6456_v48  ;;  %2789 = vmatpush1.bf16.msra.mxu1 %v6457_v18 }
 0x7bc   :  { %2749 = vmatprep.subr.bf16.mxu0 %v6458_v2  ;;  %2790 = vmatprep.subr.bf16.mxu1 %v6459_v36 }
 0x7bf   :  { %2750 = vmatpush1.bf16.msra.mxu0 %v6460_v28  ;;  %2791 = vmatpush1.bf16.msra.mxu1 %v6540_v40 }
 0x7c0   :  { %2751 = vmatprep.subr.bf16.mxu0 %v6541_v5  ;;  %2792 = vmatprep.subr.bf16.mxu1 %v6542_v63 }
 0x7c3   :  { %2752 = vmatpush1.bf16.msra.mxu0 %v6543_v21  ;;  %2793 = vmatpush1.bf16.msra.mxu1 %v6544_v39 }
 0x7c4   :  { %2753 = vmatprep.subr.bf16.mxu0 %v6545_v45  ;;  %2794 = vmatprep.subr.bf16.mxu1 %v6546_v6 }
 0x7c7   :  { %2754 = vmatpush1.bf16.msra.mxu0 %v6547_v34  ;;  %2795 = vmatpush1.bf16.msra.mxu1 %v6548_v13 }
 0x7c8   :  { %2755 = vmatprep.subr.bf16.mxu0 %v6549_v44  ;;  %2796 = vmatprep.subr.bf16.mxu1 %v6550_v58 }
 0x7cb   :  { %2756 = vmatpush1.bf16.msra.mxu0 %v6551_v7  ;;  %2797 = vmatpush1.bf16.msra.mxu1 %v6552_v16 }
 0x7cc   :  { %2757 = vmatprep.subr.bf16.mxu0 %v6553_v55  ;;  %2798 = vmatprep.subr.bf16.mxu1 %v6554_v14 }
 0x7cf   :  { %2758 = vmatpush1.bf16.msra.mxu0 %v6555_v53  ;;  %2799 = vmatpush1.bf16.msra.mxu1 %v6556_v15 }
 0x7d0   :  { %2759 = vmatprep.subr.bf16.mxu0 %v6630_v47  ;;  %2800 = vmatprep.subr.bf16.mxu1 %v6557_v42 }
 0x7d3   :  { %2760 = vmatpush1.bf16.msra.mxu0 %v6631_v1  ;;  %2801 = vmatpush1.bf16.msra.mxu1 %v6558_v4 }
 0x7d4   :  { %2761 = vmatprep.subr.bf16.mxu0 %v6632_v49  ;;  %2802 = vmatprep.subr.bf16.mxu1 %v6559_v19 }
 0x7d7   :  { %2762 = vmatpush2.bf16.msra.mxu0 %v6633_v54  ;;  %2803 = vmatpush2.bf16.msra.mxu1 %v6560_v32 }
 0x7d8   :  { %2763 = vmatprep.subr.bf16.mxu0 %v6486_v46  ;;  %2804 = vmatprep.subr.bf16.mxu1 %v6561_v61 }
 0x7db   :  { %2764 = vmatpush2.bf16.msra.mxu0 %v6488_v22  ;;  %2805 = vmatpush2.bf16.msra.mxu1 %v6562_v57 }
 0x7dc   :  { %2765 = vmatprep.subr.bf16.mxu0 %v6634_v56  ;;  %2806 = vmatprep.subr.bf16.mxu1 %v6563_v11 }
 0x7df   :  { %2766 = vmatpush2.bf16.msra.mxu0 %v6899_v52  ;;  %2807 = vmatpush2.bf16.msra.mxu1 %v6900_v30 }
 0x7e0   :  { %2767 = vmatprep.subr.bf16.mxu0 %v6901_v41  ;;  %2808 = vmatprep.subr.bf16.mxu1 %v6902_v10  ;;  %v2829_v10 = vld [vmem:[#allocation3 + $0x68] sm:$0x30] }
 0x7e3   :  { %2768 = vmatpush2.bf16.msra.mxu0 %v6903_v9  ;;  %2809 = vmatpush2.bf16.msra.mxu1 %v6904_v26 }
 0x7e4   :  { %2769 = vmatprep.subr.bf16.mxu0 %v6905_v27  ;;  %2810 = vmatprep.subr.bf16.mxu1 %v6906_v50 }
 0x7e7   :  { %2770 = vmatpush2.bf16.msra.mxu0 %v6907_v29  ;;  %2811 = vmatpush2.bf16.msra.mxu1 %v6908_v62 }
 0x7e8   :  { %2771 = vmatprep.subr.bf16.mxu0 %v6909_v35  ;;  %2812 = vmatprep.subr.bf16.mxu1 %v6910_v38  ;;  %v6921_v38 = vld [vmem:[#allocation7_spill] sm:$0xff] }
 0x7eb   :  { %2772 = vmatpush2.bf16.msra.mxu0 %v6911_v17  ;;  %2813 = vmatpush2.bf16.msra.mxu1 %v6912_v37  ;;  %v6922_v17 = vld [vmem:[#allocation15_spill] sm:$0xff] }
 0x7ec   :  { %2773 = vmatprep.subr.bf16.mxu0 %v6913_v20  ;;  %2814 = vmatprep.subr.bf16.mxu1 %v6914_v24  ;;  %v6923_v24 = vld [vmem:[#allocation8_spill] sm:$0xff]  ;;  %v6932_v20 = vld [vmem:[#allocation25_spill] sm:$0xff] }
 0x7ef   :  { %2774 = vmatpush2.bf16.msra.mxu0 %v6915_v12  ;;  %2815 = vmatpush2.bf16.msra.mxu1 %v6916_v8  ;;  %v6924_v12 = vld [vmem:[#allocation17_spill] sm:$0xff] }
 0x7f0   :  { %2775 = vmatprep.subr.bf16.mxu0 %v6917_v31  ;;  %2816 = vmatprep.subr.bf16.mxu1 %v6918_v23  ;;  %v6925_v8 = vld [vmem:[#allocation9_spill] sm:$0xff]  ;;  %v6926_v31 = vld [vmem:[#allocation19_spill] sm:$0xff]  ;;  %v6927_v23 = vld [vmem:[#allocation10_spill] sm:$0xff] }
 0x7f3   :  { %2776 = vmatpush2.bf16.msra.mxu0 %v6919_v60  ;;  %2817 = vmatpush2.bf16.msra.mxu1 %v6920_v51  ;;  %v6928_v60 = vld [vmem:[#allocation21_spill] sm:$0xff]  ;;  %v6929_v51 = vld [vmem:[#allocation11_spill] sm:$0xff] }
 0x7f4   :  { %2925 = vmatprep.subr.bf16.mxu0 %v6921_v38  ;;  %2966 = vmatprep.subr.bf16.mxu1 %v6922_v17  ;;  %v6930_v38 = vld [vmem:[#allocation23_spill] sm:$0xff]  ;;  %v6931_v17 = vld [vmem:[#allocation12_spill] sm:$0xff] }
 0x7f6   :  { %2778 = vmatmul.mubr.bf16.vlgmr.msra.gmra.mxu0 %v5718_v59  ;;  %2819 = vmatmul.mubr.bf16.vlgmr.msra.gmra.mxu1 %v5718_v59  ;;  %v6933_v59 = vld [vmem:[#allocation13_spill] sm:$0xff] }
 0x7f7   :  { %2926 = vmatpush1.bf16.msra.mxu0 %v6923_v24  ;;  %2967 = vmatpush1.bf16.msra.mxu1 %v6924_v12  ;;  %v6934_v24 = vld [vmem:[#allocation27_spill] sm:$0xff]  ;;  %v6935_v12 = vld [vmem:[#allocation14_spill] sm:$0xff] }
 0x7f8   :  { %2927 = vmatprep.subr.bf16.mxu0 %v6925_v8  ;;  %2968 = vmatprep.subr.bf16.mxu1 %v6926_v31  ;;  %v6936_v8 = vld [vmem:[#allocation29_spill] sm:$0xff]  ;;  %v6937_v31 = vld [vmem:[#allocation16_spill] sm:$0xff] }
 0x7fb   :  { %2928 = vmatpush1.bf16.msra.mxu0 %v6927_v23  ;;  %2969 = vmatpush1.bf16.msra.mxu1 %v6928_v60  ;;  %v6938_v23 = vld [vmem:[#allocation31_spill] sm:$0xff]  ;;  %v6939_v60 = vld [vmem:[#allocation18_spill] sm:$0xff] }
 0x7fc   :  { %2929 = vmatprep.subr.bf16.mxu0 %v6929_v51  ;;  %2970 = vmatprep.subr.bf16.mxu1 %v6930_v38  ;;  %v6940_v51 = vld [vmem:[#allocation33_spill] sm:$0xff]  ;;  %v6941_v38 = vld [vmem:[#allocation20_spill] sm:$0xff] }
 0x7ff   :  { %2930 = vmatpush1.bf16.msra.mxu0 %v6931_v17  ;;  %2971 = vmatpush1.bf16.msra.mxu1 %v6932_v20  ;;  %v6942_v17 = vld [vmem:[#allocation35_spill] sm:$0xff]  ;;  %v6943_v20 = vld [vmem:[#allocation22_spill] sm:$0xff] }
 0x800   :  { %2931 = vmatprep.subr.bf16.mxu0 %v6933_v59  ;;  %2972 = vmatprep.subr.bf16.mxu1 %v6934_v24  ;;  %v6944_v59 = vld [vmem:[#allocation37_spill] sm:$0xff]  ;;  %v6945_v24 = vld [vmem:[#allocation24_spill] sm:$0xff] }
 0x803   :  { %2932 = vmatpush1.bf16.msra.mxu0 %v6935_v12  ;;  %2973 = vmatpush1.bf16.msra.mxu1 %v6936_v8  ;;  %v6946_v12 = vld [vmem:[#allocation39_spill] sm:$0xff]  ;;  %v6947_v8 = vld [vmem:[#allocation26_spill] sm:$0xff] }
 0x804   :  { %2933 = vmatprep.subr.bf16.mxu0 %v6937_v31  ;;  %2974 = vmatprep.subr.bf16.mxu1 %v6938_v23  ;;  %v6948_v31 = vld [vmem:[#allocation41_spill] sm:$0xff]  ;;  %v6949_v23 = vld [vmem:[#allocation28_spill] sm:$0xff] }
 0x807   :  { %2934 = vmatpush1.bf16.msra.mxu0 %v6939_v60  ;;  %2975 = vmatpush1.bf16.msra.mxu1 %v6940_v51  ;;  %v6950_v60 = vld [vmem:[#allocation43_spill] sm:$0xff]  ;;  %v6951_v51 = vld [vmem:[#allocation30_spill] sm:$0xff] }
 0x808   :  { %2935 = vmatprep.subr.bf16.mxu0 %v6941_v38  ;;  %2976 = vmatprep.subr.bf16.mxu1 %v6942_v17  ;;  %v6952_v38 = vld [vmem:[#allocation45_spill] sm:$0xff]  ;;  %v6953_v17 = vld [vmem:[#allocation32_spill] sm:$0xff] }
 0x80b   :  { %2936 = vmatpush1.bf16.msra.mxu0 %v6943_v20  ;;  %2977 = vmatpush1.bf16.msra.mxu1 %v6944_v59  ;;  %v6954_v20 = vld [vmem:[#allocation47_spill] sm:$0xff]  ;;  %v6955_v59 = vld [vmem:[#allocation34_spill] sm:$0xff] }
 0x80c   :  { %2937 = vmatprep.subr.bf16.mxu0 %v6945_v24  ;;  %2978 = vmatprep.subr.bf16.mxu1 %v6946_v12  ;;  %v6956_v24 = vld [vmem:[#allocation49_spill] sm:$0xff]  ;;  %v6957_v12 = vld [vmem:[#allocation36_spill] sm:$0xff] }
 0x80f   :  { %2938 = vmatpush1.bf16.msra.mxu0 %v6947_v8  ;;  %2979 = vmatpush1.bf16.msra.mxu1 %v6948_v31  ;;  %v6958_v8 = vld [vmem:[#allocation51_spill] sm:$0xff]  ;;  %v6959_v31 = vld [vmem:[#allocation38_spill] sm:$0xff] }
 0x810   :  { %2939 = vmatprep.subr.bf16.mxu0 %v6949_v23  ;;  %2980 = vmatprep.subr.bf16.mxu1 %v6950_v60  ;;  %v6960_v23 = vld [vmem:[#allocation53_spill] sm:$0xff]  ;;  %v6961_v60 = vld [vmem:[#allocation40_spill] sm:$0xff] }
 0x813   :  { %2940 = vmatpush1.bf16.msra.mxu0 %v6951_v51  ;;  %2981 = vmatpush1.bf16.msra.mxu1 %v6952_v38  ;;  %v6962_v51 = vld [vmem:[#allocation55_spill] sm:$0xff]  ;;  %v6963_v38 = vld [vmem:[#allocation42_spill] sm:$0xff] }
 0x814   :  { %2941 = vmatprep.subr.bf16.mxu0 %v6953_v17  ;;  %2982 = vmatprep.subr.bf16.mxu1 %v6954_v20  ;;  %v6964_v17 = vld [vmem:[#allocation57_spill] sm:$0xff]  ;;  %v6965_v20 = vld [vmem:[#allocation44_spill] sm:$0xff] }
 0x817   :  { %2942 = vmatpush2.bf16.msra.mxu0 %v6955_v59  ;;  %2983 = vmatpush2.bf16.msra.mxu1 %v6956_v24  ;;  %v6966_v59 = vld [vmem:[#allocation59_spill] sm:$0xff]  ;;  %v6967_v24 = vld [vmem:[#allocation46_spill] sm:$0xff] }
 0x818   :  { %2943 = vmatprep.subr.bf16.mxu0 %v6957_v12  ;;  %2984 = vmatprep.subr.bf16.mxu1 %v6958_v8  ;;  %v6968_v12 = vld [vmem:[#allocation61_spill] sm:$0xff]  ;;  %v6969_v8 = vld [vmem:[#allocation48_spill] sm:$0xff] }
 0x81b   :  { %2944 = vmatpush2.bf16.msra.mxu0 %v6959_v31  ;;  %2985 = vmatpush2.bf16.msra.mxu1 %v6960_v23  ;;  %v6970_v31 = vld [vmem:[#allocation63_spill] sm:$0xff]  ;;  %v6971_v23 = vld [vmem:[#allocation50_spill] sm:$0xff] }
 0x81c   :  { %2945 = vmatprep.subr.bf16.mxu0 %v6961_v60  ;;  %2986 = vmatprep.subr.bf16.mxu1 %v6962_v51  ;;  %v6972_v60 = vld [vmem:[#allocation65_spill] sm:$0xff]  ;;  %v6973_v51 = vld [vmem:[#allocation52_spill] sm:$0xff] }
 0x81f   :  { %2946 = vmatpush2.bf16.msra.mxu0 %v6963_v38  ;;  %2987 = vmatpush2.bf16.msra.mxu1 %v6964_v17  ;;  %v6974_v38 = vld [vmem:[#allocation67_spill] sm:$0xff]  ;;  %v6975_v17 = vld [vmem:[#allocation54_spill] sm:$0xff] }
 0x820   :  { %2947 = vmatprep.subr.bf16.mxu0 %v6965_v20  ;;  %2988 = vmatprep.subr.bf16.mxu1 %v6966_v59  ;;  %v6976_v20 = vld [vmem:[#allocation69_spill] sm:$0xff]  ;;  %v6977_v59 = vld [vmem:[#allocation56_spill] sm:$0xff] }
 0x823   :  { %2948 = vmatpush2.bf16.msra.mxu0 %v6967_v24  ;;  %2989 = vmatpush2.bf16.msra.mxu1 %v6968_v12  ;;  %v6978_v24 = vld [vmem:[#allocation71_spill] sm:$0xff]  ;;  %v6979_v12 = vld [vmem:[#allocation58_spill] sm:$0xff] }
 0x824   :  { %2949 = vmatprep.subr.bf16.mxu0 %v6969_v8  ;;  %2990 = vmatprep.subr.bf16.mxu1 %v6970_v31  ;;  %v6980_v8 = vld [vmem:[#allocation73_spill] sm:$0xff]  ;;  %v6981_v31 = vld [vmem:[#allocation60_spill] sm:$0xff] }
 0x827   :  { %2950 = vmatpush2.bf16.msra.mxu0 %v6971_v23  ;;  %2991 = vmatpush2.bf16.msra.mxu1 %v6972_v60  ;;  %v6982_v23 = vld [vmem:[#allocation75_spill] sm:$0xff]  ;;  %v6983_v60 = vld [vmem:[#allocation62_spill] sm:$0xff] }
 0x828   :  { %2951 = vmatprep.subr.bf16.mxu0 %v6973_v51  ;;  %2992 = vmatprep.subr.bf16.mxu1 %v6974_v38  ;;  %v6984_v51 = vld [vmem:[#allocation77_spill] sm:$0xff]  ;;  %v6985_v38 = vld [vmem:[#allocation64_spill] sm:$0xff] }
 0x82b   :  { %2952 = vmatpush2.bf16.msra.mxu0 %v6975_v17  ;;  %2993 = vmatpush2.bf16.msra.mxu1 %v6976_v20  ;;  %v6986_v17 = vld [vmem:[#allocation79_spill] sm:$0xff] }
 0x82c   :  { %2953 = vmatprep.subr.bf16.mxu0 %v6977_v59  ;;  %2994 = vmatprep.subr.bf16.mxu1 %v6978_v24  ;;  %v2827_v20 = vld [vmem:[#allocation3 + $0x40] sm:$0x30]  ;;  %v2828_v59 = vld [vmem:[#allocation3 + $0x30] sm:$0x30] }
 0x82d   :  { %v2835_v37 = vrot.slane %v2827_v20, 4  ;;  %v2836_v62 = vrot.slane %v2828_v59, 4  ;;  %v2837_v20 = vrot.slane %v2829_v10, 4 }
 0x82f   :  { %2954 = vmatpush2.bf16.msra.mxu0 %v6979_v12  ;;  %2995 = vmatpush2.bf16.msra.mxu1 %v6980_v8 }
 0x830   :  { %2955 = vmatprep.subr.bf16.mxu0 %v6981_v31  ;;  %2996 = vmatprep.subr.bf16.mxu1 %v6982_v23 }
 0x833   :  { %2956 = vmatpush2.bf16.msra.mxu0 %v6983_v60  ;;  %2997 = vmatpush2.bf16.msra.mxu1 %v6984_v51 }
 0x834   :  { %3007 = vmatprep.subr.bf16.mxu0 %v6985_v38  ;;  %3048 = vmatprep.subr.bf16.mxu1 %v6986_v17  ;;  %v2830_v38 = vld [vmem:[#allocation3 + $0x28] sm:$0x30] }
 0x835   :  { %v2838_v17 = vrot.slane %v2830_v38, 4 }
 0x876   :  { %v2697_v24 = vpop.f32.mrf.mxu0  ;;  %v2738_v35 = vpop.f32.mrf.mxu1 }
 0x877   :  { %v2843_v12 = vadd.f32 %v2835_v37, %v2697_v24  ;;  %v2845_v37 = vadd.f32 %v2837_v20, %v2738_v35  ;;  %v2848_v35 = vld [vmem:[#allocation3 + $0x8] sm:$0xc] }
 0x878   :  { %v2699_v8 = vpop.f32.mrf.mxu0  ;;  %v2740_v29 = vpop.f32.mrf.mxu1 }
 0x879   :  { %v3652_v31 = vmul.f32 -1.442695, %v2843_v12  ;;  %v2844_v50 = vadd.f32 %v2836_v62, %v2699_v8  ;;  %v2846_v9 = vadd.f32 %v2838_v17, %v2740_v29 }
 0x87a   :  { %v2701_v23 = vpop.f32.mrf.mxu0  ;;  %v2742_v27 = vpop.f32.mrf.mxu1 }
 0x87b   :  { %3943 = vpow2.f32 %v3652_v31  ;;  %v3653_v60 = vmul.f32 -1.442695, %v2844_v50  ;;  %v3654_v41 = vmul.f32 -1.442695, %v2846_v9  ;;  %v6987_v23 = vld [vmem:[#allocation70_spill] sm:$0xff] }
 0x87c   :  { %v2702_v51 = vpop.f32.mrf.mxu0  ;;  %v2743_v26 = vpop.f32.mrf.mxu1  ;;  %v2847_v9 = vld [vmem:[#allocation3 + $0x20] sm:$0xc] }
 0x87d   :  { %3945 = vpow2.f32 %v3653_v60  ;;  %v2855_v51 = vrot.slane %v2847_v9, 2 }
 0x87e   :  { %3947 = vpow2.f32 %v3654_v41 }
 0x888   :  { %v3944_v30 = vpop.eup %3943 }
 0x889   :  { %v2870_v59 = vadd.f32 1.0, %v3944_v30 }
 0x88a   :  { %v3946_v24 = vpop.eup %3945 }
 0x88b   :  { %3949 = vrcp.f32 %v2870_v59  ;;  %v2876_v62 = vadd.f32 1.0, %v3946_v24  ;;  %v3948_v27 = vpop.eup %3947 }
 0x88c   :  { %3951 = vtanh.f32 %v2845_v37  ;;  %v2883_v8 = vadd.f32 1.0, %v3948_v27  ;;  %v2856_v37 = vrot.slane %v2848_v35, 2 }
 0x88d   :  { %3953 = vrcp.f32 %v2876_v62 }
 0x88e   :  { %3955 = vrcp.f32 %v2883_v8 }
 0x898   :  { %v3950_v50 = vpop.eup %3949 }
 0x899   :  { %v3952_v12 = vpop.eup %3951 }
 0x89a   :  { %v3954_v26 = vpop.eup %3953  ;;  %v2906_v31 = vmul.f32 %v3952_v12, %v3950_v50 }
 0x89b   :  { %v2905_v29 = vmul.f32 %v3954_v26, %v6987_v23  ;;  %v3956_v30 = vpop.eup %3955  ;;  %v2850_v23 = vld [vmem:[#allocation3 + $0x10] sm:$0xc] }
 0x89d   :  { %v5853_v60 = vadd.f32 %v2906_v31, %v2905_v29  ;;  %v2858_v29 = vrot.slane %v2850_v23, 2  ;;  %v4034_v23 = vmov 0.0  }
 0x89f   :  { %6988 = vst [vmem:[#allocation85_spill] sm:$0xff] %v5853_v60  ;;  %3957 = vtanh.f32 %v5853_v60 }
 0x8ac   :  { %v3958_v10 = vpop.eup %3957 }
 0x8ad   :  { %v2912_v41 = vmul.f32 %v3958_v10, %v3956_v30  ;;  %v2849_v10 = vld [vmem:[#allocation3 + $0x70] sm:$0xc] }
 0x8ae   :  { %v2857_v9 = vrot.slane %v2849_v10, 2  ;;  %v3090_v10 = vld [vmem:[#allocation3 + $0x30] sm:$0xc0] }
 0x8b6   :  { %v2779_v38 = vpop.f32.mrf.mxu0  ;;  %v2820_v17 = vpop.f32.mrf.mxu1 }
 0x8b7   :  { %v2863_v20 = vadd.f32 %v2855_v51, %v2779_v38  ;;  %v2865_v51 = vadd.f32 %v2857_v9, %v2820_v17 }
 0x8b8   :  { %v2781_v59 = vpop.f32.mrf.mxu0  ;;  %v2822_v24 = vpop.f32.mrf.mxu1 }
 0x8b9   :  { %v3655_v62 = vmul.f32 -1.442695, %v2863_v20  ;;  %v2864_v27 = vadd.f32 %v2856_v37, %v2781_v59  ;;  %v2866_v30 = vadd.f32 %v2858_v29, %v2822_v24  ;;  %v3748_v29 = vld [vmem:[%s6013_s6 + $0x10] sm:$0xff]  }
 0x8ba   :  { %v2783_v50 = vpop.f32.mrf.mxu0  ;;  %v2824_v12 = vpop.f32.mrf.mxu1 }
 0x8bb   :  { %3959 = vpow2.f32 %v3655_v62  ;;  %v3656_v26 = vmul.f32 -1.442695, %v2864_v27  ;;  %v3657_v60 = vmul.f32 -1.442695, %v2866_v30  ;;  %v3089_v30 = vld [vmem:[#allocation3 + $0x40] sm:$0xc0] }
 0x8bc   :  { %v2784_v8 = vpop.f32.mrf.mxu0  ;;  %v2825_v31 = vpop.f32.mrf.mxu1  ;;  %v3097_v9 = vrot.slane %v3089_v30, 6 }
 0x8bd   :  { %3961 = vpow2.f32 %v3656_v26  ;;  %v5860_v31 = vpack.c.bf16 %v2912_v41, %v2912_v41  ;;  %v3747_v41 = vld [vmem:[%s6013_s6 + $0x18] sm:$0xff]  }
 0x8be   :  { %3963 = vpow2.f32 %v3657_v60 }
 0x8c8   :  { %v3960_v52 = vpop.eup %3959 }
 0x8c9   :  { %v2889_v35 = vadd.f32 1.0, %v3960_v52 }
 0x8ca   :  { %v3962_v38 = vpop.eup %3961 }
 0x8cb   :  { %3965 = vrcp.f32 %v2889_v35  ;;  %v2895_v20 = vadd.f32 1.0, %v3962_v38  ;;  %v3964_v37 = vpop.eup %3963 }
 0x8cc   :  { %3967 = vtanh.f32 %v2865_v51  ;;  %v2902_v50 = vadd.f32 1.0, %v3964_v37 }
 0x8cd   :  { %3969 = vrcp.f32 %v2895_v20  ;;  %v3098_v20 = vrot.slane %v3090_v10, 6 }
 0x8ce   :  { %3971 = vrcp.f32 %v2902_v50 }
 0x8d8   :  { %v3966_v59 = vpop.eup %3965 }
 0x8d9   :  { %v3968_v62 = vpop.eup %3967 }
 0x8da   :  { %v3970_v27 = vpop.eup %3969  ;;  %v2909_v12 = vmul.f32 %v3968_v62, %v3966_v59 }
 0x8db   :  { %v2908_v24 = vmul.f32 %v3970_v27, %v5715_v0  ;;  %v3972_v52 = vpop.eup %3971  ;;  %v3746_v0 = vld [vmem:[%s6011_s4] sm:$0xff]  }
 0x8dd   :  { %v5857_v26 = vadd.f32 %v2909_v12, %v2908_v24 }
 0x8df   :  { %3973 = vtanh.f32 %v5857_v26 }
 0x8ec   :  { %v3974_v17 = vpop.eup %3973 }
 0x8ed   :  { %v2914_v60 = vmul.f32 %v3974_v17, %v3972_v52 }
 0x8ef   :  { %v2924_v8 = vpack.c.bf16 %v2914_v60, %v2914_v60  ;;  %v3092_v60 = vld [vmem:[#allocation3 + $0x28] sm:$0xc0] }
 0x8f1   :  { %2957 = vmatprep.mubr.bf16.mxu0 %v2924_v8  ;;  %2998 = vmatprep.mubr.bf16.mxu1 %v2924_v8 }
 0x8f2   :  { %2958 = vmatmul.mubr.bf16.vlgmr.msra.gmra.mxu0 %v5860_v31  ;;  %2999 = vmatmul.mubr.bf16.vlgmr.msra.gmra.mxu1 %v5860_v31 }
 0x8f3   :  { %3008 = vmatpush1.bf16.msra.mxu0 %v6452_v3  ;;  %3049 = vmatpush1.bf16.msra.mxu1 %v6453_v43  ;;  %v6989_v3 = vld [vmem:[#allocation106_spill] sm:$0xff]  ;;  %v6990_v43 = vld [vmem:[#allocation121_spill] sm:$0xff] }
 0x8f4   :  { %3039 = vmatprep.mubr.bf16.mxu0 %v2924_v8  ;;  %3080 = vmatprep.mubr.bf16.mxu1 %v2924_v8  ;;  %v3100_v8 = vrot.slane %v3092_v60, 6  ;;  %v3664_v60 = vld [vmem:[%s6012_s5] ss:$0 sm:$0xff]  ;;  %s4036_s5 = smov [#allocation4]  }
 0x8f5   :  { %3009 = vmatprep.subr.bf16.mxu0 %v6454_v33  ;;  %3050 = vmatprep.subr.bf16.mxu1 %v6455_v25  ;;  %v6991_v33 = vld [vmem:[#allocation108_spill] sm:$0xff]  ;;  %v6992_v25 = vld [vmem:[#allocation123_spill] sm:$0xff] }
 0x8f7   :  { %3010 = vmatpush1.bf16.msra.mxu0 %v6456_v48  ;;  %3051 = vmatpush1.bf16.msra.mxu1 %v6457_v18  ;;  %v6993_v48 = vld [vmem:[#allocation110_spill] sm:$0xff]  ;;  %v6994_v18 = vld [vmem:[#allocation125_spill] sm:$0xff] }
 0x8f8   :  { %3011 = vmatprep.subr.bf16.mxu0 %v6458_v2  ;;  %3052 = vmatprep.subr.bf16.mxu1 %v6459_v36  ;;  %v6995_v2 = vld [vmem:[#allocation112_spill] sm:$0xff]  ;;  %v6996_v36 = vld [vmem:[#allocation127_spill] sm:$0xff] }
 0x8fb   :  { %3012 = vmatpush1.bf16.msra.mxu0 %v6460_v28  ;;  %3053 = vmatpush1.bf16.msra.mxu1 %v6540_v40  ;;  %v6997_v28 = vld [vmem:[#allocation114_spill] sm:$0xff] }
 0x8fc   :  { %3013 = vmatprep.subr.bf16.mxu0 %v6541_v5  ;;  %3054 = vmatprep.subr.bf16.mxu1 %v6542_v63  ;;  %v7002_v40 = vld [vmem:[#allocation130_spill] sm:$0xff]  ;;  %v7003_v5 = vld [vmem:[#allocation120_spill] sm:$0xff]  ;;  %v7004_v63 = vld [vmem:[#allocation131_spill] sm:$0xff] }
 0x8ff   :  { %3014 = vmatpush1.bf16.msra.mxu0 %v6543_v21  ;;  %3055 = vmatpush1.bf16.msra.mxu1 %v6544_v39  ;;  %v3171_v21 = vld [vmem:[#allocation2] sm:$0xc0]  ;;  %v7005_v39 = vld [vmem:[#allocation122_spill] sm:$0xff] }
 0x900   :  { %3015 = vmatprep.subr.bf16.mxu0 %v6545_v45  ;;  %3056 = vmatprep.subr.bf16.mxu1 %v6546_v6  ;;  %v7006_v45 = vld [vmem:[#allocation132_spill] sm:$0xff] }
 0x901   :  { %v7007_v6 = vld [vmem:[#allocation124_spill] sm:$0xff] }
 0x903   :  { %3016 = vmatpush1.bf16.msra.mxu0 %v6547_v34  ;;  %3057 = vmatpush1.bf16.msra.mxu1 %v6548_v13  ;;  %v7008_v34 = vld [vmem:[#allocation133_spill] sm:$0xff]  ;;  %v3173_v13 = vpack.c.bf16 %v3171_v21, %v3171_v21 }
 0x904   :  { %3017 = vmatprep.subr.bf16.mxu0 %v6549_v44  ;;  %3058 = vmatprep.subr.bf16.mxu1 %v6550_v58  ;;  %v7009_v44 = vld [vmem:[#allocation126_spill] sm:$0xff] }
 0x905   :  { %v7010_v58 = vld [vmem:[#allocation134_spill] sm:$0xff] }
 0x907   :  { %3018 = vmatpush1.bf16.msra.mxu0 %v6551_v7  ;;  %3059 = vmatpush1.bf16.msra.mxu1 %v6552_v16  ;;  %v3216_v7 = vrot.slane %v3173_v13, 3  ;;  %v3731_v16 = vld [vmem:[%s6011_s4 + $0x78] sm:$0xff]  }
 0x908   :  { %3019 = vmatprep.subr.bf16.mxu0 %v6553_v55  ;;  %3060 = vmatprep.subr.bf16.mxu1 %v6554_v14  ;;  %v3732_v55 = vld [vmem:[%s6011_s4 + $0x38] sm:$0xff]   ;;  %v3733_v14 = vld [vmem:[%s6011_s4 + $0x70] sm:$0xff]  }
 0x90b   :  { %3020 = vmatpush1.bf16.msra.mxu0 %v6555_v53  ;;  %3061 = vmatpush1.bf16.msra.mxu1 %v6556_v15  ;;  %v3734_v53 = vld [vmem:[%s6011_s4 + $0x30] sm:$0xff]   ;;  %v3735_v15 = vld [vmem:[%s6011_s4 + $0x68] sm:$0xff]  }
 0x90c   :  { %3021 = vmatprep.subr.bf16.mxu0 %v6630_v47  ;;  %3062 = vmatprep.subr.bf16.mxu1 %v6557_v42  ;;  %v3736_v42 = vld [vmem:[%s6011_s4 + $0x28] sm:$0xff]   ;;  %v3741_v47 = vld [vmem:[%s6011_s4 + $0x50] sm:$0xff]  }
 0x90f   :  { %3022 = vmatpush1.bf16.msra.mxu0 %v6631_v1  ;;  %3063 = vmatpush1.bf16.msra.mxu1 %v6558_v4  ;;  %v3737_v4 = vld [vmem:[%s6011_s4 + $0x60] sm:$0xff]   ;;  %v3742_v1 = vld [vmem:[%s6011_s4 + $0x10] sm:$0xff]  }
 0x910   :  { %3023 = vmatprep.subr.bf16.mxu0 %v6632_v49  ;;  %3064 = vmatprep.subr.bf16.mxu1 %v6559_v19  ;;  %v3738_v19 = vld [vmem:[%s6011_s4 + $0x20] sm:$0xff]   ;;  %v3743_v49 = vld [vmem:[%s6011_s4 + $0x48] sm:$0xff]  }
 0x913   :  { %3024 = vmatpush2.bf16.msra.mxu0 %v6633_v54  ;;  %3065 = vmatpush2.bf16.msra.mxu1 %v6560_v32  ;;  %v3739_v32 = vld [vmem:[%s6011_s4 + $0x58] sm:$0xff]   ;;  %v3744_v54 = vld [vmem:[%s6011_s4 + $0x8] sm:$0xff]  }
 0x914   :  { %3025 = vmatprep.subr.bf16.mxu0 %v6486_v46  ;;  %3066 = vmatprep.subr.bf16.mxu1 %v6561_v61  ;;  %v6998_v46 = vld [vmem:[#allocation128_spill] sm:$0xff]  ;;  %v3740_v61 = vld [vmem:[%s6011_s4 + $0x18] sm:$0xff]  }
 0x917   :  { %3026 = vmatpush2.bf16.msra.mxu0 %v6488_v22  ;;  %3067 = vmatpush2.bf16.msra.mxu1 %v6562_v57  ;;  %v6999_v22 = vld [vmem:[#allocation116_spill] sm:$0xff]  ;;  %v7000_v57 = vld [vmem:[#allocation129_spill] sm:$0xff] }
 0x918   :  { %3027 = vmatprep.subr.bf16.mxu0 %v6634_v56  ;;  %3068 = vmatprep.subr.bf16.mxu1 %v6563_v11  ;;  %v7001_v11 = vld [vmem:[#allocation118_spill] sm:$0xff] }
 0x919   :  { %v3745_v56 = vld [vmem:[%s6011_s4 + $0x40] sm:$0xff]  }
 0x91b   :  { %3028 = vmatpush2.bf16.msra.mxu0 %v6989_v3  ;;  %3069 = vmatpush2.bf16.msra.mxu1 %v6990_v43  ;;  %v3091_v3 = vld [vmem:[#allocation3 + $0x68] sm:$0xc0] }
 0x91c   :  { %3029 = vmatprep.subr.bf16.mxu0 %v6991_v33  ;;  %3070 = vmatprep.subr.bf16.mxu1 %v6992_v25  ;;  %v3099_v43 = vrot.slane %v3091_v3, 6 }
 0x91f   :  { %3030 = vmatpush2.bf16.msra.mxu0 %v6993_v48  ;;  %3071 = vmatpush2.bf16.msra.mxu1 %v6994_v18 }
 0x920   :  { %3031 = vmatprep.subr.bf16.mxu0 %v6995_v2  ;;  %3072 = vmatprep.subr.bf16.mxu1 %v6996_v36 }
 0x923   :  { %3032 = vmatpush2.bf16.msra.mxu0 %v6997_v28  ;;  %3073 = vmatpush2.bf16.msra.mxu1 %v6998_v46 }
 0x924   :  { %3033 = vmatprep.subr.bf16.mxu0 %v6999_v22  ;;  %3074 = vmatprep.subr.bf16.mxu1 %v7000_v57 }
 0x927   :  { %3034 = vmatpush2.bf16.msra.mxu0 %v7001_v11  ;;  %3075 = vmatpush2.bf16.msra.mxu1 %v7002_v40 }
 0x928   :  { %3035 = vmatprep.subr.bf16.mxu0 %v7003_v5  ;;  %3076 = vmatprep.subr.bf16.mxu1 %v7004_v63  ;;  %v7011_v5 = vld [vmem:[#allocation85_spill] sm:$0xff] }
 0x92b   :  { %3036 = vmatpush2.bf16.msra.mxu0 %v7005_v39  ;;  %3077 = vmatpush2.bf16.msra.mxu1 %v7006_v45 }
 0x92c   :  { %3037 = vmatprep.subr.bf16.mxu0 %v7007_v6  ;;  %3078 = vmatprep.subr.bf16.mxu1 %v7008_v34 }
 0x92f   :  { %3038 = vmatpush2.bf16.msra.mxu0 %v7009_v44  ;;  %3079 = vmatpush2.bf16.msra.mxu1 %v7010_v58  ;;  %v3109_v44 = vld [vmem:[#allocation3 + $0x20] sm:$0x3] }
 0x930   :  { %3687 = vmatprep.subr.bf16.mxu0 %v3731_v16  ;;  %3714 = vmatprep.subr.bf16.mxu1 %v4034_v23 }
 0x932   :  { %3040 = vmatmul.mubr.bf16.vlgmr.msra.gmra.mxu0 %v5860_v31  ;;  %3081 = vmatmul.mubr.bf16.vlgmr.msra.gmra.mxu1 %v5860_v31 }
 0x933   :  { %3347 = vmatprep.mubr.bf16.mxu0 %v3216_v7  ;;  %3688 = vmatpush3.bf16.msra.mxu0 %v3732_v55  ;;  %v3110_v55 = vld [vmem:[#allocation3 + $0x8] sm:$0x3] }
 0x934   :  { %3689 = vmatprep.subr.bf16.mxu0 %v3733_v14  ;;  %3715 = vmatpush3.bf16.msra.mxu1 %v3747_v41  ;;  %v3111_v41 = vld [vmem:[#allocation3 + $0x70] sm:$0x3] }
 0x935   :  { %3716 = vmatprep.subr.bf16.mxu1 %v4034_v23  ;;  %3722 = vmatprep.mubr.msk.bf16.mxu1 %vm4035_vm1, %v4034_v23 }
 0x937   :  { %3690 = vmatpush3.bf16.msra.mxu0 %v3734_v53 }
 0x938   :  { %3691 = vmatprep.subr.bf16.mxu0 %v3735_v15  ;;  %3717 = vmatpush3.bf16.msra.mxu1 %v3748_v29 }
 0x939   :  { %3718 = vmatprep.subr.bf16.mxu1 %v4034_v23 }
 0x93b   :  { %3692 = vmatpush3.bf16.msra.mxu0 %v3736_v42 }
 0x93c   :  { %3693 = vmatprep.subr.bf16.mxu0 %v3737_v4 }
 0x93f   :  { %3694 = vmatpush3.bf16.msra.mxu0 %v3738_v19 }
 0x940   :  { %3695 = vmatprep.subr.bf16.mxu0 %v3739_v32 }
 0x943   :  { %3696 = vmatpush3.bf16.msra.mxu0 %v3740_v61 }
 0x944   :  { %3697 = vmatprep.subr.bf16.mxu0 %v3741_v47 }
 0x947   :  { %3698 = vmatpush3.bf16.msra.mxu0 %v3742_v1 }
 0x948   :  { %3699 = vmatprep.subr.bf16.mxu0 %v3743_v49 }
 0x94b   :  { %3700 = vmatpush3.bf16.msra.mxu0 %v3744_v54  ;;  %v3112_v54 = vld [vmem:[#allocation3 + $0x10] sm:$0x3] }
 0x94c   :  { %3701 = vmatprep.subr.bf16.mxu0 %v3745_v56 }
 0x94f   :  { %3702 = vmatpush3.bf16.msra.mxu0 %v3746_v0 }
 0x9b2   :  { %v2959_v51 = vpop.f32.mrf.mxu0  ;;  %v3000_v35 = vpop.f32.mrf.mxu1 }
 0x9b3   :  { %v3105_v38 = vadd.f32 %v3097_v9, %v2959_v51  ;;  %v3107_v48 = vadd.f32 %v3099_v43, %v3000_v35 }
 0x9b4   :  { %v2961_v37 = vpop.f32.mrf.mxu0  ;;  %v3002_v59 = vpop.f32.mrf.mxu1 }
 0x9b5   :  { %v3658_v62 = vmul.f32 -1.442695, %v3105_v38  ;;  %v3106_v27 = vadd.f32 %v3098_v20, %v2961_v37  ;;  %v3108_v31 = vadd.f32 %v3100_v8, %v3002_v59 }
 0x9b6   :  { %v2963_v50 = vpop.f32.mrf.mxu0  ;;  %v3004_v12 = vpop.f32.mrf.mxu1 }
 0x9b7   :  { %3975 = vpow2.f32 %v3658_v62  ;;  %v3659_v24 = vmul.f32 -1.442695, %v3106_v27  ;;  %v3660_v33 = vmul.f32 -1.442695, %v3108_v31 }
 0x9b8   :  { %v2964_v52 = vpop.f32.mrf.mxu0  ;;  %v3005_v17 = vpop.f32.mrf.mxu1 }
 0x9b9   :  { %3977 = vpow2.f32 %v3659_v24  ;;  %v3749_v52 = vld [vmem:[%s6013_s6 + $0x8] sm:$0xff]   ;;  %v3750_v17 = vld [vmem:[%s6013_s6] sm:$0xff]   ;;  %s3459_s6 = sshll.u32 %s4036_s5, 4  ;;  %s3460_s6 = int_to_ptr.vmem [resolvable:$true] %s3459_s6 }
 0x9ba   :  { %3979 = vpow2.f32 %v3660_v33  ;;  %3719 = vmatpush3.bf16.msra.mxu1 %v3749_v52  ;;  %p4016_p1 = scmp.lt.s32.totalorder %s3460_s6, %s3460_s6 }
 0x9bb   :  { %3720 = vmatprep.subr.bf16.mxu1 %v4034_v23 }
 0x9be   :  { %3721 = vmatpush3.bf16.msra.mxu1 %v3750_v17 }
 0x9c4   :  { %v3976_v25 = vpop.eup %3975 }
 0x9c5   :  { %v3120_v18 = vadd.f32 1.0, %v3976_v25 }
 0x9c6   :  { %v3978_v2 = vpop.eup %3977 }
 0x9c7   :  { %3981 = vrcp.f32 %v3120_v18  ;;  %v3126_v36 = vadd.f32 1.0, %v3978_v2  ;;  %v3980_v28 = vpop.eup %3979 }
 0x9c8   :  { %3983 = vtanh.f32 %v3107_v48  ;;  %v3133_v11 = vadd.f32 1.0, %v3980_v28  ;;  %v3681_v48 = vld [vmem:[%s6014_s7] ss:$0 sm:$0xff]  ;;  %s4011_s7 = scalar_lea.vmem %s3460_s6, 32 }
 0x9c9   :  { %3985 = vrcp.f32 %v3126_v36  ;;  %p4012_p0 = scmp.ne.s32.totalorder %s3460_s6, %s4011_s7  ;;  %p4017_p2 = scmp.lt.s32.totalorder %s4011_s7, %s4011_s7 }
 0x9ca   :  { %3987 = vrcp.f32 %v3133_v11 }
 0x9cb   :  { %p4018_p3 = por %p4017_p2, %p4016_p1 }
 0x9cd   :  { %p4019_p4 = pnand %p4018_p3, %p4012_p0 }
 0x9d4   :  { %v3982_v46 = vpop.eup %3981 }
 0x9d5   :  { %v3984_v22 = vpop.eup %3983 }
 0x9d6   :  { %v3986_v57 = vpop.eup %3985  ;;  %v3156_v40 = vmul.f32 %v3984_v22, %v3982_v46 }
 0x9d7   :  { %v3155_v63 = vmul.f32 %v3986_v57, %v7011_v5  ;;  %v3988_v39 = vpop.eup %3987 }
 0x9d9   :  { %v3157_v21 = vadd.f32 %v3156_v40, %v3155_v63 }
 0x9db   :  { %3989 = vtanh.f32 %v3157_v21 }
 0x9e8   :  { %v3990_v45 = vpop.eup %3989 }
 0x9e9   :  { %v3162_v6 = vmul.f32 %v3990_v45, %v3988_v39 }
 0x9eb   :  { %v3166_v34 = vrot.slane %v3162_v6, 2 }
 0x9ed   :  { %3168 = vst [vmem:[#allocation2 + $0x8] sm:$0xc0] %v3166_v34 }
 0x9f2   :  { %v3041_v13 = vpop.f32.mrf.mxu0  ;;  %v3082_v58 = vpop.f32.mrf.mxu1 }
 0x9f3   :  { %v3113_v7 = vadd.f32 %v3109_v44, %v3041_v13  ;;  %v3115_v30 = vadd.f32 %v3111_v41, %v3082_v58 }
 0x9f4   :  { %v3043_v16 = vpop.f32.mrf.mxu0  ;;  %v3084_v14 = vpop.f32.mrf.mxu1  ;;  %v3170_v53 = vld [vmem:[#allocation2 + $0x8] sm:$0xc0] }
 0x9f5   :  { %v3661_v15 = vmul.f32 -1.442695, %v3113_v7  ;;  %v3114_v42 = vadd.f32 %v3110_v55, %v3043_v16  ;;  %v3172_v32 = vpack.c.bf16 %v3170_v53, %v3170_v53  ;;  %v3116_v56 = vadd.f32 %v3112_v54, %v3084_v14 }
 0x9f6   :  { %v3045_v4 = vpop.f32.mrf.mxu0  ;;  %v3086_v19 = vpop.f32.mrf.mxu1 }
 0x9f7   :  { %3991 = vpow2.f32 %v3661_v15  ;;  %v3662_v61 = vmul.f32 -1.442695, %v3114_v42  ;;  %v3215_v49 = vrot.slane %v3172_v32, 3  ;;  %v3663_v0 = vmul.f32 -1.442695, %v3116_v56 }
 0x9f8   :  { %v3046_v47 = vpop.f32.mrf.mxu0  ;;  %v3087_v1 = vpop.f32.mrf.mxu1 }
 0x9f9   :  { %3993 = vpow2.f32 %v3662_v61  ;;  %3348 = vmatmul.mubr.bf16.vlgmr.msra.gmra.mxu0 %v3215_v49 }
 0x9fa   :  { %3995 = vpow2.f32 %v3663_v0 }
 0xa04   :  { %v3992_v29 = vpop.eup %3991 }
 0xa05   :  { %v3139_v10 = vadd.f32 1.0, %v3992_v29 }
 0xa06   :  { %v3994_v9 = vpop.eup %3993 }
 0xa07   :  { %3997 = vrcp.f32 %v3139_v10  ;;  %v3145_v51 = vadd.f32 1.0, %v3994_v9  ;;  %v3996_v35 = vpop.eup %3995 }
 0xa08   :  { %3999 = vtanh.f32 %v3115_v30  ;;  %v3152_v59 = vadd.f32 1.0, %v3996_v35 }
 0xa09   :  { %4001 = vrcp.f32 %v3145_v51 }
 0xa0a   :  { %4003 = vrcp.f32 %v3152_v59 }
 0xa14   :  { %v3998_v38 = vpop.eup %3997 }
 0xa15   :  { %v4000_v20 = vpop.eup %3999 }
 0xa16   :  { %v4002_v37 = vpop.eup %4001  ;;  %v3159_v62 = vmul.f32 %v4000_v20, %v3998_v38 }
 0xa17   :  { %v3158_v27 = vmul.f32 %v4002_v37, %v5857_v26  ;;  %v4004_v12 = vpop.eup %4003 }
 0xa19   :  { %v3160_v50 = vadd.f32 %v3159_v62, %v3158_v27 }
 0xa1b   :  { %4005 = vtanh.f32 %v3160_v50 }
 0xa28   :  { %v4006_v24 = vpop.eup %4005 }
 0xab9   :  { %v3703_v26 = vpop.f32.mrf.mxu0 }
 0xabb   :  { %v3704_v8 = vpop.f32.mrf.mxu0 }
 0xabc   :  { %v3705_v31 = vadd.f32 %v3704_v8, %v3703_v26 }
 0xabd   :  { %v3706_v3 = vpop.f32.mrf.mxu0 }
 0xabe   :  { %v3350_v43 = vadd.f32 %v3705_v31, %v3664_v60 }
 0xabf   :  { %v3707_v33 = vpop.f32.mrf.mxu0 }
 0xac0   :  { %v3355_v25 = vpack.c.bf16 %v3350_v43, %v3350_v43 }
 0xac2   :  { %3723 = vmatmul.mubr.msk.bf16.vlgmr.msra.gmra.mxu1 %vm3395_vm2, %v3355_v25 }
 0xb82   :  { %v3433_v18 = vpop.f32.mrf.mxu1 }
 0xb83   :  { %v3434_v23 = vadd.f32 %v3681_v48, %v3433_v18 }
 0xb84   :  { %v3724_v2 = vpop.f32.mrf.mxu1 }
 0xb85   :  { %v3440_v36 = vsel %vm3439_vm3, %v3434_v23, -inf }
 0xb86   :  { %3441 = vmax.xlane.f32.xlu0 %v3440_v36  ;;  %v3436_v28 = vpop.f32.mrf.mxu1 }
 0xb88   :  { %v3725_v46 = vpop.f32.mrf.mxu1 }
 0xc0f   :  { %v3442_v22 = vpop.xlane.xlu0 %3441 }
 0xc10   :  { %v3443_v57 = vsub.f32 %v3434_v23, %v3442_v22 }
 0xc12   :  { %v3444_v11 = vmul.f32 1.442695, %v3443_v57 }
 0xc14   :  { %4007 = vpow2.f32 %v3444_v11 }
 0xc21   :  { %v4008_v40 = vpop.eup %4007 }
 0xc22   :  { %v3446_v5 = vsel %vm3439_vm3, %v4008_v40, 0.0 }
 0xc23   :  { %3447 = vadd.xlane.f32.xlu0 %v3446_v5 }
 0xcac   :  { %v3448_v63 = vpop.xlane.xlu0 %3447 }
 0xcad   :  { %4009 = vlog2.f32 %v3448_v63 }
 0xcba   :  { %v4010_v21 = vpop.eup %4009 }
 0xcbb   :  { %v3450_v39 = vmul.f32 0.6931472, %v4010_v21 }
 0xcbd   :  { %v3451_v45 = vsub.f32 %v3443_v57, %v3450_v39 }
 0xcbf   :  { %3452 = vst.msk [vmem:[#allocation4] sm:$0x3] %vm3439_vm3, %v3451_v45 }
 0xcc0   :  { %4022 = shalt.err (!%p4019_p4)
}
 0xcc1   :  { %3462 = dma.vmem_to_hbm [thread:$0]  %s3460_s6, 32, %s6015_s8, [#allocation5]  }
 0xcc2   :  { %4031 = dma.done.wait [#allocation5], 32  }
 0xcc3   :  { %4032 = vsyncadd [#allocation5], 4294967264 }
 0xcc4   :  { %3466 = vsyncpa [#allocation5], 1 }

</bundles_post_ra>
